<compile_context>
chip_gen: v6e
topology: v6e:2x2x1
jax: 0.10.0
libtpu: 0.0.40
codegen_flags: <defaults>
</compile_context>

<pallas_src>
import functools

import jax
import jax.numpy as jnp
from jax.experimental import pallas as pl
from jax.experimental.pallas import tpu as pltpu


# ----------------------------------------------------------------------------
# Small helpers
# ----------------------------------------------------------------------------
def _round_up(x, m):
    return (x + m - 1) // m * m


def _pad_axis(x, axis, new_size):
    pad = [(0, 0)] * x.ndim
    pad[axis] = (0, new_size - x.shape[axis])
    return jnp.pad(x, pad)


def _pad_gate_cols(w, hidden, hidden_pad):
    """Zero-pad each PyTorch gate block (i|f|g|o) from H to Hp columns."""
    parts = jnp.split(w, 4, axis=-1)
    return jnp.concatenate([_pad_axis(p, -1, hidden_pad) for p in parts], axis=-1)


def _vmem_limit_bytes():
    # Per-generation sizing: ~3/4 of physical VMEM, capped at 96 MiB.
    # v5e/v6e (128 MiB) -> 96 MiB, v7x (64 MiB) -> 48 MiB.
    try:
        cap = int(pltpu.get_tpu_info().vmem_capacity_bytes)
    except Exception:
        cap = 64 * 1024 * 1024
    return max(32 * 1024 * 1024, min(cap * 3 // 4, 96 * 1024 * 1024))


def _pick_chunk(seq_len, batch_pad, hidden_pad, budget_bytes=4 * 1024 * 1024):
    """Largest divisor of S whose per-chunk f32 gate scratch fits the budget."""
    best = 1
    for tc in range(1, seq_len + 1):
        if seq_len % tc == 0 and 2 * tc * batch_pad * 4 * hidden_pad * 4 <= budget_bytes:
            best = tc
    return best


# ----------------------------------------------------------------------------
# Pallas kernel (one bidirectional LSTM layer, time-chunked grid)
# ----------------------------------------------------------------------------
def _make_layer_kernel(*, C, Tc, B, Hp, last):
    """Build the layer kernel.

    Ref layout (inputs, outputs, scratch):
      xf_0..xf_{C-1}            [Tc*B, In_c] bf16   chunk t of x (forward order)
      xb_0..xb_{C-1}            [Tc*B, In_c] bf16   chunk n_chunks-1-t of x (backward)
      wih_ref                   [2C, In_c, 4Hp] bf16  (dir-major: d*C + c)
      whh_ref                   [2, Hp, 4Hp]   bf16
      b_ref                     [2, 1, 4Hp]    f32   (b_ih + b_hh)
      [fc_w, fc_b]              [2, Hp, Cp] bf16 / [1, Cp] f32   (last layer only)
      outputs: seq_f, seq_b     [Tc*B, Hp] bf16       (non-last layers)
               logits           [B, Cp]    f32        (last layer)
      scratch: h_f, c_f, h_b, c_b [B, Hp] f32 (persistent carry),
               g_f, g_b [Tc*B, 4Hp] f32, [hb_last [B, Hp] f32 if last]
    """

    def kernel(*refs):
        xf = refs[0:C]
        xb = refs[C:2 * C]
        wih_ref, whh_ref, b_ref = refs[2 * C:2 * C + 3]
        p = 2 * C + 3
        if last:
            fcw_ref, fcb_ref = refs[p:p + 2]
            logits_ref = refs[p + 2]
            hf_s, cf_s, hb_s, cb_s, gf_s, gb_s, hblast_s = refs[p + 3:]
        else:
            seqf_ref, seqb_ref = refs[p:p + 2]
            hf_s, cf_s, hb_s, cb_s, gf_s, gb_s = refs[p + 2:]

        t = pl.program_id(0)

        @pl.when(t == 0)
        def _init():
            hf_s[...] = jnp.zeros_like(hf_s)
            cf_s[...] = jnp.zeros_like(cf_s)
            hb_s[...] = jnp.zeros_like(hb_s)
            cb_s[...] = jnp.zeros_like(cb_s)

        # Hoisted per-chunk input projection for both directions (bias folded once).
        gf = jnp.dot(xf[0][...], wih_ref[0], preferred_element_type=jnp.float32)
        gb = jnp.dot(xb[0][...], wih_ref[C], preferred_element_type=jnp.float32)
        for cc in range(1, C):
            gf = gf + jnp.dot(xf[cc][...], wih_ref[cc],
                              preferred_element_type=jnp.float32)
            gb = gb + jnp.dot(xb[cc][...], wih_ref[C + cc],
                              preferred_element_type=jnp.float32)
        gf_s[...] = gf + b_ref[0]                      # [Tc*B, 4Hp] f32, VMEM-resident
        gb_s[...] = gb + b_ref[1]

        whh_f = whh_ref[0]                             # hoisted out of the time loop
        whh_b = whh_ref[1]

        h_f = hf_s[...]
        c_f = cf_s[...]
        h_b = hb_s[...]
        c_b = cb_s[...]

        def cell(g_pre, h_prev, c_prev, whh):
            g = g_pre + jnp.dot(h_prev.astype(jnp.bfloat16), whh,
                                preferred_element_type=jnp.float32)
            i_g = jax.nn.sigmoid(g[:, 0 * Hp:1 * Hp])
            f_g = jax.nn.sigmoid(g[:, 1 * Hp:2 * Hp])
            g_g = jnp.tanh(g[:, 2 * Hp:3 * Hp])
            o_g = jax.nn.sigmoid(g[:, 3 * Hp:4 * Hp])
            c_new = f_g * c_prev + i_g * g_g
            h_new = o_g * jnp.tanh(c_new)
            return h_new, c_new

        # Static unroll over the chunk's time steps; forward and backward are two
        # independent dependency chains issued back-to-back (ILP on one TensorCore).
        for s in range(Tc):
            sb = Tc - 1 - s
            h_f, c_f = cell(gf_s[s * B:(s + 1) * B, :], h_f, c_f, whh_f)
            h_b, c_b = cell(gb_s[sb * B:(sb + 1) * B, :], h_b, c_b, whh_b)
            if not last:
                seqf_ref[s * B:(s + 1) * B, :] = h_f.astype(seqf_ref.dtype)
                seqb_ref[sb * B:(sb + 1) * B, :] = h_b.astype(seqb_ref.dtype)
            if last and s == 0:
                # Backward hidden at original time S-1 is its FIRST processed step,
                # which happens in grid step 0 (matches out[:, -1, :] semantics).
                @pl.when(t == 0)
                def _store_hb(h_b=h_b):
                    hblast_s[...] = h_b

        hf_s[...] = h_f
        cf_s[...] = c_f
        hb_s[...] = h_b
        cb_s[...] = c_b

        if last:
            nt = pl.num_programs(0)

            @pl.when(t == nt - 1)
            def _fc():
                # Fused classifier: logits = h_fwd(S-1) @ W0 + h_bwd(S-1) @ W1 + b
                logits_ref[...] = (
                    jnp.dot(h_f.astype(jnp.bfloat16), fcw_ref[0],
                            preferred_element_type=jnp.float32)
                    + jnp.dot(hblast_s[...].astype(jnp.bfloat16), fcw_ref[1],
                              preferred_element_type=jnp.float32)
                    + fcb_ref[...])

    return kernel


# ----------------------------------------------------------------------------
# Wrappers
# ----------------------------------------------------------------------------
def bilstm_layer(xs, layer, *, seq_len, batch_pad, hidden_pad, chunk,
                 fc_w=None, fc_b=None):
    """One bidirectional LSTM layer.

    xs: list of C feature-chunk arrays, each [S*Bp, In_c] bf16 (time-major).
    Returns (seq_f, seq_b) each [S*Bp, Hp] bf16, or logits [Bp, Cp] f32 if fc given.
    """
    C = len(xs)
    SB, In_c = xs[0].shape
    S, Bp, Hp = seq_len, batch_pad, hidden_pad
    assert SB == S * Bp and S % chunk == 0
    Tc = chunk
    n_chunks = S // Tc
    last = fc_w is not None

    w_ih, w_hh, b = layer["w_ih"], layer["w_hh"], layer["b"]

    def const_spec(arr):
        nd = arr.ndim
        return pl.BlockSpec(arr.shape, lambda t, _nd=nd: (0,) * _nd)

    in_specs = (
        [pl.BlockSpec((Tc * Bp, In_c), lambda t: (t, 0)) for _ in range(C)]
        + [pl.BlockSpec((Tc * Bp, In_c), lambda t: (n_chunks - 1 - t, 0))
           for _ in range(C)]
        + [const_spec(w_ih), const_spec(w_hh), const_spec(b)]
    )
    args = list(xs) + list(xs) + [w_ih, w_hh, b]

    scratch = ([pltpu.VMEM((Bp, Hp), jnp.float32)] * 4            # h_f, c_f, h_b, c_b
               + [pltpu.VMEM((Tc * Bp, 4 * Hp), jnp.float32)] * 2)  # gates fwd / bwd

    if last:
        Cp = fc_w.shape[-1]
        in_specs += [const_spec(fc_w), const_spec(fc_b)]
        args += [fc_w, fc_b]
        out_shape = jax.ShapeDtypeStruct((Bp, Cp), jnp.float32)
        out_specs = pl.BlockSpec((Bp, Cp), lambda t: (0, 0))
        scratch = scratch + [pltpu.VMEM((Bp, Hp), jnp.float32)]   # h_bwd at t = S-1
    else:
        out_shape = (jax.ShapeDtypeStruct((S * Bp, Hp), jnp.bfloat16),
                     jax.ShapeDtypeStruct((S * Bp, Hp), jnp.bfloat16))
        out_specs = (pl.BlockSpec((Tc * Bp, Hp), lambda t: (t, 0)),
                     pl.BlockSpec((Tc * Bp, Hp), lambda t: (n_chunks - 1 - t, 0)))

    kernel = _make_layer_kernel(C=C, Tc=Tc, B=Bp, Hp=Hp, last=last)

    return pl.pallas_call(
        kernel,
        out_shape=out_shape,
        grid=(n_chunks,),
        in_specs=in_specs,
        out_specs=out_specs,
        scratch_shapes=scratch,
        compiler_params=pltpu.CompilerParams(
            dimension_semantics=("arbitrary",),        # sequential recurrence carry
            vmem_limit_bytes=_vmem_limit_bytes(),
        ),
    )(*args)


def _embed_time_major(embedding, token_ids, batch_pad, pad_idx):
    B, S = token_ids.shape
    ids = jnp.pad(token_ids, ((0, batch_pad - B), (0, 0)), constant_values=pad_idx)
    flat = ids.T.reshape(-1)                           # time-major (s, b) row order
    return jnp.take(embedding, flat, axis=0)           # [S*Bp, Ep] bf16


def bilstm_forward(params, token_ids, *, num_classes, chunk=None):
    """token_ids: [B, S] int32 -> logits [B, num_classes] f32."""
    B, S = token_ids.shape
    Bp = max(8, _round_up(B, 8))
    Hp = params["layers"][0]["w_hh"].shape[1]
    pad_idx = params["embedding"].shape[0] - 1
    if chunk is None:
        chunk = _pick_chunk(S, Bp, Hp)
    assert S % chunk == 0

    x = _embed_time_major(params["embedding"], token_ids, Bp, pad_idx)
    xs = [x]
    n_layers = len(params["layers"])
    logits = None
    for li, layer in enumerate(params["layers"]):
        if li == n_layers - 1:
            logits = bilstm_layer(xs, layer, seq_len=S, batch_pad=Bp, hidden_pad=Hp,
                                  chunk=chunk, fc_w=params["fc_w"], fc_b=params["fc_b"])
        else:
            seq_f, seq_b = bilstm_layer(xs, layer, seq_len=S, batch_pad=Bp,
                                        hidden_pad=Hp, chunk=chunk)
            xs = [seq_f, seq_b]                        # 2 feature chunks, no concat
    return logits[:B, :num_classes]


# ----------------------------------------------------------------------------
# Pure-JAX reference (mirrors kernel dtypes: bf16 matmul operands, f32 accumulate)
# ----------------------------------------------------------------------------
def _lstm_dir_ref(x_chunks, w_ih_chunks, w_hh, b, S, Bp, reverse):
    Hp = w_hh.shape[0]
    g = jnp.dot(x_chunks[0], w_ih_chunks[0], preferred_element_type=jnp.float32)
    for xc, wc in zip(x_chunks[1:], w_ih_chunks[1:]):
        g = g + jnp.dot(xc, wc, preferred_element_type=jnp.float32)
    g = (g + b).reshape(S, Bp, 4 * Hp)
    if reverse:
        g = g[::-1]

    def step(carry, g_t):
        h, c = carry
        gg = g_t + jnp.dot(h.astype(jnp.bfloat16), w_hh,
                           preferred_element_type=jnp.float32)
        i = jax.nn.sigmoid(gg[:, :Hp])
        f = jax.nn.sigmoid(gg[:, Hp:2 * Hp])
        gc = jnp.tanh(gg[:, 2 * Hp:3 * Hp])
        o = jax.nn.sigmoid(gg[:, 3 * Hp:])
        c = f * c + i * gc
        h = o * jnp.tanh(c)
        return (h, c), h

    init = (jnp.zeros((Bp, Hp), jnp.float32), jnp.zeros((Bp, Hp), jnp.float32))
    _, hs = jax.lax.scan(step, init, g)
    if reverse:
        hs = hs[::-1]
    return hs                                          # [S, Bp, Hp] f32, original order


def bilstm_forward_ref(params, token_ids, *, num_classes):
    B, S = token_ids.shape
    Bp = max(8, _round_up(B, 8))
    Hp = params["layers"][0]["w_hh"].shape[1]
    pad_idx = params["embedding"].shape[0] - 1
    x = _embed_time_major(params["embedding"], token_ids, Bp, pad_idx)
    xs = [x]
    n_layers = len(params["layers"])
    logits = None
    for li, layer in enumerate(params["layers"]):
        C = len(xs)
        w_ih = layer["w_ih"]
        hs_f = _lstm_dir_ref(xs, [w_ih[c] for c in range(C)],
                             layer["w_hh"][0], layer["b"][0], S, Bp, reverse=False)
        hs_b = _lstm_dir_ref(xs, [w_ih[C + c] for c in range(C)],
                             layer["w_hh"][1], layer["b"][1], S, Bp, reverse=True)
        if li == n_layers - 1:
            logits = (jnp.dot(hs_f[-1].astype(jnp.bfloat16), params["fc_w"][0],
                              preferred_element_type=jnp.float32)
                      + jnp.dot(hs_b[-1].astype(jnp.bfloat16), params["fc_w"][1],
                                preferred_element_type=jnp.float32)
                      + params["fc_b"])
        else:
            xs = [hs_f.astype(jnp.bfloat16).reshape(S * Bp, Hp),
                  hs_b.astype(jnp.bfloat16).reshape(S * Bp, Hp)]
    return logits[:B, :num_classes]


# ----------------------------------------------------------------------------
# Deterministic parameter construction (nn.Embedding / nn.LSTM / nn.Linear shapes),
# padded to lane/sublane-dense kernel layouts (extra rows/cols are exact zeros).
# ----------------------------------------------------------------------------
def init_params(key, *, n_vocab, embed, hidden, num_layers, num_classes):
    H, Hp = hidden, _round_up(hidden, 128)
    E, Ep = embed, _round_up(embed, 128)
    Cn, Cp = num_classes, _round_up(num_classes, 128)
    pad_idx = n_vocab - 1
    k = 1.0 / jnp.sqrt(hidden)
    keys = iter(jax.random.split(key, 4 + num_layers * 8))

    # nn.Embedding(n_vocab, embed, padding_idx=n_vocab-1)
    emb = jax.random.normal(next(keys), (n_vocab, E), jnp.float32)
    emb = emb.at[pad_idx].set(0.0)
    emb = _pad_axis(emb, 1, Ep).astype(jnp.bfloat16)

    layers = []
    for li in range(num_layers):
        in_size = E if li == 0 else 2 * H
        in_pad = Ep if li == 0 else Hp                 # per-chunk padded input width
        C = 1 if li == 0 else 2
        wih_all, whh_all, b_all = [], [], []
        for _direction in range(2):                    # 0 = forward, 1 = reverse
            w_ih = jax.random.uniform(next(keys), (4 * H, in_size), jnp.float32, -k, k)
            w_hh = jax.random.uniform(next(keys), (4 * H, H), jnp.float32, -k, k)
            b_ih = jax.random.uniform(next(keys), (4 * H,), jnp.float32, -k, k)
            b_hh = jax.random.uniform(next(keys), (4 * H,), jnp.float32, -k, k)

            w_ih_t = w_ih.T                            # [in_size, 4H]
            chunks = []
            for c in range(C):                         # chunk 0 = fwd feats, 1 = bwd
                wc = w_ih_t[c * (in_size // C):(c + 1) * (in_size // C)]
                wc = _pad_gate_cols(wc, H, Hp)         # [in_c, 4Hp]
                wc = _pad_axis(wc, 0, in_pad)          # [in_pad, 4Hp]
                chunks.append(wc.astype(jnp.bfloat16))
            wih_all.append(chunks)

            whh = _pad_axis(_pad_gate_cols(w_hh.T, H, Hp), 0, Hp)   # [Hp, 4Hp]
            whh_all.append(whh.astype(jnp.bfloat16))
            b_all.append(_pad_gate_cols((b_ih + b_hh).reshape(1, 4 * H), H, Hp))

        layers.append({
            "w_ih": jnp.stack([wc for d in range(2) for wc in wih_all[d]]),  # [2C,in_pad,4Hp]
            "w_hh": jnp.stack(whh_all),                                      # [2,Hp,4Hp]
            "b": jnp.stack(b_all),                                           # [2,1,4Hp] f32
        })

    # nn.Linear(hidden*2, num_classes), weight split per direction, padded lane-dense.
    kf = 1.0 / jnp.sqrt(2.0 * hidden)
    fc_w = jax.random.uniform(next(keys), (Cn, 2 * H), jnp.float32, -kf, kf)
    fc_b = jax.random.uniform(next(keys), (Cn,), jnp.float32, -kf, kf)
    fc_w_t = fc_w.T                                    # [2H, Cn]
    fw = _pad_axis(_pad_axis(fc_w_t[:H], 0, Hp), 1, Cp)
    bw = _pad_axis(_pad_axis(fc_w_t[H:], 0, Hp), 1, Cp)

    return {
        "embedding": emb,
        "layers": layers,
        "fc_w": jnp.stack([fw, bw]).astype(jnp.bfloat16),   # [2, Hp, Cp]
        "fc_b": _pad_axis(fc_b.reshape(1, Cn), 1, Cp),      # [1, Cp] f32
    }


# ----------------------------------------------------------------------------
if __name__ == "__main__":
    # Small config consistent with the module's __init__.
    N_VOCAB, EMBED, HIDDEN, NUM_LAYERS, NUM_CLASSES = 50, 32, 32, 2, 4
    BATCH, SEQ = 2, 8

    key = jax.random.PRNGKey(0)
    pkey, xkey = jax.random.split(key)
    params = init_params(pkey, n_vocab=N_VOCAB, embed=EMBED, hidden=HIDDEN,
                         num_layers=NUM_LAYERS, num_classes=NUM_CLASSES)
    token_ids = jax.random.randint(xkey, (BATCH, SEQ), 0, N_VOCAB, dtype=jnp.int32)

    # chunk=4 -> 2 time chunks per layer (exercises the chunked carry path).
    fwd = jax.jit(functools.partial(bilstm_forward, num_classes=NUM_CLASSES, chunk=4))
    logits = jax.block_until_ready(fwd(params, token_ids))
    ref = jax.block_until_ready(
        bilstm_forward_ref(params, token_ids, num_classes=NUM_CLASSES))

    assert logits.shape == (BATCH, NUM_CLASSES)
    assert jnp.allclose(logits, ref, atol=1e-3, rtol=1e-3), (logits, ref)

    print("KERNEL_OK")
</pallas_src>

<mosaic_0001>
module attributes {stable_mosaic.version = 11 : i64} {
  func.func @kernel(%arg0: i32, %arg1: memref<32x128xbf16, #tpu.memory_space<vmem>>, %arg2: memref<32x128xbf16, #tpu.memory_space<vmem>>, %arg3: memref<2x128x512xbf16, #tpu.memory_space<vmem>>, %arg4: memref<2x128x512xbf16, #tpu.memory_space<vmem>>, %arg5: memref<2x1x512xf32, #tpu.memory_space<vmem>>, %arg6: memref<32x128xbf16, #tpu.memory_space<vmem>>, %arg7: memref<32x128xbf16, #tpu.memory_space<vmem>>, %arg8: memref<8x128xf32, #tpu.memory_space<vmem>>, %arg9: memref<8x128xf32, #tpu.memory_space<vmem>>, %arg10: memref<8x128xf32, #tpu.memory_space<vmem>>, %arg11: memref<8x128xf32, #tpu.memory_space<vmem>>, %arg12: memref<32x512xf32, #tpu.memory_space<vmem>>, %arg13: memref<32x512xf32, #tpu.memory_space<vmem>>) attributes {dimension_semantics = [#tpu.dimension_semantics<arbitrary>], iteration_bounds = array<i64: 2>, scalar_prefetch = 0 : i64, scratch_operands = 6 : i64, tpu.core_type = #tpu.core_type<tc>, window_params = [{transform_indices = @transform_0, window_bounds = array<i64: 32, 128>}, {transform_indices = @transform_1, window_bounds = array<i64: 32, 128>}, {pipeline_mode = #tpu.pipeline_mode<synchronous>, transform_indices = @transform_2, window_bounds = array<i64: 2, 128, 512>}, {pipeline_mode = #tpu.pipeline_mode<synchronous>, transform_indices = @transform_3, window_bounds = array<i64: 2, 128, 512>}, {pipeline_mode = #tpu.pipeline_mode<synchronous>, transform_indices = @transform_4, window_bounds = array<i64: 2, 1, 512>}, {transform_indices = @transform_5, window_bounds = array<i64: 32, 128>}, {transform_indices = @transform_6, window_bounds = array<i64: 32, 128>}]} {
    %c0_i32 = arith.constant 0 : i32
    %0 = arith.cmpi eq, %arg0, %c0_i32 : i32
    %1 = arith.extui %0 : i1 to i32
    %c0_i32_0 = arith.constant 0 : i32
    %2 = arith.cmpi ne, %1, %c0_i32_0 : i32
    scf.if %2 {
      %cst_103 = arith.constant 0.000000e+00 : f32
      %281 = vector.broadcast %cst_103 : f32 to vector<8x128xf32>
      %c0_104 = arith.constant 0 : index
      %c0_105 = arith.constant 0 : index
      %282 = vector.load %arg8[%c0_104, %c0_105] : memref<8x128xf32, #tpu.memory_space<vmem>>, vector<8x128xf32>
      tpu.vector_store %arg8[%c0_104, %c0_105], %281 {strides = array<i32>} : memref<8x128xf32, #tpu.memory_space<vmem>>, vector<8x128xf32>,
      %cst_106 = arith.constant 0.000000e+00 : f32
      %283 = vector.broadcast %cst_106 : f32 to vector<8x128xf32>
      %c0_107 = arith.constant 0 : index
      %c0_108 = arith.constant 0 : index
      %284 = vector.load %arg9[%c0_107, %c0_108] : memref<8x128xf32, #tpu.memory_space<vmem>>, vector<8x128xf32>
      tpu.vector_store %arg9[%c0_107, %c0_108], %283 {strides = array<i32>} : memref<8x128xf32, #tpu.memory_space<vmem>>, vector<8x128xf32>,
      %cst_109 = arith.constant 0.000000e+00 : f32
      %285 = vector.broadcast %cst_109 : f32 to vector<8x128xf32>
      %c0_110 = arith.constant 0 : index
      %c0_111 = arith.constant 0 : index
      %286 = vector.load %arg10[%c0_110, %c0_111] : memref<8x128xf32, #tpu.memory_space<vmem>>, vector<8x128xf32>
      tpu.vector_store %arg10[%c0_110, %c0_111], %285 {strides = array<i32>} : memref<8x128xf32, #tpu.memory_space<vmem>>, vector<8x128xf32>,
      %cst_112 = arith.constant 0.000000e+00 : f32
      %287 = vector.broadcast %cst_112 : f32 to vector<8x128xf32>
      %c0_113 = arith.constant 0 : index
      %c0_114 = arith.constant 0 : index
      %288 = vector.load %arg11[%c0_113, %c0_114] : memref<8x128xf32, #tpu.memory_space<vmem>>, vector<8x128xf32>
      tpu.vector_store %arg11[%c0_113, %c0_114], %287 {strides = array<i32>} : memref<8x128xf32, #tpu.memory_space<vmem>>, vector<8x128xf32>,
    } else {
    }
    %c0 = arith.constant 0 : index
    %c0_1 = arith.constant 0 : index
    %3 = vector.load %arg1[%c0, %c0_1] : memref<32x128xbf16, #tpu.memory_space<vmem>>, vector<32x128xbf16>
    %c0_2 = arith.constant 0 : index
    %c0_3 = arith.constant 0 : index
    %c0_4 = arith.constant 0 : index
    %4 = vector.load %arg3[%c0_2, %c0_3, %c0_4] : memref<2x128x512xbf16, #tpu.memory_space<vmem>>, vector<1x128x512xbf16>
    %5 = vector.shape_cast %4 : vector<1x128x512xbf16> to vector<128x512xbf16>
    %cst = arith.constant dense<0.000000e+00> : vector<32x512xf32>
    %6 = tpu.matmul %3, %5, %cst {dimension_numbers = #tpu.dot_dimension_numbers<[1], [0], [0], [1], [0, 0, 1, 1], [], []>} : vector<32x128xbf16>, vector<128x512xbf16>, vector<32x512xf32> -> vector<32x512xf32>
    %c0_5 = arith.constant 0 : index
    %c0_6 = arith.constant 0 : index
    %7 = vector.load %arg2[%c0_5, %c0_6] : memref<32x128xbf16, #tpu.memory_space<vmem>>, vector<32x128xbf16>
    %c1 = arith.constant 1 : index
    %c0_7 = arith.constant 0 : index
    %c0_8 = arith.constant 0 : index
    %8 = vector.load %arg3[%c1, %c0_7, %c0_8] : memref<2x128x512xbf16, #tpu.memory_space<vmem>>, vector<1x128x512xbf16>
    %9 = vector.shape_cast %8 : vector<1x128x512xbf16> to vector<128x512xbf16>
    %cst_9 = arith.constant dense<0.000000e+00> : vector<32x512xf32>
    %10 = tpu.matmul %7, %9, %cst_9 {dimension_numbers = #tpu.dot_dimension_numbers<[1], [0], [0], [1], [0, 0, 1, 1], [], []>} : vector<32x128xbf16>, vector<128x512xbf16>, vector<32x512xf32> -> vector<32x512xf32>
    %c0_10 = arith.constant 0 : index
    %c0_11 = arith.constant 0 : index
    %c0_12 = arith.constant 0 : index
    %11 = vector.load %arg5[%c0_10, %c0_11, %c0_12] : memref<2x1x512xf32, #tpu.memory_space<vmem>>, vector<1x1x512xf32>
    %12 = vector.shape_cast %11 : vector<1x1x512xf32> to vector<1x512xf32>
    %13 = vector.broadcast %12 : vector<1x512xf32> to vector<32x512xf32>
    %14 = arith.addf %6, %13 : vector<32x512xf32>
    %c0_13 = arith.constant 0 : index
    %c0_14 = arith.constant 0 : index
    %15 = vector.load %arg12[%c0_13, %c0_14] : memref<32x512xf32, #tpu.memory_space<vmem>>, vector<32x512xf32>
    tpu.vector_store %arg12[%c0_13, %c0_14], %14 {strides = array<i32>} : memref<32x512xf32, #tpu.memory_space<vmem>>, vector<32x512xf32>,
    %c1_15 = arith.constant 1 : index
    %c0_16 = arith.constant 0 : index
    %c0_17 = arith.constant 0 : index
    %16 = vector.load %arg5[%c1_15, %c0_16, %c0_17] : memref<2x1x512xf32, #tpu.memory_space<vmem>>, vector<1x1x512xf32>
    %17 = vector.shape_cast %16 : vector<1x1x512xf32> to vector<1x512xf32>
    %18 = vector.broadcast %17 : vector<1x512xf32> to vector<32x512xf32>
    %19 = arith.addf %10, %18 : vector<32x512xf32>
    %c0_18 = arith.constant 0 : index
    %c0_19 = arith.constant 0 : index
    %20 = vector.load %arg13[%c0_18, %c0_19] : memref<32x512xf32, #tpu.memory_space<vmem>>, vector<32x512xf32>
    tpu.vector_store %arg13[%c0_18, %c0_19], %19 {strides = array<i32>} : memref<32x512xf32, #tpu.memory_space<vmem>>, vector<32x512xf32>,
    %c0_20 = arith.constant 0 : index
    %c0_21 = arith.constant 0 : index
    %c0_22 = arith.constant 0 : index
    %21 = vector.load %arg4[%c0_20, %c0_21, %c0_22] : memref<2x128x512xbf16, #tpu.memory_space<vmem>>, vector<1x128x512xbf16>
    %22 = vector.shape_cast %21 : vector<1x128x512xbf16> to vector<128x512xbf16>
    %c1_23 = arith.constant 1 : index
    %c0_24 = arith.constant 0 : index
    %c0_25 = arith.constant 0 : index
    %23 = vector.load %arg4[%c1_23, %c0_24, %c0_25] : memref<2x128x512xbf16, #tpu.memory_space<vmem>>, vector<1x128x512xbf16>
    %24 = vector.shape_cast %23 : vector<1x128x512xbf16> to vector<128x512xbf16>
    %c0_26 = arith.constant 0 : index
    %c0_27 = arith.constant 0 : index
    %25 = vector.load %arg8[%c0_26, %c0_27] : memref<8x128xf32, #tpu.memory_space<vmem>>, vector<8x128xf32>
    %c0_28 = arith.constant 0 : index
    %c0_29 = arith.constant 0 : index
    %26 = vector.load %arg9[%c0_28, %c0_29] : memref<8x128xf32, #tpu.memory_space<vmem>>, vector<8x128xf32>
    %c0_30 = arith.constant 0 : index
    %c0_31 = arith.constant 0 : index
    %27 = vector.load %arg10[%c0_30, %c0_31] : memref<8x128xf32, #tpu.memory_space<vmem>>, vector<8x128xf32>
    %c0_32 = arith.constant 0 : index
    %c0_33 = arith.constant 0 : index
    %28 = vector.load %arg11[%c0_32, %c0_33] : memref<8x128xf32, #tpu.memory_space<vmem>>, vector<8x128xf32>
    %c0_34 = arith.constant 0 : index
    %c0_35 = arith.constant 0 : index
    %29 = vector.load %arg12[%c0_34, %c0_35] : memref<32x512xf32, #tpu.memory_space<vmem>>, vector<8x512xf32>
    %30 = arith.truncf %25 : vector<8x128xf32> to vector<8x128xbf16>
    %cst_36 = arith.constant dense<0.000000e+00> : vector<8x512xf32>
    %31 = tpu.matmul %30, %22, %cst_36 {dimension_numbers = #tpu.dot_dimension_numbers<[1], [0], [0], [1], [0, 0, 1, 1], [], []>} : vector<8x128xbf16>, vector<128x512xbf16>, vector<8x512xf32> -> vector<8x512xf32>
    %32 = arith.addf %29, %31 : vector<8x512xf32>
    %33 = vector.extract_strided_slice %32 {offsets = [0, 0], sizes = [8, 128], strides = [1, 1]} : vector<8x512xf32> to vector<8x128xf32>
    %34 = arith.negf %33 : vector<8x128xf32>
    %35 = math.exp %34 : vector<8x128xf32>
    %cst_37 = arith.constant 1.000000e+00 : f32
    %36 = vector.broadcast %cst_37 : f32 to vector<8x128xf32>
    %37 = arith.addf %36, %35 : vector<8x128xf32>
    %38 = arith.divf %36, %37 : vector<8x128xf32>
    %39 = vector.extract_strided_slice %32 {offsets = [0, 128], sizes = [8, 128], strides = [1, 1]} : vector<8x512xf32> to vector<8x128xf32>
    %40 = arith.negf %39 : vector<8x128xf32>
    %41 = math.exp %40 : vector<8x128xf32>
    %cst_38 = arith.constant 1.000000e+00 : f32
    %42 = vector.broadcast %cst_38 : f32 to vector<8x128xf32>
    %43 = arith.addf %42, %41 : vector<8x128xf32>
    %44 = arith.divf %42, %43 : vector<8x128xf32>
    %45 = vector.extract_strided_slice %32 {offsets = [0, 256], sizes = [8, 128], strides = [1, 1]} : vector<8x512xf32> to vector<8x128xf32>
    %46 = math.tanh %45 : vector<8x128xf32>
    %47 = vector.extract_strided_slice %32 {offsets = [0, 384], sizes = [8, 128], strides = [1, 1]} : vector<8x512xf32> to vector<8x128xf32>
    %48 = arith.negf %47 : vector<8x128xf32>
    %49 = math.exp %48 : vector<8x128xf32>
    %cst_39 = arith.constant 1.000000e+00 : f32
    %50 = vector.broadcast %cst_39 : f32 to vector<8x128xf32>
    %51 = arith.addf %50, %49 : vector<8x128xf32>
    %52 = arith.divf %50, %51 : vector<8x128xf32>
    %53 = arith.mulf %44, %26 : vector<8x128xf32>
    %54 = arith.mulf %38, %46 : vector<8x128xf32>
    %55 = arith.addf %53, %54 : vector<8x128xf32>
    %56 = math.tanh %55 : vector<8x128xf32>
    %57 = arith.mulf %52, %56 : vector<8x128xf32>
    %c24 = arith.constant 24 : index
    %c0_40 = arith.constant 0 : index
    %58 = vector.load %arg13[%c24, %c0_40] : memref<32x512xf32, #tpu.memory_space<vmem>>, vector<8x512xf32>
    %59 = arith.truncf %27 : vector<8x128xf32> to vector<8x128xbf16>
    %cst_41 = arith.constant dense<0.000000e+00> : vector<8x512xf32>
    %60 = tpu.matmul %59, %24, %cst_41 {dimension_numbers = #tpu.dot_dimension_numbers<[1], [0], [0], [1], [0, 0, 1, 1], [], []>} : vector<8x128xbf16>, vector<128x512xbf16>, vector<8x512xf32> -> vector<8x512xf32>
    %61 = arith.addf %58, %60 : vector<8x512xf32>
    %62 = vector.extract_strided_slice %61 {offsets = [0, 0], sizes = [8, 128], strides = [1, 1]} : vector<8x512xf32> to vector<8x128xf32>
    %63 = arith.negf %62 : vector<8x128xf32>
    %64 = math.exp %63 : vector<8x128xf32>
    %cst_42 = arith.constant 1.000000e+00 : f32
    %65 = vector.broadcast %cst_42 : f32 to vector<8x128xf32>
    %66 = arith.addf %65, %64 : vector<8x128xf32>
    %67 = arith.divf %65, %66 : vector<8x128xf32>
    %68 = vector.extract_strided_slice %61 {offsets = [0, 128], sizes = [8, 128], strides = [1, 1]} : vector<8x512xf32> to vector<8x128xf32>
    %69 = arith.negf %68 : vector<8x128xf32>
    %70 = math.exp %69 : vector<8x128xf32>
    %cst_43 = arith.constant 1.000000e+00 : f32
    %71 = vector.broadcast %cst_43 : f32 to vector<8x128xf32>
    %72 = arith.addf %71, %70 : vector<8x128xf32>
    %73 = arith.divf %71, %72 : vector<8x128xf32>
    %74 = vector.extract_strided_slice %61 {offsets = [0, 256], sizes = [8, 128], strides = [1, 1]} : vector<8x512xf32> to vector<8x128xf32>
    %75 = math.tanh %74 : vector<8x128xf32>
    %76 = vector.extract_strided_slice %61 {offsets = [0, 384], sizes = [8, 128], strides = [1, 1]} : vector<8x512xf32> to vector<8x128xf32>
    %77 = arith.negf %76 : vector<8x128xf32>
    %78 = math.exp %77 : vector<8x128xf32>
    %cst_44 = arith.constant 1.000000e+00 : f32
    %79 = vector.broadcast %cst_44 : f32 to vector<8x128xf32>
    %80 = arith.addf %79, %78 : vector<8x128xf32>
    %81 = arith.divf %79, %80 : vector<8x128xf32>
    %82 = arith.mulf %73, %28 : vector<8x128xf32>
    %83 = arith.mulf %67, %75 : vector<8x128xf32>
    %84 = arith.addf %82, %83 : vector<8x128xf32>
    %85 = math.tanh %84 : vector<8x128xf32>
    %86 = arith.mulf %81, %85 : vector<8x128xf32>
    %87 = arith.truncf %57 : vector<8x128xf32> to vector<8x128xbf16>
    %c0_45 = arith.constant 0 : index
    %c0_46 = arith.constant 0 : index
    %88 = vector.load %arg6[%c0_45, %c0_46] : memref<32x128xbf16, #tpu.memory_space<vmem>>, vector<8x128xbf16>
    tpu.vector_store %arg6[%c0_45, %c0_46], %87 {strides = array<i32>} : memref<32x128xbf16, #tpu.memory_space<vmem>>, vector<8x128xbf16>,
    %89 = arith.truncf %86 : vector<8x128xf32> to vector<8x128xbf16>
    %c24_47 = arith.constant 24 : index
    %c0_48 = arith.constant 0 : index
    %90 = vector.load %arg7[%c24_47, %c0_48] : memref<32x128xbf16, #tpu.memory_space<vmem>>, vector<8x128xbf16>
    tpu.vector_store %arg7[%c24_47, %c0_48], %89 {strides = array<i32>} : memref<32x128xbf16, #tpu.memory_space<vmem>>, vector<8x128xbf16>,
    %c8 = arith.constant 8 : index
    %c0_49 = arith.constant 0 : index
    %91 = vector.load %arg12[%c8, %c0_49] : memref<32x512xf32, #tpu.memory_space<vmem>>, vector<8x512xf32>
    %92 = arith.truncf %57 : vector<8x128xf32> to vector<8x128xbf16>
    %cst_50 = arith.constant dense<0.000000e+00> : vector<8x512xf32>
    %93 = tpu.matmul %92, %22, %cst_50 {dimension_numbers = #tpu.dot_dimension_numbers<[1], [0], [0], [1], [0, 0, 1, 1], [], []>} : vector<8x128xbf16>, vector<128x512xbf16>, vector<8x512xf32> -> vector<8x512xf32>
    %94 = arith.addf %91, %93 : vector<8x512xf32>
    %95 = vector.extract_strided_slice %94 {offsets = [0, 0], sizes = [8, 128], strides = [1, 1]} : vector<8x512xf32> to vector<8x128xf32>
    %96 = arith.negf %95 : vector<8x128xf32>
    %97 = math.exp %96 : vector<8x128xf32>
    %cst_51 = arith.constant 1.000000e+00 : f32
    %98 = vector.broadcast %cst_51 : f32 to vector<8x128xf32>
    %99 = arith.addf %98, %97 : vector<8x128xf32>
    %100 = arith.divf %98, %99 : vector<8x128xf32>
    %101 = vector.extract_strided_slice %94 {offsets = [0, 128], sizes = [8, 128], strides = [1, 1]} : vector<8x512xf32> to vector<8x128xf32>
    %102 = arith.negf %101 : vector<8x128xf32>
    %103 = math.exp %102 : vector<8x128xf32>
    %cst_52 = arith.constant 1.000000e+00 : f32
    %104 = vector.broadcast %cst_52 : f32 to vector<8x128xf32>
    %105 = arith.addf %104, %103 : vector<8x128xf32>
    %106 = arith.divf %104, %105 : vector<8x128xf32>
    %107 = vector.extract_strided_slice %94 {offsets = [0, 256], sizes = [8, 128], strides = [1, 1]} : vector<8x512xf32> to vector<8x128xf32>
    %108 = math.tanh %107 : vector<8x128xf32>
    %109 = vector.extract_strided_slice %94 {offsets = [0, 384], sizes = [8, 128], strides = [1, 1]} : vector<8x512xf32> to vector<8x128xf32>
    %110 = arith.negf %109 : vector<8x128xf32>
    %111 = math.exp %110 : vector<8x128xf32>
    %cst_53 = arith.constant 1.000000e+00 : f32
    %112 = vector.broadcast %cst_53 : f32 to vector<8x128xf32>
    %113 = arith.addf %112, %111 : vector<8x128xf32>
    %114 = arith.divf %112, %113 : vector<8x128xf32>
    %115 = arith.mulf %106, %55 : vector<8x128xf32>
    %116 = arith.mulf %100, %108 : vector<8x128xf32>
    %117 = arith.addf %115, %116 : vector<8x128xf32>
    %118 = math.tanh %117 : vector<8x128xf32>
    %119 = arith.mulf %114, %118 : vector<8x128xf32>
    %c16 = arith.constant 16 : index
    %c0_54 = arith.constant 0 : index
    %120 = vector.load %arg13[%c16, %c0_54] : memref<32x512xf32, #tpu.memory_space<vmem>>, vector<8x512xf32>
    %121 = arith.truncf %86 : vector<8x128xf32> to vector<8x128xbf16>
    %cst_55 = arith.constant dense<0.000000e+00> : vector<8x512xf32>
    %122 = tpu.matmul %121, %24, %cst_55 {dimension_numbers = #tpu.dot_dimension_numbers<[1], [0], [0], [1], [0, 0, 1, 1], [], []>} : vector<8x128xbf16>, vector<128x512xbf16>, vector<8x512xf32> -> vector<8x512xf32>
    %123 = arith.addf %120, %122 : vector<8x512xf32>
    %124 = vector.extract_strided_slice %123 {offsets = [0, 0], sizes = [8, 128], strides = [1, 1]} : vector<8x512xf32> to vector<8x128xf32>
    %125 = arith.negf %124 : vector<8x128xf32>
    %126 = math.exp %125 : vector<8x128xf32>
    %cst_56 = arith.constant 1.000000e+00 : f32
    %127 = vector.broadcast %cst_56 : f32 to vector<8x128xf32>
    %128 = arith.addf %127, %126 : vector<8x128xf32>
    %129 = arith.divf %127, %128 : vector<8x128xf32>
    %130 = vector.extract_strided_slice %123 {offsets = [0, 128], sizes = [8, 128], strides = [1, 1]} : vector<8x512xf32> to vector<8x128xf32>
    %131 = arith.negf %130 : vector<8x128xf32>
    %132 = math.exp %131 : vector<8x128xf32>
    %cst_57 = arith.constant 1.000000e+00 : f32
    %133 = vector.broadcast %cst_57 : f32 to vector<8x128xf32>
    %134 = arith.addf %133, %132 : vector<8x128xf32>
    %135 = arith.divf %133, %134 : vector<8x128xf32>
    %136 = vector.extract_strided_slice %123 {offsets = [0, 256], sizes = [8, 128], strides = [1, 1]} : vector<8x512xf32> to vector<8x128xf32>
    %137 = math.tanh %136 : vector<8x128xf32>
    %138 = vector.extract_strided_slice %123 {offsets = [0, 384], sizes = [8, 128], strides = [1, 1]} : vector<8x512xf32> to vector<8x128xf32>
    %139 = arith.negf %138 : vector<8x128xf32>
    %140 = math.exp %139 : vector<8x128xf32>
    %cst_58 = arith.constant 1.000000e+00 : f32
    %141 = vector.broadcast %cst_58 : f32 to vector<8x128xf32>
    %142 = arith.addf %141, %140 : vector<8x128xf32>
    %143 = arith.divf %141, %142 : vector<8x128xf32>
    %144 = arith.mulf %135, %84 : vector<8x128xf32>
    %145 = arith.mulf %129, %137 : vector<8x128xf32>
    %146 = arith.addf %144, %145 : vector<8x128xf32>
    %147 = math.tanh %146 : vector<8x128xf32>
    %148 = arith.mulf %143, %147 : vector<8x128xf32>
    %149 = arith.truncf %119 : vector<8x128xf32> to vector<8x128xbf16>
    %c8_59 = arith.constant 8 : index
    %c0_60 = arith.constant 0 : index
    %150 = vector.load %arg6[%c8_59, %c0_60] : memref<32x128xbf16, #tpu.memory_space<vmem>>, vector<8x128xbf16>
    tpu.vector_store %arg6[%c8_59, %c0_60], %149 {strides = array<i32>} : memref<32x128xbf16, #tpu.memory_space<vmem>>, vector<8x128xbf16>,
    %151 = arith.truncf %148 : vector<8x128xf32> to vector<8x128xbf16>
    %c16_61 = arith.constant 16 : index
    %c0_62 = arith.constant 0 : index
    %152 = vector.load %arg7[%c16_61, %c0_62] : memref<32x128xbf16, #tpu.memory_space<vmem>>, vector<8x128xbf16>
    tpu.vector_store %arg7[%c16_61, %c0_62], %151 {strides = array<i32>} : memref<32x128xbf16, #tpu.memory_space<vmem>>, vector<8x128xbf16>,
    %c16_63 = arith.constant 16 : index
    %c0_64 = arith.constant 0 : index
    %153 = vector.load %arg12[%c16_63, %c0_64] : memref<32x512xf32, #tpu.memory_space<vmem>>, vector<8x512xf32>
    %154 = arith.truncf %119 : vector<8x128xf32> to vector<8x128xbf16>
    %cst_65 = arith.constant dense<0.000000e+00> : vector<8x512xf32>
    %155 = tpu.matmul %154, %22, %cst_65 {dimension_numbers = #tpu.dot_dimension_numbers<[1], [0], [0], [1], [0, 0, 1, 1], [], []>} : vector<8x128xbf16>, vector<128x512xbf16>, vector<8x512xf32> -> vector<8x512xf32>
    %156 = arith.addf %153, %155 : vector<8x512xf32>
    %157 = vector.extract_strided_slice %156 {offsets = [0, 0], sizes = [8, 128], strides = [1, 1]} : vector<8x512xf32> to vector<8x128xf32>
    %158 = arith.negf %157 : vector<8x128xf32>
    %159 = math.exp %158 : vector<8x128xf32>
    %cst_66 = arith.constant 1.000000e+00 : f32
    %160 = vector.broadcast %cst_66 : f32 to vector<8x128xf32>
    %161 = arith.addf %160, %159 : vector<8x128xf32>
    %162 = arith.divf %160, %161 : vector<8x128xf32>
    %163 = vector.extract_strided_slice %156 {offsets = [0, 128], sizes = [8, 128], strides = [1, 1]} : vector<8x512xf32> to vector<8x128xf32>
    %164 = arith.negf %163 : vector<8x128xf32>
    %165 = math.exp %164 : vector<8x128xf32>
    %cst_67 = arith.constant 1.000000e+00 : f32
    %166 = vector.broadcast %cst_67 : f32 to vector<8x128xf32>
    %167 = arith.addf %166, %165 : vector<8x128xf32>
    %168 = arith.divf %166, %167 : vector<8x128xf32>
    %169 = vector.extract_strided_slice %156 {offsets = [0, 256], sizes = [8, 128], strides = [1, 1]} : vector<8x512xf32> to vector<8x128xf32>
    %170 = math.tanh %169 : vector<8x128xf32>
    %171 = vector.extract_strided_slice %156 {offsets = [0, 384], sizes = [8, 128], strides = [1, 1]} : vector<8x512xf32> to vector<8x128xf32>
    %172 = arith.negf %171 : vector<8x128xf32>
    %173 = math.exp %172 : vector<8x128xf32>
    %cst_68 = arith.constant 1.000000e+00 : f32
    %174 = vector.broadcast %cst_68 : f32 to vector<8x128xf32>
    %175 = arith.addf %174, %173 : vector<8x128xf32>
    %176 = arith.divf %174, %175 : vector<8x128xf32>
    %177 = arith.mulf %168, %117 : vector<8x128xf32>
    %178 = arith.mulf %162, %170 : vector<8x128xf32>
    %179 = arith.addf %177, %178 : vector<8x128xf32>
    %180 = math.tanh %179 : vector<8x128xf32>
    %181 = arith.mulf %176, %180 : vector<8x128xf32>
    %c8_69 = arith.constant 8 : index
    %c0_70 = arith.constant 0 : index
    %182 = vector.load %arg13[%c8_69, %c0_70] : memref<32x512xf32, #tpu.memory_space<vmem>>, vector<8x512xf32>
    %183 = arith.truncf %148 : vector<8x128xf32> to vector<8x128xbf16>
    %cst_71 = arith.constant dense<0.000000e+00> : vector<8x512xf32>
    %184 = tpu.matmul %183, %24, %cst_71 {dimension_numbers = #tpu.dot_dimension_numbers<[1], [0], [0], [1], [0, 0, 1, 1], [], []>} : vector<8x128xbf16>, vector<128x512xbf16>, vector<8x512xf32> -> vector<8x512xf32>
    %185 = arith.addf %182, %184 : vector<8x512xf32>
    %186 = vector.extract_strided_slice %185 {offsets = [0, 0], sizes = [8, 128], strides = [1, 1]} : vector<8x512xf32> to vector<8x128xf32>
    %187 = arith.negf %186 : vector<8x128xf32>
    %188 = math.exp %187 : vector<8x128xf32>
    %cst_72 = arith.constant 1.000000e+00 : f32
    %189 = vector.broadcast %cst_72 : f32 to vector<8x128xf32>
    %190 = arith.addf %189, %188 : vector<8x128xf32>
    %191 = arith.divf %189, %190 : vector<8x128xf32>
    %192 = vector.extract_strided_slice %185 {offsets = [0, 128], sizes = [8, 128], strides = [1, 1]} : vector<8x512xf32> to vector<8x128xf32>
    %193 = arith.negf %192 : vector<8x128xf32>
    %194 = math.exp %193 : vector<8x128xf32>
    %cst_73 = arith.constant 1.000000e+00 : f32
    %195 = vector.broadcast %cst_73 : f32 to vector<8x128xf32>
    %196 = arith.addf %195, %194 : vector<8x128xf32>
    %197 = arith.divf %195, %196 : vector<8x128xf32>
    %198 = vector.extract_strided_slice %185 {offsets = [0, 256], sizes = [8, 128], strides = [1, 1]} : vector<8x512xf32> to vector<8x128xf32>
    %199 = math.tanh %198 : vector<8x128xf32>
    %200 = vector.extract_strided_slice %185 {offsets = [0, 384], sizes = [8, 128], strides = [1, 1]} : vector<8x512xf32> to vector<8x128xf32>
    %201 = arith.negf %200 : vector<8x128xf32>
    %202 = math.exp %201 : vector<8x128xf32>
    %cst_74 = arith.constant 1.000000e+00 : f32
    %203 = vector.broadcast %cst_74 : f32 to vector<8x128xf32>
    %204 = arith.addf %203, %202 : vector<8x128xf32>
    %205 = arith.divf %203, %204 : vector<8x128xf32>
    %206 = arith.mulf %197, %146 : vector<8x128xf32>
    %207 = arith.mulf %191, %199 : vector<8x128xf32>
    %208 = arith.addf %206, %207 : vector<8x128xf32>
    %209 = math.tanh %208 : vector<8x128xf32>
    %210 = arith.mulf %205, %209 : vector<8x128xf32>
    %211 = arith.truncf %181 : vector<8x128xf32> to vector<8x128xbf16>
    %c16_75 = arith.constant 16 : index
    %c0_76 = arith.constant 0 : index
    %212 = vector.load %arg6[%c16_75, %c0_76] : memref<32x128xbf16, #tpu.memory_space<vmem>>, vector<8x128xbf16>
    tpu.vector_store %arg6[%c16_75, %c0_76], %211 {strides = array<i32>} : memref<32x128xbf16, #tpu.memory_space<vmem>>, vector<8x128xbf16>,
    %213 = arith.truncf %210 : vector<8x128xf32> to vector<8x128xbf16>
    %c8_77 = arith.constant 8 : index
    %c0_78 = arith.constant 0 : index
    %214 = vector.load %arg7[%c8_77, %c0_78] : memref<32x128xbf16, #tpu.memory_space<vmem>>, vector<8x128xbf16>
    tpu.vector_store %arg7[%c8_77, %c0_78], %213 {strides = array<i32>} : memref<32x128xbf16, #tpu.memory_space<vmem>>, vector<8x128xbf16>,
    %c24_79 = arith.constant 24 : index
    %c0_80 = arith.constant 0 : index
    %215 = vector.load %arg12[%c24_79, %c0_80] : memref<32x512xf32, #tpu.memory_space<vmem>>, vector<8x512xf32>
    %216 = arith.truncf %181 : vector<8x128xf32> to vector<8x128xbf16>
    %cst_81 = arith.constant dense<0.000000e+00> : vector<8x512xf32>
    %217 = tpu.matmul %216, %22, %cst_81 {dimension_numbers = #tpu.dot_dimension_numbers<[1], [0], [0], [1], [0, 0, 1, 1], [], []>} : vector<8x128xbf16>, vector<128x512xbf16>, vector<8x512xf32> -> vector<8x512xf32>
    %218 = arith.addf %215, %217 : vector<8x512xf32>
    %219 = vector.extract_strided_slice %218 {offsets = [0, 0], sizes = [8, 128], strides = [1, 1]} : vector<8x512xf32> to vector<8x128xf32>
    %220 = arith.negf %219 : vector<8x128xf32>
    %221 = math.exp %220 : vector<8x128xf32>
    %cst_82 = arith.constant 1.000000e+00 : f32
    %222 = vector.broadcast %cst_82 : f32 to vector<8x128xf32>
    %223 = arith.addf %222, %221 : vector<8x128xf32>
    %224 = arith.divf %222, %223 : vector<8x128xf32>
    %225 = vector.extract_strided_slice %218 {offsets = [0, 128], sizes = [8, 128], strides = [1, 1]} : vector<8x512xf32> to vector<8x128xf32>
    %226 = arith.negf %225 : vector<8x128xf32>
    %227 = math.exp %226 : vector<8x128xf32>
    %cst_83 = arith.constant 1.000000e+00 : f32
    %228 = vector.broadcast %cst_83 : f32 to vector<8x128xf32>
    %229 = arith.addf %228, %227 : vector<8x128xf32>
    %230 = arith.divf %228, %229 : vector<8x128xf32>
    %231 = vector.extract_strided_slice %218 {offsets = [0, 256], sizes = [8, 128], strides = [1, 1]} : vector<8x512xf32> to vector<8x128xf32>
    %232 = math.tanh %231 : vector<8x128xf32>
    %233 = vector.extract_strided_slice %218 {offsets = [0, 384], sizes = [8, 128], strides = [1, 1]} : vector<8x512xf32> to vector<8x128xf32>
    %234 = arith.negf %233 : vector<8x128xf32>
    %235 = math.exp %234 : vector<8x128xf32>
    %cst_84 = arith.constant 1.000000e+00 : f32
    %236 = vector.broadcast %cst_84 : f32 to vector<8x128xf32>
    %237 = arith.addf %236, %235 : vector<8x128xf32>
    %238 = arith.divf %236, %237 : vector<8x128xf32>
    %239 = arith.mulf %230, %179 : vector<8x128xf32>
    %240 = arith.mulf %224, %232 : vector<8x128xf32>
    %241 = arith.addf %239, %240 : vector<8x128xf32>
    %242 = math.tanh %241 : vector<8x128xf32>
    %243 = arith.mulf %238, %242 : vector<8x128xf32>
    %c0_85 = arith.constant 0 : index
    %c0_86 = arith.constant 0 : index
    %244 = vector.load %arg13[%c0_85, %c0_86] : memref<32x512xf32, #tpu.memory_space<vmem>>, vector<8x512xf32>
    %245 = arith.truncf %210 : vector<8x128xf32> to vector<8x128xbf16>
    %cst_87 = arith.constant dense<0.000000e+00> : vector<8x512xf32>
    %246 = tpu.matmul %245, %24, %cst_87 {dimension_numbers = #tpu.dot_dimension_numbers<[1], [0], [0], [1], [0, 0, 1, 1], [], []>} : vector<8x128xbf16>, vector<128x512xbf16>, vector<8x512xf32> -> vector<8x512xf32>
    %247 = arith.addf %244, %246 : vector<8x512xf32>
    %248 = vector.extract_strided_slice %247 {offsets = [0, 0], sizes = [8, 128], strides = [1, 1]} : vector<8x512xf32> to vector<8x128xf32>
    %249 = arith.negf %248 : vector<8x128xf32>
    %250 = math.exp %249 : vector<8x128xf32>
    %cst_88 = arith.constant 1.000000e+00 : f32
    %251 = vector.broadcast %cst_88 : f32 to vector<8x128xf32>
    %252 = arith.addf %251, %250 : vector<8x128xf32>
    %253 = arith.divf %251, %252 : vector<8x128xf32>
    %254 = vector.extract_strided_slice %247 {offsets = [0, 128], sizes = [8, 128], strides = [1, 1]} : vector<8x512xf32> to vector<8x128xf32>
    %255 = arith.negf %254 : vector<8x128xf32>
    %256 = math.exp %255 : vector<8x128xf32>
    %cst_89 = arith.constant 1.000000e+00 : f32
    %257 = vector.broadcast %cst_89 : f32 to vector<8x128xf32>
    %258 = arith.addf %257, %256 : vector<8x128xf32>
    %259 = arith.divf %257, %258 : vector<8x128xf32>
    %260 = vector.extract_strided_slice %247 {offsets = [0, 256], sizes = [8, 128], strides = [1, 1]} : vector<8x512xf32> to vector<8x128xf32>
    %261 = math.tanh %260 : vector<8x128xf32>
    %262 = vector.extract_strided_slice %247 {offsets = [0, 384], sizes = [8, 128], strides = [1, 1]} : vector<8x512xf32> to vector<8x128xf32>
    %263 = arith.negf %262 : vector<8x128xf32>
    %264 = math.exp %263 : vector<8x128xf32>
    %cst_90 = arith.constant 1.000000e+00 : f32
    %265 = vector.broadcast %cst_90 : f32 to vector<8x128xf32>
    %266 = arith.addf %265, %264 : vector<8x128xf32>
    %267 = arith.divf %265, %266 : vector<8x128xf32>
    %268 = arith.mulf %259, %208 : vector<8x128xf32>
    %269 = arith.mulf %253, %261 : vector<8x128xf32>
    %270 = arith.addf %268, %269 : vector<8x128xf32>
    %271 = math.tanh %270 : vector<8x128xf32>
    %272 = arith.mulf %267, %271 : vector<8x128xf32>
    %273 = arith.truncf %243 : vector<8x128xf32> to vector<8x128xbf16>
    %c24_91 = arith.constant 24 : index
    %c0_92 = arith.constant 0 : index
    %274 = vector.load %arg6[%c24_91, %c0_92] : memref<32x128xbf16, #tpu.memory_space<vmem>>, vector<8x128xbf16>
    tpu.vector_store %arg6[%c24_91, %c0_92], %273 {strides = array<i32>} : memref<32x128xbf16, #tpu.memory_space<vmem>>, vector<8x128xbf16>,
    %275 = arith.truncf %272 : vector<8x128xf32> to vector<8x128xbf16>
    %c0_93 = arith.constant 0 : index
    %c0_94 = arith.constant 0 : index
    %276 = vector.load %arg7[%c0_93, %c0_94] : memref<32x128xbf16, #tpu.memory_space<vmem>>, vector<8x128xbf16>
    tpu.vector_store %arg7[%c0_93, %c0_94], %275 {strides = array<i32>} : memref<32x128xbf16, #tpu.memory_space<vmem>>, vector<8x128xbf16>,
    %c0_95 = arith.constant 0 : index
    %c0_96 = arith.constant 0 : index
    %277 = vector.load %arg8[%c0_95, %c0_96] : memref<8x128xf32, #tpu.memory_space<vmem>>, vector<8x128xf32>
    tpu.vector_store %arg8[%c0_95, %c0_96], %243 {strides = array<i32>} : memref<8x128xf32, #tpu.memory_space<vmem>>, vector<8x128xf32>,
    %c0_97 = arith.constant 0 : index
    %c0_98 = arith.constant 0 : index
    %278 = vector.load %arg9[%c0_97, %c0_98] : memref<8x128xf32, #tpu.memory_space<vmem>>, vector<8x128xf32>
    tpu.vector_store %arg9[%c0_97, %c0_98], %241 {strides = array<i32>} : memref<8x128xf32, #tpu.memory_space<vmem>>, vector<8x128xf32>,
    %c0_99 = arith.constant 0 : index
    %c0_100 = arith.constant 0 : index
    %279 = vector.load %arg10[%c0_99, %c0_100] : memref<8x128xf32, #tpu.memory_space<vmem>>, vector<8x128xf32>
    tpu.vector_store %arg10[%c0_99, %c0_100], %272 {strides = array<i32>} : memref<8x128xf32, #tpu.memory_space<vmem>>, vector<8x128xf32>,
    %c0_101 = arith.constant 0 : index
    %c0_102 = arith.constant 0 : index
    %280 = vector.load %arg11[%c0_101, %c0_102] : memref<8x128xf32, #tpu.memory_space<vmem>>, vector<8x128xf32>
    tpu.vector_store %arg11[%c0_101, %c0_102], %270 {strides = array<i32>} : memref<8x128xf32, #tpu.memory_space<vmem>>, vector<8x128xf32>,
    return
  }
  func.func @transform_0(%arg0: i32) -> (i32, i32) {
    %c0_i32 = arith.constant 0 : i32
    %c0_i32_0 = arith.constant 0 : i32
    return %arg0, %c0_i32 : i32, i32
  }
  func.func @transform_1(%arg0: i32) -> (i32, i32) {
    %c1_i32 = arith.constant 1 : i32
    %0 = arith.subi %c1_i32, %arg0 : i32
    %c0_i32 = arith.constant 0 : i32
    %c0_i32_0 = arith.constant 0 : i32
    return %0, %c0_i32 : i32, i32
  }
  func.func @transform_2(%arg0: i32) -> (i32, i32, i32) {
    %c0_i32 = arith.constant 0 : i32
    %c0_i32_0 = arith.constant 0 : i32
    %c0_i32_1 = arith.constant 0 : i32
    %c0_i32_2 = arith.constant 0 : i32
    return %c0_i32, %c0_i32_0, %c0_i32_1 : i32, i32, i32
  }
  func.func @transform_3(%arg0: i32) -> (i32, i32, i32) {
    %c0_i32 = arith.constant 0 : i32
    %c0_i32_0 = arith.constant 0 : i32
    %c0_i32_1 = arith.constant 0 : i32
    %c0_i32_2 = arith.constant 0 : i32
    return %c0_i32, %c0_i32_0, %c0_i32_1 : i32, i32, i32
  }
  func.func @transform_4(%arg0: i32) -> (i32, i32, i32) {
    %c0_i32 = arith.constant 0 : i32
    %c0_i32_0 = arith.constant 0 : i32
    %c0_i32_1 = arith.constant 0 : i32
    %c0_i32_2 = arith.constant 0 : i32
    return %c0_i32, %c0_i32_0, %c0_i32_1 : i32, i32, i32
  }
  func.func @transform_5(%arg0: i32) -> (i32, i32) {
    %c0_i32 = arith.constant 0 : i32
    %c0_i32_0 = arith.constant 0 : i32
    return %arg0, %c0_i32 : i32, i32
  }
  func.func @transform_6(%arg0: i32) -> (i32, i32) {
    %c1_i32 = arith.constant 1 : i32
    %0 = arith.subi %c1_i32, %arg0 : i32
    %c0_i32 = arith.constant 0 : i32
    %c0_i32_0 = arith.constant 0 : i32
    return %0, %c0_i32 : i32, i32
  }
}

module attributes {stable_mosaic.version = 11 : i64} {
  func.func @kernel(%arg0: i32, %arg1: memref<32x128xbf16, #tpu.memory_space<vmem>>, %arg2: memref<32x128xbf16, #tpu.memory_space<vmem>>, %arg3: memref<32x128xbf16, #tpu.memory_space<vmem>>, %arg4: memref<32x128xbf16, #tpu.memory_space<vmem>>, %arg5: memref<4x128x512xbf16, #tpu.memory_space<vmem>>, %arg6: memref<2x128x512xbf16, #tpu.memory_space<vmem>>, %arg7: memref<2x1x512xf32, #tpu.memory_space<vmem>>, %arg8: memref<2x128x128xbf16, #tpu.memory_space<vmem>>, %arg9: memref<1x128xf32, #tpu.memory_space<vmem>>, %arg10: memref<8x128xf32, #tpu.memory_space<vmem>>, %arg11: memref<8x128xf32, #tpu.memory_space<vmem>>, %arg12: memref<8x128xf32, #tpu.memory_space<vmem>>, %arg13: memref<8x128xf32, #tpu.memory_space<vmem>>, %arg14: memref<8x128xf32, #tpu.memory_space<vmem>>, %arg15: memref<32x512xf32, #tpu.memory_space<vmem>>, %arg16: memref<32x512xf32, #tpu.memory_space<vmem>>, %arg17: memref<8x128xf32, #tpu.memory_space<vmem>>) attributes {dimension_semantics = [#tpu.dimension_semantics<arbitrary>], iteration_bounds = array<i64: 2>, scalar_prefetch = 0 : i64, scratch_operands = 7 : i64, tpu.core_type = #tpu.core_type<tc>, window_params = [{transform_indices = @transform_0, window_bounds = array<i64: 32, 128>}, {transform_indices = @transform_1, window_bounds = array<i64: 32, 128>}, {transform_indices = @transform_2, window_bounds = array<i64: 32, 128>}, {transform_indices = @transform_3, window_bounds = array<i64: 32, 128>}, {pipeline_mode = #tpu.pipeline_mode<synchronous>, transform_indices = @transform_4, window_bounds = array<i64: 4, 128, 512>}, {pipeline_mode = #tpu.pipeline_mode<synchronous>, transform_indices = @transform_5, window_bounds = array<i64: 2, 128, 512>}, {pipeline_mode = #tpu.pipeline_mode<synchronous>, transform_indices = @transform_6, window_bounds = array<i64: 2, 1, 512>}, {pipeline_mode = #tpu.pipeline_mode<synchronous>, transform_indices = @transform_7, window_bounds = array<i64: 2, 128, 128>}, {pipeline_mode = #tpu.pipeline_mode<synchronous>, transform_indices = @transform_8, window_bounds = array<i64: 1, 128>}, {pipeline_mode = #tpu.pipeline_mode<synchronous>, transform_indices = @transform_9, window_bounds = array<i64: 8, 128>}]} {
    %c0_i32 = arith.constant 0 : i32
    %0 = arith.cmpi eq, %arg0, %c0_i32 : i32
    %1 = arith.extui %0 : i1 to i32
    %c0_i32_0 = arith.constant 0 : i32
    %2 = arith.cmpi ne, %1, %c0_i32_0 : i32
    scf.if %2 {
      %cst_100 = arith.constant 0.000000e+00 : f32
      %281 = vector.broadcast %cst_100 : f32 to vector<8x128xf32>
      %c0_101 = arith.constant 0 : index
      %c0_102 = arith.constant 0 : index
      %282 = vector.load %arg11[%c0_101, %c0_102] : memref<8x128xf32, #tpu.memory_space<vmem>>, vector<8x128xf32>
      tpu.vector_store %arg11[%c0_101, %c0_102], %281 {strides = array<i32>} : memref<8x128xf32, #tpu.memory_space<vmem>>, vector<8x128xf32>,
      %cst_103 = arith.constant 0.000000e+00 : f32
      %283 = vector.broadcast %cst_103 : f32 to vector<8x128xf32>
      %c0_104 = arith.constant 0 : index
      %c0_105 = arith.constant 0 : index
      %284 = vector.load %arg12[%c0_104, %c0_105] : memref<8x128xf32, #tpu.memory_space<vmem>>, vector<8x128xf32>
      tpu.vector_store %arg12[%c0_104, %c0_105], %283 {strides = array<i32>} : memref<8x128xf32, #tpu.memory_space<vmem>>, vector<8x128xf32>,
      %cst_106 = arith.constant 0.000000e+00 : f32
      %285 = vector.broadcast %cst_106 : f32 to vector<8x128xf32>
      %c0_107 = arith.constant 0 : index
      %c0_108 = arith.constant 0 : index
      %286 = vector.load %arg13[%c0_107, %c0_108] : memref<8x128xf32, #tpu.memory_space<vmem>>, vector<8x128xf32>
      tpu.vector_store %arg13[%c0_107, %c0_108], %285 {strides = array<i32>} : memref<8x128xf32, #tpu.memory_space<vmem>>, vector<8x128xf32>,
      %cst_109 = arith.constant 0.000000e+00 : f32
      %287 = vector.broadcast %cst_109 : f32 to vector<8x128xf32>
      %c0_110 = arith.constant 0 : index
      %c0_111 = arith.constant 0 : index
      %288 = vector.load %arg14[%c0_110, %c0_111] : memref<8x128xf32, #tpu.memory_space<vmem>>, vector<8x128xf32>
      tpu.vector_store %arg14[%c0_110, %c0_111], %287 {strides = array<i32>} : memref<8x128xf32, #tpu.memory_space<vmem>>, vector<8x128xf32>,
    } else {
    }
    %c0 = arith.constant 0 : index
    %c0_1 = arith.constant 0 : index
    %3 = vector.load %arg1[%c0, %c0_1] : memref<32x128xbf16, #tpu.memory_space<vmem>>, vector<32x128xbf16>
    %c0_2 = arith.constant 0 : index
    %c0_3 = arith.constant 0 : index
    %c0_4 = arith.constant 0 : index
    %4 = vector.load %arg5[%c0_2, %c0_3, %c0_4] : memref<4x128x512xbf16, #tpu.memory_space<vmem>>, vector<1x128x512xbf16>
    %5 = vector.shape_cast %4 : vector<1x128x512xbf16> to vector<128x512xbf16>
    %cst = arith.constant dense<0.000000e+00> : vector<32x512xf32>
    %6 = tpu.matmul %3, %5, %cst {dimension_numbers = #tpu.dot_dimension_numbers<[1], [0], [0], [1], [0, 0, 1, 1], [], []>} : vector<32x128xbf16>, vector<128x512xbf16>, vector<32x512xf32> -> vector<32x512xf32>
    %c0_5 = arith.constant 0 : index
    %c0_6 = arith.constant 0 : index
    %7 = vector.load %arg3[%c0_5, %c0_6] : memref<32x128xbf16, #tpu.memory_space<vmem>>, vector<32x128xbf16>
    %c2 = arith.constant 2 : index
    %c0_7 = arith.constant 0 : index
    %c0_8 = arith.constant 0 : index
    %8 = vector.load %arg5[%c2, %c0_7, %c0_8] : memref<4x128x512xbf16, #tpu.memory_space<vmem>>, vector<1x128x512xbf16>
    %9 = vector.shape_cast %8 : vector<1x128x512xbf16> to vector<128x512xbf16>
    %cst_9 = arith.constant dense<0.000000e+00> : vector<32x512xf32>
    %10 = tpu.matmul %7, %9, %cst_9 {dimension_numbers = #tpu.dot_dimension_numbers<[1], [0], [0], [1], [0, 0, 1, 1], [], []>} : vector<32x128xbf16>, vector<128x512xbf16>, vector<32x512xf32> -> vector<32x512xf32>
    %c0_10 = arith.constant 0 : index
    %c0_11 = arith.constant 0 : index
    %11 = vector.load %arg2[%c0_10, %c0_11] : memref<32x128xbf16, #tpu.memory_space<vmem>>, vector<32x128xbf16>
    %c1 = arith.constant 1 : index
    %c0_12 = arith.constant 0 : index
    %c0_13 = arith.constant 0 : index
    %12 = vector.load %arg5[%c1, %c0_12, %c0_13] : memref<4x128x512xbf16, #tpu.memory_space<vmem>>, vector<1x128x512xbf16>
    %13 = vector.shape_cast %12 : vector<1x128x512xbf16> to vector<128x512xbf16>
    %cst_14 = arith.constant dense<0.000000e+00> : vector<32x512xf32>
    %14 = tpu.matmul %11, %13, %cst_14 {dimension_numbers = #tpu.dot_dimension_numbers<[1], [0], [0], [1], [0, 0, 1, 1], [], []>} : vector<32x128xbf16>, vector<128x512xbf16>, vector<32x512xf32> -> vector<32x512xf32>
    %15 = arith.addf %6, %14 : vector<32x512xf32>
    %c0_15 = arith.constant 0 : index
    %c0_16 = arith.constant 0 : index
    %16 = vector.load %arg4[%c0_15, %c0_16] : memref<32x128xbf16, #tpu.memory_space<vmem>>, vector<32x128xbf16>
    %c3 = arith.constant 3 : index
    %c0_17 = arith.constant 0 : index
    %c0_18 = arith.constant 0 : index
    %17 = vector.load %arg5[%c3, %c0_17, %c0_18] : memref<4x128x512xbf16, #tpu.memory_space<vmem>>, vector<1x128x512xbf16>
    %18 = vector.shape_cast %17 : vector<1x128x512xbf16> to vector<128x512xbf16>
    %cst_19 = arith.constant dense<0.000000e+00> : vector<32x512xf32>
    %19 = tpu.matmul %16, %18, %cst_19 {dimension_numbers = #tpu.dot_dimension_numbers<[1], [0], [0], [1], [0, 0, 1, 1], [], []>} : vector<32x128xbf16>, vector<128x512xbf16>, vector<32x512xf32> -> vector<32x512xf32>
    %20 = arith.addf %10, %19 : vector<32x512xf32>
    %c0_20 = arith.constant 0 : index
    %c0_21 = arith.constant 0 : index
    %c0_22 = arith.constant 0 : index
    %21 = vector.load %arg7[%c0_20, %c0_21, %c0_22] : memref<2x1x512xf32, #tpu.memory_space<vmem>>, vector<1x1x512xf32>
    %22 = vector.shape_cast %21 : vector<1x1x512xf32> to vector<1x512xf32>
    %23 = vector.broadcast %22 : vector<1x512xf32> to vector<32x512xf32>
    %24 = arith.addf %15, %23 : vector<32x512xf32>
    %c0_23 = arith.constant 0 : index
    %c0_24 = arith.constant 0 : index
    %25 = vector.load %arg15[%c0_23, %c0_24] : memref<32x512xf32, #tpu.memory_space<vmem>>, vector<32x512xf32>
    tpu.vector_store %arg15[%c0_23, %c0_24], %24 {strides = array<i32>} : memref<32x512xf32, #tpu.memory_space<vmem>>, vector<32x512xf32>,
    %c1_25 = arith.constant 1 : index
    %c0_26 = arith.constant 0 : index
    %c0_27 = arith.constant 0 : index
    %26 = vector.load %arg7[%c1_25, %c0_26, %c0_27] : memref<2x1x512xf32, #tpu.memory_space<vmem>>, vector<1x1x512xf32>
    %27 = vector.shape_cast %26 : vector<1x1x512xf32> to vector<1x512xf32>
    %28 = vector.broadcast %27 : vector<1x512xf32> to vector<32x512xf32>
    %29 = arith.addf %20, %28 : vector<32x512xf32>
    %c0_28 = arith.constant 0 : index
    %c0_29 = arith.constant 0 : index
    %30 = vector.load %arg16[%c0_28, %c0_29] : memref<32x512xf32, #tpu.memory_space<vmem>>, vector<32x512xf32>
    tpu.vector_store %arg16[%c0_28, %c0_29], %29 {strides = array<i32>} : memref<32x512xf32, #tpu.memory_space<vmem>>, vector<32x512xf32>,
    %c0_30 = arith.constant 0 : index
    %c0_31 = arith.constant 0 : index
    %c0_32 = arith.constant 0 : index
    %31 = vector.load %arg6[%c0_30, %c0_31, %c0_32] : memref<2x128x512xbf16, #tpu.memory_space<vmem>>, vector<1x128x512xbf16>
    %32 = vector.shape_cast %31 : vector<1x128x512xbf16> to vector<128x512xbf16>
    %c1_33 = arith.constant 1 : index
    %c0_34 = arith.constant 0 : index
    %c0_35 = arith.constant 0 : index
    %33 = vector.load %arg6[%c1_33, %c0_34, %c0_35] : memref<2x128x512xbf16, #tpu.memory_space<vmem>>, vector<1x128x512xbf16>
    %34 = vector.shape_cast %33 : vector<1x128x512xbf16> to vector<128x512xbf16>
    %c0_36 = arith.constant 0 : index
    %c0_37 = arith.constant 0 : index
    %35 = vector.load %arg11[%c0_36, %c0_37] : memref<8x128xf32, #tpu.memory_space<vmem>>, vector<8x128xf32>
    %c0_38 = arith.constant 0 : index
    %c0_39 = arith.constant 0 : index
    %36 = vector.load %arg12[%c0_38, %c0_39] : memref<8x128xf32, #tpu.memory_space<vmem>>, vector<8x128xf32>
    %c0_40 = arith.constant 0 : index
    %c0_41 = arith.constant 0 : index
    %37 = vector.load %arg13[%c0_40, %c0_41] : memref<8x128xf32, #tpu.memory_space<vmem>>, vector<8x128xf32>
    %c0_42 = arith.constant 0 : index
    %c0_43 = arith.constant 0 : index
    %38 = vector.load %arg14[%c0_42, %c0_43] : memref<8x128xf32, #tpu.memory_space<vmem>>, vector<8x128xf32>
    %c0_44 = arith.constant 0 : index
    %c0_45 = arith.constant 0 : index
    %39 = vector.load %arg15[%c0_44, %c0_45] : memref<32x512xf32, #tpu.memory_space<vmem>>, vector<8x512xf32>
    %40 = arith.truncf %35 : vector<8x128xf32> to vector<8x128xbf16>
    %cst_46 = arith.constant dense<0.000000e+00> : vector<8x512xf32>
    %41 = tpu.matmul %40, %32, %cst_46 {dimension_numbers = #tpu.dot_dimension_numbers<[1], [0], [0], [1], [0, 0, 1, 1], [], []>} : vector<8x128xbf16>, vector<128x512xbf16>, vector<8x512xf32> -> vector<8x512xf32>
    %42 = arith.addf %39, %41 : vector<8x512xf32>
    %43 = vector.extract_strided_slice %42 {offsets = [0, 0], sizes = [8, 128], strides = [1, 1]} : vector<8x512xf32> to vector<8x128xf32>
    %44 = arith.negf %43 : vector<8x128xf32>
    %45 = math.exp %44 : vector<8x128xf32>
    %cst_47 = arith.constant 1.000000e+00 : f32
    %46 = vector.broadcast %cst_47 : f32 to vector<8x128xf32>
    %47 = arith.addf %46, %45 : vector<8x128xf32>
    %48 = arith.divf %46, %47 : vector<8x128xf32>
    %49 = vector.extract_strided_slice %42 {offsets = [0, 128], sizes = [8, 128], strides = [1, 1]} : vector<8x512xf32> to vector<8x128xf32>
    %50 = arith.negf %49 : vector<8x128xf32>
    %51 = math.exp %50 : vector<8x128xf32>
    %cst_48 = arith.constant 1.000000e+00 : f32
    %52 = vector.broadcast %cst_48 : f32 to vector<8x128xf32>
    %53 = arith.addf %52, %51 : vector<8x128xf32>
    %54 = arith.divf %52, %53 : vector<8x128xf32>
    %55 = vector.extract_strided_slice %42 {offsets = [0, 256], sizes = [8, 128], strides = [1, 1]} : vector<8x512xf32> to vector<8x128xf32>
    %56 = math.tanh %55 : vector<8x128xf32>
    %57 = vector.extract_strided_slice %42 {offsets = [0, 384], sizes = [8, 128], strides = [1, 1]} : vector<8x512xf32> to vector<8x128xf32>
    %58 = arith.negf %57 : vector<8x128xf32>
    %59 = math.exp %58 : vector<8x128xf32>
    %cst_49 = arith.constant 1.000000e+00 : f32
    %60 = vector.broadcast %cst_49 : f32 to vector<8x128xf32>
    %61 = arith.addf %60, %59 : vector<8x128xf32>
    %62 = arith.divf %60, %61 : vector<8x128xf32>
    %63 = arith.mulf %54, %36 : vector<8x128xf32>
    %64 = arith.mulf %48, %56 : vector<8x128xf32>
    %65 = arith.addf %63, %64 : vector<8x128xf32>
    %66 = math.tanh %65 : vector<8x128xf32>
    %67 = arith.mulf %62, %66 : vector<8x128xf32>
    %c24 = arith.constant 24 : index
    %c0_50 = arith.constant 0 : index
    %68 = vector.load %arg16[%c24, %c0_50] : memref<32x512xf32, #tpu.memory_space<vmem>>, vector<8x512xf32>
    %69 = arith.truncf %37 : vector<8x128xf32> to vector<8x128xbf16>
    %cst_51 = arith.constant dense<0.000000e+00> : vector<8x512xf32>
    %70 = tpu.matmul %69, %34, %cst_51 {dimension_numbers = #tpu.dot_dimension_numbers<[1], [0], [0], [1], [0, 0, 1, 1], [], []>} : vector<8x128xbf16>, vector<128x512xbf16>, vector<8x512xf32> -> vector<8x512xf32>
    %71 = arith.addf %68, %70 : vector<8x512xf32>
    %72 = vector.extract_strided_slice %71 {offsets = [0, 0], sizes = [8, 128], strides = [1, 1]} : vector<8x512xf32> to vector<8x128xf32>
    %73 = arith.negf %72 : vector<8x128xf32>
    %74 = math.exp %73 : vector<8x128xf32>
    %cst_52 = arith.constant 1.000000e+00 : f32
    %75 = vector.broadcast %cst_52 : f32 to vector<8x128xf32>
    %76 = arith.addf %75, %74 : vector<8x128xf32>
    %77 = arith.divf %75, %76 : vector<8x128xf32>
    %78 = vector.extract_strided_slice %71 {offsets = [0, 128], sizes = [8, 128], strides = [1, 1]} : vector<8x512xf32> to vector<8x128xf32>
    %79 = arith.negf %78 : vector<8x128xf32>
    %80 = math.exp %79 : vector<8x128xf32>
    %cst_53 = arith.constant 1.000000e+00 : f32
    %81 = vector.broadcast %cst_53 : f32 to vector<8x128xf32>
    %82 = arith.addf %81, %80 : vector<8x128xf32>
    %83 = arith.divf %81, %82 : vector<8x128xf32>
    %84 = vector.extract_strided_slice %71 {offsets = [0, 256], sizes = [8, 128], strides = [1, 1]} : vector<8x512xf32> to vector<8x128xf32>
    %85 = math.tanh %84 : vector<8x128xf32>
    %86 = vector.extract_strided_slice %71 {offsets = [0, 384], sizes = [8, 128], strides = [1, 1]} : vector<8x512xf32> to vector<8x128xf32>
    %87 = arith.negf %86 : vector<8x128xf32>
    %88 = math.exp %87 : vector<8x128xf32>
    %cst_54 = arith.constant 1.000000e+00 : f32
    %89 = vector.broadcast %cst_54 : f32 to vector<8x128xf32>
    %90 = arith.addf %89, %88 : vector<8x128xf32>
    %91 = arith.divf %89, %90 : vector<8x128xf32>
    %92 = arith.mulf %83, %38 : vector<8x128xf32>
    %93 = arith.mulf %77, %85 : vector<8x128xf32>
    %94 = arith.addf %92, %93 : vector<8x128xf32>
    %95 = math.tanh %94 : vector<8x128xf32>
    %96 = arith.mulf %91, %95 : vector<8x128xf32>
    %c0_i32_55 = arith.constant 0 : i32
    %97 = arith.cmpi eq, %arg0, %c0_i32_55 : i32
    %98 = arith.extui %97 : i1 to i32
    %c0_i32_56 = arith.constant 0 : i32
    %99 = arith.cmpi ne, %98, %c0_i32_56 : i32
    scf.if %99 {
      %c0_100 = arith.constant 0 : index
      %c0_101 = arith.constant 0 : index
      %281 = vector.load %arg17[%c0_100, %c0_101] : memref<8x128xf32, #tpu.memory_space<vmem>>, vector<8x128xf32>
      tpu.vector_store %arg17[%c0_100, %c0_101], %96 {strides = array<i32>} : memref<8x128xf32, #tpu.memory_space<vmem>>, vector<8x128xf32>,
    } else {
    }
    %c8 = arith.constant 8 : index
    %c0_57 = arith.constant 0 : index
    %100 = vector.load %arg15[%c8, %c0_57] : memref<32x512xf32, #tpu.memory_space<vmem>>, vector<8x512xf32>
    %101 = arith.truncf %67 : vector<8x128xf32> to vector<8x128xbf16>
    %cst_58 = arith.constant dense<0.000000e+00> : vector<8x512xf32>
    %102 = tpu.matmul %101, %32, %cst_58 {dimension_numbers = #tpu.dot_dimension_numbers<[1], [0], [0], [1], [0, 0, 1, 1], [], []>} : vector<8x128xbf16>, vector<128x512xbf16>, vector<8x512xf32> -> vector<8x512xf32>
    %103 = arith.addf %100, %102 : vector<8x512xf32>
    %104 = vector.extract_strided_slice %103 {offsets = [0, 0], sizes = [8, 128], strides = [1, 1]} : vector<8x512xf32> to vector<8x128xf32>
    %105 = arith.negf %104 : vector<8x128xf32>
    %106 = math.exp %105 : vector<8x128xf32>
    %cst_59 = arith.constant 1.000000e+00 : f32
    %107 = vector.broadcast %cst_59 : f32 to vector<8x128xf32>
    %108 = arith.addf %107, %106 : vector<8x128xf32>
    %109 = arith.divf %107, %108 : vector<8x128xf32>
    %110 = vector.extract_strided_slice %103 {offsets = [0, 128], sizes = [8, 128], strides = [1, 1]} : vector<8x512xf32> to vector<8x128xf32>
    %111 = arith.negf %110 : vector<8x128xf32>
    %112 = math.exp %111 : vector<8x128xf32>
    %cst_60 = arith.constant 1.000000e+00 : f32
    %113 = vector.broadcast %cst_60 : f32 to vector<8x128xf32>
    %114 = arith.addf %113, %112 : vector<8x128xf32>
    %115 = arith.divf %113, %114 : vector<8x128xf32>
    %116 = vector.extract_strided_slice %103 {offsets = [0, 256], sizes = [8, 128], strides = [1, 1]} : vector<8x512xf32> to vector<8x128xf32>
    %117 = math.tanh %116 : vector<8x128xf32>
    %118 = vector.extract_strided_slice %103 {offsets = [0, 384], sizes = [8, 128], strides = [1, 1]} : vector<8x512xf32> to vector<8x128xf32>
    %119 = arith.negf %118 : vector<8x128xf32>
    %120 = math.exp %119 : vector<8x128xf32>
    %cst_61 = arith.constant 1.000000e+00 : f32
    %121 = vector.broadcast %cst_61 : f32 to vector<8x128xf32>
    %122 = arith.addf %121, %120 : vector<8x128xf32>
    %123 = arith.divf %121, %122 : vector<8x128xf32>
    %124 = arith.mulf %115, %65 : vector<8x128xf32>
    %125 = arith.mulf %109, %117 : vector<8x128xf32>
    %126 = arith.addf %124, %125 : vector<8x128xf32>
    %127 = math.tanh %126 : vector<8x128xf32>
    %128 = arith.mulf %123, %127 : vector<8x128xf32>
    %c16 = arith.constant 16 : index
    %c0_62 = arith.constant 0 : index
    %129 = vector.load %arg16[%c16, %c0_62] : memref<32x512xf32, #tpu.memory_space<vmem>>, vector<8x512xf32>
    %130 = arith.truncf %96 : vector<8x128xf32> to vector<8x128xbf16>
    %cst_63 = arith.constant dense<0.000000e+00> : vector<8x512xf32>
    %131 = tpu.matmul %130, %34, %cst_63 {dimension_numbers = #tpu.dot_dimension_numbers<[1], [0], [0], [1], [0, 0, 1, 1], [], []>} : vector<8x128xbf16>, vector<128x512xbf16>, vector<8x512xf32> -> vector<8x512xf32>
    %132 = arith.addf %129, %131 : vector<8x512xf32>
    %133 = vector.extract_strided_slice %132 {offsets = [0, 0], sizes = [8, 128], strides = [1, 1]} : vector<8x512xf32> to vector<8x128xf32>
    %134 = arith.negf %133 : vector<8x128xf32>
    %135 = math.exp %134 : vector<8x128xf32>
    %cst_64 = arith.constant 1.000000e+00 : f32
    %136 = vector.broadcast %cst_64 : f32 to vector<8x128xf32>
    %137 = arith.addf %136, %135 : vector<8x128xf32>
    %138 = arith.divf %136, %137 : vector<8x128xf32>
    %139 = vector.extract_strided_slice %132 {offsets = [0, 128], sizes = [8, 128], strides = [1, 1]} : vector<8x512xf32> to vector<8x128xf32>
    %140 = arith.negf %139 : vector<8x128xf32>
    %141 = math.exp %140 : vector<8x128xf32>
    %cst_65 = arith.constant 1.000000e+00 : f32
    %142 = vector.broadcast %cst_65 : f32 to vector<8x128xf32>
    %143 = arith.addf %142, %141 : vector<8x128xf32>
    %144 = arith.divf %142, %143 : vector<8x128xf32>
    %145 = vector.extract_strided_slice %132 {offsets = [0, 256], sizes = [8, 128], strides = [1, 1]} : vector<8x512xf32> to vector<8x128xf32>
    %146 = math.tanh %145 : vector<8x128xf32>
    %147 = vector.extract_strided_slice %132 {offsets = [0, 384], sizes = [8, 128], strides = [1, 1]} : vector<8x512xf32> to vector<8x128xf32>
    %148 = arith.negf %147 : vector<8x128xf32>
    %149 = math.exp %148 : vector<8x128xf32>
    %cst_66 = arith.constant 1.000000e+00 : f32
    %150 = vector.broadcast %cst_66 : f32 to vector<8x128xf32>
    %151 = arith.addf %150, %149 : vector<8x128xf32>
    %152 = arith.divf %150, %151 : vector<8x128xf32>
    %153 = arith.mulf %144, %94 : vector<8x128xf32>
    %154 = arith.mulf %138, %146 : vector<8x128xf32>
    %155 = arith.addf %153, %154 : vector<8x128xf32>
    %156 = math.tanh %155 : vector<8x128xf32>
    %157 = arith.mulf %152, %156 : vector<8x128xf32>
    %c16_67 = arith.constant 16 : index
    %c0_68 = arith.constant 0 : index
    %158 = vector.load %arg15[%c16_67, %c0_68] : memref<32x512xf32, #tpu.memory_space<vmem>>, vector<8x512xf32>
    %159 = arith.truncf %128 : vector<8x128xf32> to vector<8x128xbf16>
    %cst_69 = arith.constant dense<0.000000e+00> : vector<8x512xf32>
    %160 = tpu.matmul %159, %32, %cst_69 {dimension_numbers = #tpu.dot_dimension_numbers<[1], [0], [0], [1], [0, 0, 1, 1], [], []>} : vector<8x128xbf16>, vector<128x512xbf16>, vector<8x512xf32> -> vector<8x512xf32>
    %161 = arith.addf %158, %160 : vector<8x512xf32>
    %162 = vector.extract_strided_slice %161 {offsets = [0, 0], sizes = [8, 128], strides = [1, 1]} : vector<8x512xf32> to vector<8x128xf32>
    %163 = arith.negf %162 : vector<8x128xf32>
    %164 = math.exp %163 : vector<8x128xf32>
    %cst_70 = arith.constant 1.000000e+00 : f32
    %165 = vector.broadcast %cst_70 : f32 to vector<8x128xf32>
    %166 = arith.addf %165, %164 : vector<8x128xf32>
    %167 = arith.divf %165, %166 : vector<8x128xf32>
    %168 = vector.extract_strided_slice %161 {offsets = [0, 128], sizes = [8, 128], strides = [1, 1]} : vector<8x512xf32> to vector<8x128xf32>
    %169 = arith.negf %168 : vector<8x128xf32>
    %170 = math.exp %169 : vector<8x128xf32>
    %cst_71 = arith.constant 1.000000e+00 : f32
    %171 = vector.broadcast %cst_71 : f32 to vector<8x128xf32>
    %172 = arith.addf %171, %170 : vector<8x128xf32>
    %173 = arith.divf %171, %172 : vector<8x128xf32>
    %174 = vector.extract_strided_slice %161 {offsets = [0, 256], sizes = [8, 128], strides = [1, 1]} : vector<8x512xf32> to vector<8x128xf32>
    %175 = math.tanh %174 : vector<8x128xf32>
    %176 = vector.extract_strided_slice %161 {offsets = [0, 384], sizes = [8, 128], strides = [1, 1]} : vector<8x512xf32> to vector<8x128xf32>
    %177 = arith.negf %176 : vector<8x128xf32>
    %178 = math.exp %177 : vector<8x128xf32>
    %cst_72 = arith.constant 1.000000e+00 : f32
    %179 = vector.broadcast %cst_72 : f32 to vector<8x128xf32>
    %180 = arith.addf %179, %178 : vector<8x128xf32>
    %181 = arith.divf %179, %180 : vector<8x128xf32>
    %182 = arith.mulf %173, %126 : vector<8x128xf32>
    %183 = arith.mulf %167, %175 : vector<8x128xf32>
    %184 = arith.addf %182, %183 : vector<8x128xf32>
    %185 = math.tanh %184 : vector<8x128xf32>
    %186 = arith.mulf %181, %185 : vector<8x128xf32>
    %c8_73 = arith.constant 8 : index
    %c0_74 = arith.constant 0 : index
    %187 = vector.load %arg16[%c8_73, %c0_74] : memref<32x512xf32, #tpu.memory_space<vmem>>, vector<8x512xf32>
    %188 = arith.truncf %157 : vector<8x128xf32> to vector<8x128xbf16>
    %cst_75 = arith.constant dense<0.000000e+00> : vector<8x512xf32>
    %189 = tpu.matmul %188, %34, %cst_75 {dimension_numbers = #tpu.dot_dimension_numbers<[1], [0], [0], [1], [0, 0, 1, 1], [], []>} : vector<8x128xbf16>, vector<128x512xbf16>, vector<8x512xf32> -> vector<8x512xf32>
    %190 = arith.addf %187, %189 : vector<8x512xf32>
    %191 = vector.extract_strided_slice %190 {offsets = [0, 0], sizes = [8, 128], strides = [1, 1]} : vector<8x512xf32> to vector<8x128xf32>
    %192 = arith.negf %191 : vector<8x128xf32>
    %193 = math.exp %192 : vector<8x128xf32>
    %cst_76 = arith.constant 1.000000e+00 : f32
    %194 = vector.broadcast %cst_76 : f32 to vector<8x128xf32>
    %195 = arith.addf %194, %193 : vector<8x128xf32>
    %196 = arith.divf %194, %195 : vector<8x128xf32>
    %197 = vector.extract_strided_slice %190 {offsets = [0, 128], sizes = [8, 128], strides = [1, 1]} : vector<8x512xf32> to vector<8x128xf32>
    %198 = arith.negf %197 : vector<8x128xf32>
    %199 = math.exp %198 : vector<8x128xf32>
    %cst_77 = arith.constant 1.000000e+00 : f32
    %200 = vector.broadcast %cst_77 : f32 to vector<8x128xf32>
    %201 = arith.addf %200, %199 : vector<8x128xf32>
    %202 = arith.divf %200, %201 : vector<8x128xf32>
    %203 = vector.extract_strided_slice %190 {offsets = [0, 256], sizes = [8, 128], strides = [1, 1]} : vector<8x512xf32> to vector<8x128xf32>
    %204 = math.tanh %203 : vector<8x128xf32>
    %205 = vector.extract_strided_slice %190 {offsets = [0, 384], sizes = [8, 128], strides = [1, 1]} : vector<8x512xf32> to vector<8x128xf32>
    %206 = arith.negf %205 : vector<8x128xf32>
    %207 = math.exp %206 : vector<8x128xf32>
    %cst_78 = arith.constant 1.000000e+00 : f32
    %208 = vector.broadcast %cst_78 : f32 to vector<8x128xf32>
    %209 = arith.addf %208, %207 : vector<8x128xf32>
    %210 = arith.divf %208, %209 : vector<8x128xf32>
    %211 = arith.mulf %202, %155 : vector<8x128xf32>
    %212 = arith.mulf %196, %204 : vector<8x128xf32>
    %213 = arith.addf %211, %212 : vector<8x128xf32>
    %214 = math.tanh %213 : vector<8x128xf32>
    %215 = arith.mulf %210, %214 : vector<8x128xf32>
    %c24_79 = arith.constant 24 : index
    %c0_80 = arith.constant 0 : index
    %216 = vector.load %arg15[%c24_79, %c0_80] : memref<32x512xf32, #tpu.memory_space<vmem>>, vector<8x512xf32>
    %217 = arith.truncf %186 : vector<8x128xf32> to vector<8x128xbf16>
    %cst_81 = arith.constant dense<0.000000e+00> : vector<8x512xf32>
    %218 = tpu.matmul %217, %32, %cst_81 {dimension_numbers = #tpu.dot_dimension_numbers<[1], [0], [0], [1], [0, 0, 1, 1], [], []>} : vector<8x128xbf16>, vector<128x512xbf16>, vector<8x512xf32> -> vector<8x512xf32>
    %219 = arith.addf %216, %218 : vector<8x512xf32>
    %220 = vector.extract_strided_slice %219 {offsets = [0, 0], sizes = [8, 128], strides = [1, 1]} : vector<8x512xf32> to vector<8x128xf32>
    %221 = arith.negf %220 : vector<8x128xf32>
    %222 = math.exp %221 : vector<8x128xf32>
    %cst_82 = arith.constant 1.000000e+00 : f32
    %223 = vector.broadcast %cst_82 : f32 to vector<8x128xf32>
    %224 = arith.addf %223, %222 : vector<8x128xf32>
    %225 = arith.divf %223, %224 : vector<8x128xf32>
    %226 = vector.extract_strided_slice %219 {offsets = [0, 128], sizes = [8, 128], strides = [1, 1]} : vector<8x512xf32> to vector<8x128xf32>
    %227 = arith.negf %226 : vector<8x128xf32>
    %228 = math.exp %227 : vector<8x128xf32>
    %cst_83 = arith.constant 1.000000e+00 : f32
    %229 = vector.broadcast %cst_83 : f32 to vector<8x128xf32>
    %230 = arith.addf %229, %228 : vector<8x128xf32>
    %231 = arith.divf %229, %230 : vector<8x128xf32>
    %232 = vector.extract_strided_slice %219 {offsets = [0, 256], sizes = [8, 128], strides = [1, 1]} : vector<8x512xf32> to vector<8x128xf32>
    %233 = math.tanh %232 : vector<8x128xf32>
    %234 = vector.extract_strided_slice %219 {offsets = [0, 384], sizes = [8, 128], strides = [1, 1]} : vector<8x512xf32> to vector<8x128xf32>
    %235 = arith.negf %234 : vector<8x128xf32>
    %236 = math.exp %235 : vector<8x128xf32>
    %cst_84 = arith.constant 1.000000e+00 : f32
    %237 = vector.broadcast %cst_84 : f32 to vector<8x128xf32>
    %238 = arith.addf %237, %236 : vector<8x128xf32>
    %239 = arith.divf %237, %238 : vector<8x128xf32>
    %240 = arith.mulf %231, %184 : vector<8x128xf32>
    %241 = arith.mulf %225, %233 : vector<8x128xf32>
    %242 = arith.addf %240, %241 : vector<8x128xf32>
    %243 = math.tanh %242 : vector<8x128xf32>
    %244 = arith.mulf %239, %243 : vector<8x128xf32>
    %c0_85 = arith.constant 0 : index
    %c0_86 = arith.constant 0 : index
    %245 = vector.load %arg16[%c0_85, %c0_86] : memref<32x512xf32, #tpu.memory_space<vmem>>, vector<8x512xf32>
    %246 = arith.truncf %215 : vector<8x128xf32> to vector<8x128xbf16>
    %cst_87 = arith.constant dense<0.000000e+00> : vector<8x512xf32>
    %247 = tpu.matmul %246, %34, %cst_87 {dimension_numbers = #tpu.dot_dimension_numbers<[1], [0], [0], [1], [0, 0, 1, 1], [], []>} : vector<8x128xbf16>, vector<128x512xbf16>, vector<8x512xf32> -> vector<8x512xf32>
    %248 = arith.addf %245, %247 : vector<8x512xf32>
    %249 = vector.extract_strided_slice %248 {offsets = [0, 0], sizes = [8, 128], strides = [1, 1]} : vector<8x512xf32> to vector<8x128xf32>
    %250 = arith.negf %249 : vector<8x128xf32>
    %251 = math.exp %250 : vector<8x128xf32>
    %cst_88 = arith.constant 1.000000e+00 : f32
    %252 = vector.broadcast %cst_88 : f32 to vector<8x128xf32>
    %253 = arith.addf %252, %251 : vector<8x128xf32>
    %254 = arith.divf %252, %253 : vector<8x128xf32>
    %255 = vector.extract_strided_slice %248 {offsets = [0, 128], sizes = [8, 128], strides = [1, 1]} : vector<8x512xf32> to vector<8x128xf32>
    %256 = arith.negf %255 : vector<8x128xf32>
    %257 = math.exp %256 : vector<8x128xf32>
    %cst_89 = arith.constant 1.000000e+00 : f32
    %258 = vector.broadcast %cst_89 : f32 to vector<8x128xf32>
    %259 = arith.addf %258, %257 : vector<8x128xf32>
    %260 = arith.divf %258, %259 : vector<8x128xf32>
    %261 = vector.extract_strided_slice %248 {offsets = [0, 256], sizes = [8, 128], strides = [1, 1]} : vector<8x512xf32> to vector<8x128xf32>
    %262 = math.tanh %261 : vector<8x128xf32>
    %263 = vector.extract_strided_slice %248 {offsets = [0, 384], sizes = [8, 128], strides = [1, 1]} : vector<8x512xf32> to vector<8x128xf32>
    %264 = arith.negf %263 : vector<8x128xf32>
    %265 = math.exp %264 : vector<8x128xf32>
    %cst_90 = arith.constant 1.000000e+00 : f32
    %266 = vector.broadcast %cst_90 : f32 to vector<8x128xf32>
    %267 = arith.addf %266, %265 : vector<8x128xf32>
    %268 = arith.divf %266, %267 : vector<8x128xf32>
    %269 = arith.mulf %260, %213 : vector<8x128xf32>
    %270 = arith.mulf %254, %262 : vector<8x128xf32>
    %271 = arith.addf %269, %270 : vector<8x128xf32>
    %272 = math.tanh %271 : vector<8x128xf32>
    %273 = arith.mulf %268, %272 : vector<8x128xf32>
    %c0_91 = arith.constant 0 : index
    %c0_92 = arith.constant 0 : index
    %274 = vector.load %arg11[%c0_91, %c0_92] : memref<8x128xf32, #tpu.memory_space<vmem>>, vector<8x128xf32>
    tpu.vector_store %arg11[%c0_91, %c0_92], %244 {strides = array<i32>} : memref<8x128xf32, #tpu.memory_space<vmem>>, vector<8x128xf32>,
    %c0_93 = arith.constant 0 : index
    %c0_94 = arith.constant 0 : index
    %275 = vector.load %arg12[%c0_93, %c0_94] : memref<8x128xf32, #tpu.memory_space<vmem>>, vector<8x128xf32>
    tpu.vector_store %arg12[%c0_93, %c0_94], %242 {strides = array<i32>} : memref<8x128xf32, #tpu.memory_space<vmem>>, vector<8x128xf32>,
    %c0_95 = arith.constant 0 : index
    %c0_96 = arith.constant 0 : index
    %276 = vector.load %arg13[%c0_95, %c0_96] : memref<8x128xf32, #tpu.memory_space<vmem>>, vector<8x128xf32>
    tpu.vector_store %arg13[%c0_95, %c0_96], %273 {strides = array<i32>} : memref<8x128xf32, #tpu.memory_space<vmem>>, vector<8x128xf32>,
    %c0_97 = arith.constant 0 : index
    %c0_98 = arith.constant 0 : index
    %277 = vector.load %arg14[%c0_97, %c0_98] : memref<8x128xf32, #tpu.memory_space<vmem>>, vector<8x128xf32>
    tpu.vector_store %arg14[%c0_97, %c0_98], %271 {strides = array<i32>} : memref<8x128xf32, #tpu.memory_space<vmem>>, vector<8x128xf32>,
    %c1_i32 = arith.constant 1 : i32
    %278 = arith.cmpi eq, %arg0, %c1_i32 : i32
    %279 = arith.extui %278 : i1 to i32
    %c0_i32_99 = arith.constant 0 : i32
    %280 = arith.cmpi ne, %279, %c0_i32_99 : i32
    scf.if %280 {
      %281 = arith.truncf %244 : vector<8x128xf32> to vector<8x128xbf16>
      %c0_100 = arith.constant 0 : index
      %c0_101 = arith.constant 0 : index
      %c0_102 = arith.constant 0 : index
      %282 = vector.load %arg8[%c0_100, %c0_101, %c0_102] : memref<2x128x128xbf16, #tpu.memory_space<vmem>>, vector<1x128x128xbf16>
      %283 = vector.shape_cast %282 : vector<1x128x128xbf16> to vector<128x128xbf16>
      %cst_103 = arith.constant dense<0.000000e+00> : vector<8x128xf32>
      %284 = tpu.matmul %281, %283, %cst_103 {dimension_numbers = #tpu.dot_dimension_numbers<[1], [0], [0], [1], [0, 0, 1, 1], [], []>} : vector<8x128xbf16>, vector<128x128xbf16>, vector<8x128xf32> -> vector<8x128xf32>
      %c0_104 = arith.constant 0 : index
      %c0_105 = arith.constant 0 : index
      %285 = vector.load %arg17[%c0_104, %c0_105] : memref<8x128xf32, #tpu.memory_space<vmem>>, vector<8x128xf32>
      %286 = arith.truncf %285 : vector<8x128xf32> to vector<8x128xbf16>
      %c1_106 = arith.constant 1 : index
      %c0_107 = arith.constant 0 : index
      %c0_108 = arith.constant 0 : index
      %287 = vector.load %arg8[%c1_106, %c0_107, %c0_108] : memref<2x128x128xbf16, #tpu.memory_space<vmem>>, vector<1x128x128xbf16>
      %288 = vector.shape_cast %287 : vector<1x128x128xbf16> to vector<128x128xbf16>
      %cst_109 = arith.constant dense<0.000000e+00> : vector<8x128xf32>
      %289 = tpu.matmul %286, %288, %cst_109 {dimension_numbers = #tpu.dot_dimension_numbers<[1], [0], [0], [1], [0, 0, 1, 1], [], []>} : vector<8x128xbf16>, vector<128x128xbf16>, vector<8x128xf32> -> vector<8x128xf32>
      %290 = arith.addf %284, %289 : vector<8x128xf32>
      %c0_110 = arith.constant 0 : index
      %c0_111 = arith.constant 0 : index
      %291 = vector.load %arg9[%c0_110, %c0_111] : memref<1x128xf32, #tpu.memory_space<vmem>>, vector<1x128xf32>
      %292 = vector.broadcast %291 : vector<1x128xf32> to vector<8x128xf32>
      %293 = arith.addf %290, %292 : vector<8x128xf32>
      %c0_112 = arith.constant 0 : index
      %c0_113 = arith.constant 0 : index
      %294 = vector.load %arg10[%c0_112, %c0_113] : memref<8x128xf32, #tpu.memory_space<vmem>>, vector<8x128xf32>
      tpu.vector_store %arg10[%c0_112, %c0_113], %293 {strides = array<i32>} : memref<8x128xf32, #tpu.memory_space<vmem>>, vector<8x128xf32>,
    } else {
    }
    return
  }
  func.func @transform_0(%arg0: i32) -> (i32, i32) {
    %c0_i32 = arith.constant 0 : i32
    %c0_i32_0 = arith.constant 0 : i32
    return %arg0, %c0_i32 : i32, i32
  }
  func.func @transform_1(%arg0: i32) -> (i32, i32) {
    %c0_i32 = arith.constant 0 : i32
    %c0_i32_0 = arith.constant 0 : i32
    return %arg0, %c0_i32 : i32, i32
  }
  func.func @transform_2(%arg0: i32) -> (i32, i32) {
    %c1_i32 = arith.constant 1 : i32
    %0 = arith.subi %c1_i32, %arg0 : i32
    %c0_i32 = arith.constant 0 : i32
    %c0_i32_0 = arith.constant 0 : i32
    return %0, %c0_i32 : i32, i32
  }
  func.func @transform_3(%arg0: i32) -> (i32, i32) {
    %c1_i32 = arith.constant 1 : i32
    %0 = arith.subi %c1_i32, %arg0 : i32
    %c0_i32 = arith.constant 0 : i32
    %c0_i32_0 = arith.constant 0 : i32
    return %0, %c0_i32 : i32, i32
  }
  func.func @transform_4(%arg0: i32) -> (i32, i32, i32) {
    %c0_i32 = arith.constant 0 : i32
    %c0_i32_0 = arith.constant 0 : i32
    %c0_i32_1 = arith.constant 0 : i32
    %c0_i32_2 = arith.constant 0 : i32
    return %c0_i32, %c0_i32_0, %c0_i32_1 : i32, i32, i32
  }
  func.func @transform_5(%arg0: i32) -> (i32, i32, i32) {
    %c0_i32 = arith.constant 0 : i32
    %c0_i32_0 = arith.constant 0 : i32
    %c0_i32_1 = arith.constant 0 : i32
    %c0_i32_2 = arith.constant 0 : i32
    return %c0_i32, %c0_i32_0, %c0_i32_1 : i32, i32, i32
  }
  func.func @transform_6(%arg0: i32) -> (i32, i32, i32) {
    %c0_i32 = arith.constant 0 : i32
    %c0_i32_0 = arith.constant 0 : i32
    %c0_i32_1 = arith.constant 0 : i32
    %c0_i32_2 = arith.constant 0 : i32
    return %c0_i32, %c0_i32_0, %c0_i32_1 : i32, i32, i32
  }
  func.func @transform_7(%arg0: i32) -> (i32, i32, i32) {
    %c0_i32 = arith.constant 0 : i32
    %c0_i32_0 = arith.constant 0 : i32
    %c0_i32_1 = arith.constant 0 : i32
    %c0_i32_2 = arith.constant 0 : i32
    return %c0_i32, %c0_i32_0, %c0_i32_1 : i32, i32, i32
  }
  func.func @transform_8(%arg0: i32) -> (i32, i32) {
    %c0_i32 = arith.constant 0 : i32
    %c0_i32_0 = arith.constant 0 : i32
    %c0_i32_1 = arith.constant 0 : i32
    return %c0_i32, %c0_i32_0 : i32, i32
  }
  func.func @transform_9(%arg0: i32) -> (i32, i32) {
    %c0_i32 = arith.constant 0 : i32
    %c0_i32_0 = arith.constant 0 : i32
    %c0_i32_1 = arith.constant 0 : i32
    return %c0_i32, %c0_i32_0 : i32, i32
  }
}

</mosaic_0001>

<bundles_post_ra>
// kernel: bilstm_forward.2
= control target key start
LH: loop header
LB: loop body
LE: loop exit
PB: predicated region body
PF: predicated region fallthrough
CT: control target
= control target key end

     0   :  { %12 = vsyncpa [#allocation9], 0  ;;  %s3865_s0 = inlined_call_operand.vmem [shape: bf16[64,128], index: 0, kind: input, shape index: {}, may-alias: {0,1}]   ;;  %s3866_s1 = inlined_call_operand.vmem [shape: bf16[64,128], index: 1, kind: input, shape index: {}, may-alias: {0,1}]   ;;  %s3867_s2 = inlined_call_operand.hbm [shape: bf16[2,128,512], index: 2, kind: input, shape index: {}]   ;;  %s3868_s3 = inlined_call_operand.hbm [shape: bf16[2,128,512], index: 3, kind: input, shape index: {}]   ;;  %s3869_s4 = inlined_call_operand.hbm [shape: f32[2,1,512], index: 4, kind: input, shape index: {}]   ;;  %s3870_s5 = inlined_call_operand.vmem [shape: bf16[64,128], index: 5, kind: output, shape index: {0}]   ;;  %s3871_s6 = inlined_call_operand.vmem [shape: bf16[64,128], index: 6, kind: output, shape index: {1}]  }
   0x1   :  { %13 = vsyncpa [#allocation11], 0  ;;  %s3261_s21 = smov 0  }
   0x2 LB: > { %s3267_s22 = sadd.s32 4294967295, %s3215_s21   ;;  %p2523_p0 = scmp.ge.s32.totalorder %s3215_s21, 1  ;;  %s3215_s21 = sphi %s3261_s21, %s19_s21  }
   0x3   : > { %p195_p1 = scmp.lt.s32.totalorder %s3215_s21, 3  ;;  %p2524_p2 = scmp.ne.s32.totalorder %s3267_s22, 0 }
   0x4   : > { %p2721_p3 = scmp.eq.s32.totalorder %s3267_s22, 0  ;;  %s3217_s24 = smov [#allocation10]  }
   0x5   : > { %p3273_p4 = pnand %p2523_p0, %p195_p1  ;;  %s220_s25 = sshll.u32 %s3217_s24, 4  ;;  %s221_s25 = int_to_ptr.vmem [resolvable:$true] %s220_s25 }
   0x6   : > { %s3218_s26 = smov [#allocation8]   ;;  %s3219_s29 = smov [#allocation12]  }
   0x7   : > { %p2711_p5 = pneg %p3273_p4  ;;  %s207_s27 = sshll.u32 %s3218_s26, 4  ;;  %s3279_s27 = int_to_ptr.vmem [resolvable:$true] %s207_s27 }
   0x8   : > { %s233_s30 = sshll.u32 %s3219_s29, 4  ;;  %s3134_s7 = scalar_lea.vmem %s221_s25, 8192  ;;  %s3287_s30 = int_to_ptr.vmem [resolvable:$true] %s233_s30 }
   0x9   : > { %p3283_p6 = pnand %p2721_p3, %p2711_p5  ;;  %p3135_p8 = scmp.ne.s32.totalorder %s221_s25, %s3134_s7 }
   0xa   : > { %p3142_p11 = scmp.lt.s32.totalorder %s221_s25, %s221_s25  ;;  %p3143_p12 = scmp.lt.s32.totalorder %s3134_s7, %s3134_s7 }
   0xb   : > { %p3125_p7 = pneg %p3283_p6 }
   0xc   : > { %p3144_p13 = por %p3143_p12, %p3142_p11 }
   0xd   : > { %p3137_p9 = pnand %p3135_p8, %p3125_p7 }
   0xf   : > { %p3138_p10 = pneg %p3137_p9 }
  0x11   : > { %p3145_p0 = pnand %p3144_p13, %p3138_p10 }
  0x13   : > { %3148 = shalt.err (!%p3145_p0)
}
  0x14   : > { %s3220_s8 = smov 256   ;;  %s3221_s9 = smov 16  }
  0x15   : > { %2717 = dma.hbm_to_vmem [thread:$0]  (!%p3283_p6), %s3868_s3, 8192, %s221_s25, [#allocation11], %s3220_s8, %s3220_s8, %s3221_s9  }
  0x16   : > { %s3160_s12 = scalar_lea.vmem %s3279_s27, 8192  ;;  %p3168_p9 = scmp.lt.s32.totalorder %s3279_s27, %s3279_s27 }
  0x17   : > { %p3161_p1 = scmp.ne.s32.totalorder %s3279_s27, %s3160_s12  ;;  %p3169_p10 = scmp.lt.s32.totalorder %s3160_s12, %s3160_s12 }
  0x19   : > { %p3163_p5 = pnand %p3161_p1, %p3125_p7  ;;  %p3170_p11 = por %p3169_p10, %p3168_p9 }
  0x1b   : > { %p3164_p8 = pneg %p3163_p5 }
  0x1d   : > { %p3171_p12 = pnand %p3170_p11, %p3164_p8 }
  0x1f   : > { %3174 = shalt.err (!%p3171_p12)
}
  0x20   : > { %2714 = dma.hbm_to_vmem [thread:$0]  (!%p3283_p6), %s3867_s2, 8192, %s3279_s27, [#allocation9], %s3220_s8, %s3220_s8, %s3221_s9  }
  0x21   : > { %s3186_s15 = scalar_lea.vmem %s3287_s30, 128  ;;  %p3194_p5 = scmp.lt.s32.totalorder %s3287_s30, %s3287_s30 }
  0x22   : > { %p3187_p13 = scmp.ne.s32.totalorder %s3287_s30, %s3186_s15  ;;  %p3195_p8 = scmp.lt.s32.totalorder %s3186_s15, %s3186_s15 }
  0x24   : > { %p3189_p0 = pnand %p3187_p13, %p3125_p7  ;;  %p3196_p9 = por %p3195_p8, %p3194_p5 }
  0x26   : > { %p3190_p1 = pneg %p3189_p0 }
  0x28   : > { %p3197_p10 = pnand %p3196_p9, %p3190_p1 }
  0x2a   : > { %3200 = shalt.err (!%p3197_p10)
}
  0x2b   : > { %s3222_s16 = smov 64   ;;  %s3223_s17 = smov 4  }
  0x2c   : > { %2720 = dma.hbm_to_vmem [thread:$0]  (!%p3283_p6), %s3869_s4, 128, %s3287_s30, [#allocation11], %s3222_s16, %s3222_s16, %s3223_s17  }
  0x2d   : > { %269 = sbr.rel (%p3273_p4) target bundleno = 1199 (0x4af), region = 40 }
  0x32   : > { %3206 = dma.done.wait (%p2721_p3), [#allocation9], 8192  }
  0x33   : > { %3208 = vsyncadd (%p2721_p3), [#allocation9], 4294959104 }
  0x34   : > { %3210 = dma.done.wait (%p2721_p3), [#allocation11], 8320  }
  0x35   : > { %3212 = vsyncadd (%p2721_p3), [#allocation11], 4294958976  ;;  %s2532_s20 = sshll.u32 %s3267_s22, 2  ;;  %s325_s24 = ssub.s32 1, %s3267_s22 }
  0x36   : > { %p320_p6 = scmp.lt.s32.totalorder %s2532_s20, 7  ;;  %s2534_s25 = sshll.u32 %s325_s24, 2 }
  0x37   : > { %p327_p7 = scmp.lt.s32.totalorder %s2534_s25, 7 }
  0x38   : > { %s4034_s20 = smov (!%p320_p6, %s2532_s20), 7  ;;  %351 = sbr.rel (%p2524_p2) target bundleno = 64 (0x40), region = 56 }
  0x39   : > { %s4036_s25 = smov (!%p327_p7, %s2534_s25), 7  ;;  %s2533_s23 = sshll.u32 %s4034_s20, 2 }
  0x3a   : > { %s3340_s28 = scalar_lea.vmem %s3865_s0, %s2533_s23  ;;  %s2535_s29 = sshll.u32 %s4036_s25, 2 }
  0x3b   : > { %s3345_s8 = scalar_lea.vmem %s3866_s1, %s2535_s29  ;;  %s3350_s11 = scalar_lea.vmem %s3870_s5, %s2533_s23 }
  0x3c   : > { %s3355_s14 = scalar_lea.vmem %s3871_s6, %s2535_s29 }
  0x3d   : > { %v3224_v0 = vmov 0.0  }
  0x3e   : > { %352 = vst [vmem:[#allocation2] sm:$0xff] %v3224_v0  ;;  %353 = vst [vmem:[#allocation3] sm:$0xff] %v3224_v0 }
  0x3f   : > { %354 = vst [vmem:[#allocation4] sm:$0xff] %v3224_v0  ;;  %355 = vst [vmem:[#allocation5] sm:$0xff] %v3224_v0 }
  0x40 PF: > { %v2744_v1 = vld [vmem:[#allocation8 + $0xe4] ss:$16 sps:$4 sm:$0xff]   ;;  %v2746_v2 = vld [vmem:[#allocation8 + $0xec] ss:$16 sps:$4 sm:$0xff]   ;;  %v3872_v3 = vmov 0  }
  0x41   : > { %655 = vmatprep.mubr.bf16.mxu0 %v3872_v3  ;;  %708 = vmatprep.mubr.bf16.mxu1 %v3872_v3  ;;  %v2748_v4 = vld [vmem:[#allocation8 + $0xe0] ss:$16 sps:$4 sm:$0xff]   ;;  %v2749_v5 = vld [vmem:[#allocation8 + $0xe8] ss:$16 sps:$4 sm:$0xff]   ;;  %v2750_v6 = vld [vmem:[#allocation8 + $0xc4] ss:$16 sps:$4 sm:$0xff]  }
  0x42   : > { %623 = vmatprep.subr.bf16.mxu0 %v2744_v1  ;;  %676 = vmatprep.subr.bf16.mxu1 %v2746_v2  ;;  %v2752_v7 = vld [vmem:[#allocation8 + $0xcc] ss:$16 sps:$4 sm:$0xff]   ;;  %v2754_v8 = vld [vmem:[#allocation8 + $0xc0] ss:$16 sps:$4 sm:$0xff]   ;;  %v2755_v9 = vld [vmem:[#allocation8 + $0xc8] ss:$16 sps:$4 sm:$0xff]  }
  0x43   : > { %624 = vmatpush1.bf16.msra.mxu0 %v2748_v4  ;;  %677 = vmatpush1.bf16.msra.mxu1 %v2749_v5  ;;  %v2756_v10 = vld [vmem:[#allocation8 + $0xa4] ss:$16 sps:$4 sm:$0xff]   ;;  %v2758_v11 = vld [vmem:[#allocation8 + $0xac] ss:$16 sps:$4 sm:$0xff]   ;;  %v2760_v12 = vld [vmem:[#allocation8 + $0xa0] ss:$16 sps:$4 sm:$0xff]  }
  0x44   : > { %625 = vmatprep.subr.bf16.mxu0 %v2750_v6  ;;  %678 = vmatprep.subr.bf16.mxu1 %v2752_v7  ;;  %v2761_v13 = vld [vmem:[#allocation8 + $0xa8] ss:$16 sps:$4 sm:$0xff]   ;;  %v2762_v14 = vld [vmem:[#allocation8 + $0x84] ss:$16 sps:$4 sm:$0xff]   ;;  %v2764_v15 = vld [vmem:[#allocation8 + $0x8c] ss:$16 sps:$4 sm:$0xff]  }
  0x45   : > { %v2766_v16 = vld [vmem:[#allocation8 + $0x80] ss:$16 sps:$4 sm:$0xff]   ;;  %v2767_v17 = vld [vmem:[#allocation8 + $0x88] ss:$16 sps:$4 sm:$0xff]   ;;  %v2768_v18 = vld [vmem:[#allocation8 + $0x64] ss:$16 sps:$4 sm:$0xff]  }
  0x46   : > { %v2770_v19 = vld [vmem:[#allocation8 + $0x6c] ss:$16 sps:$4 sm:$0xff]   ;;  %v2772_v20 = vld [vmem:[#allocation8 + $0x60] ss:$16 sps:$4 sm:$0xff]   ;;  %v2773_v21 = vld [vmem:[#allocation8 + $0x68] ss:$16 sps:$4 sm:$0xff]  }
  0x47   : > { %626 = vmatpush1.bf16.msra.mxu0 %v2754_v8  ;;  %679 = vmatpush1.bf16.msra.mxu1 %v2755_v9  ;;  %v2774_v22 = vld [vmem:[#allocation8 + $0x44] ss:$16 sps:$4 sm:$0xff]   ;;  %v2776_v23 = vld [vmem:[#allocation8 + $0x4c] ss:$16 sps:$4 sm:$0xff]   ;;  %v2778_v24 = vld [vmem:[#allocation8 + $0x40] ss:$16 sps:$4 sm:$0xff]  }
  0x48   : > { %627 = vmatprep.subr.bf16.mxu0 %v2756_v10  ;;  %680 = vmatprep.subr.bf16.mxu1 %v2758_v11  ;;  %v2779_v25 = vld [vmem:[#allocation8 + $0x48] ss:$16 sps:$4 sm:$0xff]   ;;  %v2780_v26 = vld [vmem:[#allocation8 + $0x24] ss:$16 sps:$4 sm:$0xff]   ;;  %v2782_v27 = vld [vmem:[#allocation8 + $0x2c] ss:$16 sps:$4 sm:$0xff]  }
  0x49   : > { %v2784_v28 = vld [vmem:[#allocation8 + $0x20] ss:$16 sps:$4 sm:$0xff]   ;;  %v2785_v29 = vld [vmem:[#allocation8 + $0x28] ss:$16 sps:$4 sm:$0xff]   ;;  %v2786_v30 = vld [vmem:[#allocation8 + $0x4] ss:$16 sps:$4 sm:$0xff]  }
  0x4a   : > { %v2788_v31 = vld [vmem:[#allocation8 + $0xc] ss:$16 sps:$4 sm:$0xff]   ;;  %v2790_v32 = vld [vmem:[#allocation8] ss:$16 sps:$4 sm:$0xff]   ;;  %v2791_v33 = vld [vmem:[#allocation8 + $0x8] ss:$16 sps:$4 sm:$0xff]  }
  0x4b   : > { %628 = vmatpush1.bf16.msra.mxu0 %v2760_v12  ;;  %681 = vmatpush1.bf16.msra.mxu1 %v2761_v13  ;;  %v2795_v34 = vld [vmem:[#allocation8 + $0x1e4] ss:$16 sps:$4 sm:$0xff]   ;;  %v2798_v35 = vld [vmem:[#allocation8 + $0x1ec] ss:$16 sps:$4 sm:$0xff]   ;;  %v2793_v37 = vld [vmem:[#allocation8 + $0x1e0] ss:$16 sps:$4 sm:$0xff]  }
  0x4c   : > { %629 = vmatprep.subr.bf16.mxu0 %v2762_v14  ;;  %682 = vmatprep.subr.bf16.mxu1 %v2764_v15  ;;  %v2792_v36 = vld [vmem:[%s3340_s28] sm:$0xff]   ;;  %v2796_v38 = vld [vmem:[#allocation8 + $0x1e8] ss:$16 sps:$4 sm:$0xff]   ;;  %v2804_v40 = vld [vmem:[#allocation8 + $0x1cc] ss:$16 sps:$4 sm:$0xff]  }
  0x4d   : > { %v2801_v39 = vld [vmem:[#allocation8 + $0x1c4] ss:$16 sps:$4 sm:$0xff]   ;;  %v2799_v41 = vld [vmem:[#allocation8 + $0x1c0] ss:$16 sps:$4 sm:$0xff]   ;;  %v2802_v42 = vld [vmem:[#allocation8 + $0x1c8] ss:$16 sps:$4 sm:$0xff]  }
  0x4e   : > { %v2807_v43 = vld [vmem:[#allocation8 + $0x1a4] ss:$16 sps:$4 sm:$0xff]   ;;  %v2810_v44 = vld [vmem:[#allocation8 + $0x1ac] ss:$16 sps:$4 sm:$0xff]   ;;  %v2805_v46 = vld [vmem:[#allocation8 + $0x1a0] ss:$16 sps:$4 sm:$0xff]  }
  0x4f   : > { %630 = vmatpush1.bf16.msra.mxu0 %v2766_v16  ;;  %683 = vmatpush1.bf16.msra.mxu1 %v2767_v17  ;;  %v2823_v45 = vld [vmem:[%s3340_s28 + $0x8] sm:$0xff]   ;;  %v2813_v48 = vld [vmem:[#allocation8 + $0x184] ss:$16 sps:$4 sm:$0xff]   ;;  %v2811_v50 = vld [vmem:[#allocation8 + $0x180] ss:$16 sps:$4 sm:$0xff]  }
  0x50   : > { %631 = vmatprep.subr.bf16.mxu0 %v2768_v18  ;;  %684 = vmatprep.subr.bf16.mxu1 %v2770_v19  ;;  %v2808_v47 = vld [vmem:[#allocation8 + $0x1a8] ss:$16 sps:$4 sm:$0xff]   ;;  %v2816_v49 = vld [vmem:[#allocation8 + $0x18c] ss:$16 sps:$4 sm:$0xff]   ;;  %v2819_v52 = vld [vmem:[#allocation8 + $0x164] ss:$16 sps:$4 sm:$0xff]  }
  0x51   : > { %v2814_v51 = vld [vmem:[#allocation8 + $0x188] ss:$16 sps:$4 sm:$0xff]   ;;  %v2822_v53 = vld [vmem:[#allocation8 + $0x16c] ss:$16 sps:$4 sm:$0xff]   ;;  %v2817_v54 = vld [vmem:[#allocation8 + $0x160] ss:$16 sps:$4 sm:$0xff]  }
  0x52   : > { %v2820_v55 = vld [vmem:[#allocation8 + $0x168] ss:$16 sps:$4 sm:$0xff]   ;;  %v2826_v56 = vld [vmem:[#allocation8 + $0x144] ss:$16 sps:$4 sm:$0xff]   ;;  %v2829_v57 = vld [vmem:[#allocation8 + $0x14c] ss:$16 sps:$4 sm:$0xff]  }
  0x53   : > { %632 = vmatpush1.bf16.msra.mxu0 %v2772_v20  ;;  %685 = vmatpush1.bf16.msra.mxu1 %v2773_v21  ;;  %v2824_v58 = vld [vmem:[#allocation8 + $0x140] ss:$16 sps:$4 sm:$0xff]   ;;  %v2827_v59 = vld [vmem:[#allocation8 + $0x148] ss:$16 sps:$4 sm:$0xff]   ;;  %v2832_v60 = vld [vmem:[#allocation8 + $0x124] ss:$16 sps:$4 sm:$0xff]  }
  0x54   : > { %633 = vmatprep.subr.bf16.mxu0 %v2774_v22  ;;  %686 = vmatprep.subr.bf16.mxu1 %v2776_v23  ;;  %v2835_v61 = vld [vmem:[#allocation8 + $0x12c] ss:$16 sps:$4 sm:$0xff]   ;;  %v2830_v62 = vld [vmem:[#allocation8 + $0x120] ss:$16 sps:$4 sm:$0xff]   ;;  %v2833_v63 = vld [vmem:[#allocation8 + $0x128] ss:$16 sps:$4 sm:$0xff]  }
  0x55   : > { %v2838_v0 = vld [vmem:[#allocation8 + $0x104] ss:$16 sps:$4 sm:$0xff]   ;;  %v2841_v1 = vld [vmem:[#allocation8 + $0x10c] ss:$16 sps:$4 sm:$0xff]   ;;  %v2836_v2 = vld [vmem:[#allocation8 + $0x100] ss:$16 sps:$4 sm:$0xff]  }
  0x56   : > { %v2839_v4 = vld [vmem:[#allocation8 + $0x108] ss:$16 sps:$4 sm:$0xff]   ;;  %v3367_v5 = vld [vmem:[#allocation10 + $0xe4] ss:$16 sps:$4 sm:$0xff]   ;;  %v3369_v6 = vld [vmem:[#allocation10 + $0xec] ss:$16 sps:$4 sm:$0xff]  }
  0x57   : > { %634 = vmatpush1.bf16.msra.mxu0 %v2778_v24  ;;  %687 = vmatpush1.bf16.msra.mxu1 %v2779_v25  ;;  %v2842_v7 = vld [vmem:[%s3345_s8] sm:$0xff]   ;;  %v3374_v9 = vld [vmem:[#allocation10 + $0xe8] ss:$16 sps:$4 sm:$0xff]   ;;  %v3380_v11 = vld [vmem:[#allocation10 + $0xcc] ss:$16 sps:$4 sm:$0xff]  }
  0x58   : > { %635 = vmatprep.subr.bf16.mxu0 %v2780_v26  ;;  %688 = vmatprep.subr.bf16.mxu1 %v2782_v27  ;;  %v3372_v8 = vld [vmem:[#allocation10 + $0xe0] ss:$16 sps:$4 sm:$0xff]   ;;  %v3376_v10 = vld [vmem:[#allocation10 + $0xc4] ss:$16 sps:$4 sm:$0xff]   ;;  %3920 = vst [vmem:[#allocation15_spill] sm:$0xff] %v3380_v11  ;;  %v2873_v17 = vld [vmem:[%s3345_s8 + $0x8] sm:$0xff]  }
  0x59   : > { %v3382_v12 = vld [vmem:[#allocation10 + $0xc0] ss:$16 sps:$4 sm:$0xff]   ;;  %v3384_v13 = vld [vmem:[#allocation10 + $0xc8] ss:$16 sps:$4 sm:$0xff]   ;;  %v3388_v14 = vld [vmem:[#allocation10 + $0xa4] ss:$16 sps:$4 sm:$0xff]  }
  0x5a   : > { %3921 = vst [vmem:[#allocation16_spill] sm:$0xff] %v3382_v12  ;;  %3922 = vst [vmem:[#allocation17_spill] sm:$0xff] %v3384_v13  ;;  %v3392_v15 = vld [vmem:[#allocation10 + $0xac] ss:$16 sps:$4 sm:$0xff]   ;;  %v3394_v16 = vld [vmem:[#allocation10 + $0xa0] ss:$16 sps:$4 sm:$0xff]  }
  0x5b   : > { %636 = vmatpush1.bf16.msra.mxu0 %v2784_v28  ;;  %689 = vmatpush1.bf16.msra.mxu1 %v2785_v29  ;;  %3923 = vst [vmem:[#allocation18_spill] sm:$0xff] %v3388_v14  ;;  %3924 = vst [vmem:[#allocation19_spill] sm:$0xff] %v3392_v15  ;;  %v3401_v18 = vld [vmem:[#allocation10 + $0xa8] ss:$16 sps:$4 sm:$0xff]   ;;  %v3405_v19 = vld [vmem:[#allocation10 + $0x84] ss:$16 sps:$4 sm:$0xff]  }
  0x5c   : > { %637 = vmatprep.subr.bf16.mxu0 %v2786_v30  ;;  %690 = vmatprep.subr.bf16.mxu1 %v2788_v31  ;;  %3925 = vst [vmem:[#allocation20_spill] sm:$0xff] %v3394_v16  ;;  %3926 = vst [vmem:[#allocation21_spill] sm:$0xff] %v3401_v18  ;;  %v3407_v20 = vld [vmem:[#allocation10 + $0x8c] ss:$16 sps:$4 sm:$0xff]   ;;  %v3409_v21 = vld [vmem:[#allocation10 + $0x80] ss:$16 sps:$4 sm:$0xff]  }
  0x5d   : > { %3927 = vst [vmem:[#allocation22_spill] sm:$0xff] %v3405_v19  ;;  %3928 = vst [vmem:[#allocation23_spill] sm:$0xff] %v3407_v20  ;;  %v3411_v22 = vld [vmem:[#allocation10 + $0x88] ss:$16 sps:$4 sm:$0xff]   ;;  %v3415_v23 = vld [vmem:[#allocation10 + $0x64] ss:$16 sps:$4 sm:$0xff]  }
  0x5e   : > { %3929 = vst [vmem:[#allocation24_spill] sm:$0xff] %v3409_v21  ;;  %3930 = vst [vmem:[#allocation25_spill] sm:$0xff] %v3411_v22  ;;  %v3419_v24 = vld [vmem:[#allocation10 + $0x6c] ss:$16 sps:$4 sm:$0xff]   ;;  %v3423_v25 = vld [vmem:[#allocation10 + $0x60] ss:$16 sps:$4 sm:$0xff]  }
  0x5f   : > { %638 = vmatpush1.bf16.msra.mxu0 %v2790_v32  ;;  %691 = vmatpush1.bf16.msra.mxu1 %v2791_v33  ;;  %3931 = vst [vmem:[#allocation26_spill] sm:$0xff] %v3415_v23  ;;  %3932 = vst [vmem:[#allocation27_spill] sm:$0xff] %v3419_v24  ;;  %v3427_v26 = vld [vmem:[#allocation10 + $0x68] ss:$16 sps:$4 sm:$0xff]   ;;  %v3431_v27 = vld [vmem:[#allocation10 + $0x44] ss:$16 sps:$4 sm:$0xff]  }
  0x60   : > { %940 = vmatprep.subr.bf16.mxu0 %v2795_v34  ;;  %993 = vmatprep.subr.bf16.mxu1 %v2798_v35  ;;  %3933 = vst [vmem:[#allocation28_spill] sm:$0xff] %v3423_v25  ;;  %3934 = vst [vmem:[#allocation29_spill] sm:$0xff] %v3427_v26  ;;  %v3433_v28 = vld [vmem:[#allocation10 + $0x4c] ss:$16 sps:$4 sm:$0xff]   ;;  %v3435_v29 = vld [vmem:[#allocation10 + $0x40] ss:$16 sps:$4 sm:$0xff]  }
  0x61   : > { %3935 = vst [vmem:[#allocation30_spill] sm:$0xff] %v3431_v27  ;;  %3936 = vst [vmem:[#allocation31_spill] sm:$0xff] %v3433_v28  ;;  %v3437_v30 = vld [vmem:[#allocation10 + $0x48] ss:$16 sps:$4 sm:$0xff]   ;;  %v3441_v31 = vld [vmem:[#allocation10 + $0x24] ss:$16 sps:$4 sm:$0xff]  }
  0x62   : > { %656 = vmatmul.mubr.bf16.vlgmr.msra.gmra.mxu0 %v2792_v36  ;;  %709 = vmatmul.mubr.bf16.vlgmr.msra.gmra.mxu1 %v2792_v36  ;;  %3937 = vst [vmem:[#allocation32_spill] sm:$0xff] %v3435_v29  ;;  %3938 = vst [vmem:[#allocation33_spill] sm:$0xff] %v3437_v30  ;;  %v3445_v32 = vld [vmem:[#allocation10 + $0x2c] ss:$16 sps:$4 sm:$0xff]   ;;  %v3447_v33 = vld [vmem:[#allocation10 + $0x20] ss:$16 sps:$4 sm:$0xff]  }
  0x63   : > { %941 = vmatpush1.bf16.msra.mxu0 %v2793_v37  ;;  %994 = vmatpush1.bf16.msra.mxu1 %v2796_v38  ;;  %3939 = vst [vmem:[#allocation34_spill] sm:$0xff] %v3441_v31  ;;  %3940 = vst [vmem:[#allocation35_spill] sm:$0xff] %v3445_v32  ;;  %v3451_v34 = vld [vmem:[#allocation10 + $0x28] ss:$16 sps:$4 sm:$0xff]   ;;  %v3455_v35 = vld [vmem:[#allocation10 + $0x4] ss:$16 sps:$4 sm:$0xff]  }
  0x64   : > { %942 = vmatprep.subr.bf16.mxu0 %v2801_v39  ;;  %995 = vmatprep.subr.bf16.mxu1 %v2804_v40  ;;  %3941 = vst [vmem:[#allocation36_spill] sm:$0xff] %v3447_v33  ;;  %3942 = vst [vmem:[#allocation37_spill] sm:$0xff] %v3451_v34  ;;  %v3457_v36 = vld [vmem:[#allocation10 + $0xc] ss:$16 sps:$4 sm:$0xff]   ;;  %v3461_v37 = vld [vmem:[#allocation10] ss:$16 sps:$4 sm:$0xff]  }
  0x65   : > { %665 = vmatprep.mubr.bf16.mxu0 %v3872_v3  ;;  %718 = vmatprep.mubr.bf16.mxu1 %v3872_v3  ;;  %3943 = vst [vmem:[#allocation38_spill] sm:$0xff] %v3455_v35  ;;  %3944 = vst [vmem:[#allocation39_spill] sm:$0xff] %v3457_v36  ;;  %v3463_v38 = vld [vmem:[#allocation10 + $0x8] ss:$16 sps:$4 sm:$0xff]   ;;  %v1127_v39 = vld [vmem:[#allocation2] sm:$0xff] }
  0x66   : > { %3945 = vst [vmem:[#allocation40_spill] sm:$0xff] %v3461_v37  ;;  %3946 = vst [vmem:[#allocation41_spill] sm:$0xff] %v3463_v38  ;;  %v3467_v40 = vld [vmem:[#allocation10 + $0x1e4] ss:$16 sps:$4 sm:$0xff]  }
  0x67   : > { %943 = vmatpush1.bf16.msra.mxu0 %v2799_v41  ;;  %996 = vmatpush1.bf16.msra.mxu1 %v2802_v42  ;;  %3947 = vst [vmem:[#allocation42_spill] sm:$0xff] %v3467_v40  ;;  %v3469_v41 = vld [vmem:[#allocation10 + $0x1ec] ss:$16 sps:$4 sm:$0xff]   ;;  %v1135_v42 = vpack.c.bf16 %v1127_v39, %v1127_v39 }
  0x68   : > { %944 = vmatprep.subr.bf16.mxu0 %v2807_v43  ;;  %997 = vmatprep.subr.bf16.mxu1 %v2810_v44  ;;  %3948 = vst [vmem:[#allocation43_spill] sm:$0xff] %v3469_v41  ;;  %v3473_v43 = vld [vmem:[#allocation10 + $0x1e0] ss:$16 sps:$4 sm:$0xff]   ;;  %v3475_v44 = vld [vmem:[#allocation10 + $0x1e8] ss:$16 sps:$4 sm:$0xff]  }
  0x69   : > { %v3555_v39 = vld [vmem:[#allocation10 + $0x10c] ss:$16 sps:$4 sm:$0xff]  }
  0x6a   : > { %666 = vmatmul.mubr.bf16.gmra.mxu0 %v2823_v45  ;;  %719 = vmatmul.mubr.bf16.gmra.mxu1 %v2823_v45  ;;  %v3479_v45 = vld [vmem:[#allocation10 + $0x1c4] ss:$16 sps:$4 sm:$0xff]   ;;  %3951 = vst [vmem:[#allocation46_spill] sm:$0xff] %v3555_v39 }
  0x6b   : > { %945 = vmatpush1.bf16.msra.mxu0 %v2805_v46  ;;  %998 = vmatpush1.bf16.msra.mxu1 %v2808_v47  ;;  %v3481_v46 = vld [vmem:[#allocation10 + $0x1cc] ss:$16 sps:$4 sm:$0xff]   ;;  %v3485_v47 = vld [vmem:[#allocation10 + $0x1c0] ss:$16 sps:$4 sm:$0xff]  }
  0x6c   : > { %946 = vmatprep.subr.bf16.mxu0 %v2813_v48  ;;  %999 = vmatprep.subr.bf16.mxu1 %v2816_v49  ;;  %v3487_v48 = vld [vmem:[#allocation10 + $0x1c8] ss:$16 sps:$4 sm:$0xff]   ;;  %v3491_v49 = vld [vmem:[#allocation10 + $0x1a4] ss:$16 sps:$4 sm:$0xff]  }
  0x6d   : > { %972 = vmatprep.mubr.bf16.mxu0 %v3872_v3  ;;  %1025 = vmatprep.mubr.bf16.mxu1 %v3872_v3 }
  0x6f   : > { %947 = vmatpush1.bf16.msra.mxu0 %v2811_v50  ;;  %1000 = vmatpush1.bf16.msra.mxu1 %v2814_v51  ;;  %v3493_v50 = vld [vmem:[#allocation10 + $0x1ac] ss:$16 sps:$4 sm:$0xff]   ;;  %v3499_v51 = vld [vmem:[#allocation10 + $0x1a0] ss:$16 sps:$4 sm:$0xff]  }
  0x70   : > { %948 = vmatprep.subr.bf16.mxu0 %v2819_v52  ;;  %1001 = vmatprep.subr.bf16.mxu1 %v2822_v53  ;;  %v3501_v52 = vld [vmem:[#allocation10 + $0x1a8] ss:$16 sps:$4 sm:$0xff]   ;;  %v3505_v53 = vld [vmem:[#allocation10 + $0x184] ss:$16 sps:$4 sm:$0xff]  }
  0x73   : > { %949 = vmatpush1.bf16.msra.mxu0 %v2817_v54  ;;  %1002 = vmatpush1.bf16.msra.mxu1 %v2820_v55  ;;  %v3507_v54 = vld [vmem:[#allocation10 + $0x18c] ss:$16 sps:$4 sm:$0xff]   ;;  %v3511_v55 = vld [vmem:[#allocation10 + $0x180] ss:$16 sps:$4 sm:$0xff]  }
  0x74   : > { %950 = vmatprep.subr.bf16.mxu0 %v2826_v56  ;;  %1003 = vmatprep.subr.bf16.mxu1 %v2829_v57  ;;  %v3513_v56 = vld [vmem:[#allocation10 + $0x188] ss:$16 sps:$4 sm:$0xff]   ;;  %v3517_v57 = vld [vmem:[#allocation10 + $0x164] ss:$16 sps:$4 sm:$0xff]  }
  0x77   : > { %951 = vmatpush1.bf16.msra.mxu0 %v2824_v58  ;;  %1004 = vmatpush1.bf16.msra.mxu1 %v2827_v59  ;;  %v3519_v58 = vld [vmem:[#allocation10 + $0x16c] ss:$16 sps:$4 sm:$0xff]   ;;  %v3523_v59 = vld [vmem:[#allocation10 + $0x160] ss:$16 sps:$4 sm:$0xff]  }
  0x78   : > { %952 = vmatprep.subr.bf16.mxu0 %v2832_v60  ;;  %1005 = vmatprep.subr.bf16.mxu1 %v2835_v61  ;;  %v3525_v60 = vld [vmem:[#allocation10 + $0x168] ss:$16 sps:$4 sm:$0xff]   ;;  %v3529_v61 = vld [vmem:[#allocation10 + $0x144] ss:$16 sps:$4 sm:$0xff]  }
  0x7b   : > { %953 = vmatpush1.bf16.msra.mxu0 %v2830_v62  ;;  %1006 = vmatpush1.bf16.msra.mxu1 %v2833_v63  ;;  %v3531_v62 = vld [vmem:[#allocation10 + $0x14c] ss:$16 sps:$4 sm:$0xff]   ;;  %v3535_v63 = vld [vmem:[#allocation10 + $0x140] ss:$16 sps:$4 sm:$0xff]  }
  0x7c   : > { %954 = vmatprep.subr.bf16.mxu0 %v2838_v0  ;;  %1007 = vmatprep.subr.bf16.mxu1 %v2841_v1  ;;  %v3537_v0 = vld [vmem:[#allocation10 + $0x148] ss:$16 sps:$4 sm:$0xff]   ;;  %v3541_v1 = vld [vmem:[#allocation10 + $0x124] ss:$16 sps:$4 sm:$0xff]  }
  0x7d   : > { %3949 = vst [vmem:[#allocation44_spill] sm:$0xff] %v3537_v0  ;;  %3950 = vst [vmem:[#allocation45_spill] sm:$0xff] %v3541_v1 }
  0x7f   : > { %955 = vmatpush1.bf16.msra.mxu0 %v2836_v2  ;;  %1008 = vmatpush1.bf16.msra.mxu1 %v2839_v4  ;;  %v3543_v2 = vld [vmem:[#allocation10 + $0x12c] ss:$16 sps:$4 sm:$0xff]   ;;  %v3547_v4 = vld [vmem:[#allocation10 + $0x120] ss:$16 sps:$4 sm:$0xff]  }
  0x80   : > { %1296 = vmatprep.subr.bf16.mxu0 %v3367_v5  ;;  %1337 = vmatprep.subr.bf16.mxu1 %v3369_v6 }
  0x82   : > { %973 = vmatmul.mubr.bf16.vlgmr.msra.gmra.mxu0 %v2842_v7  ;;  %1026 = vmatmul.mubr.bf16.vlgmr.msra.gmra.mxu1 %v2842_v7  ;;  %v3549_v7 = vld [vmem:[#allocation10 + $0x128] ss:$16 sps:$4 sm:$0xff]  }
  0x83   : > { %1297 = vmatpush1.bf16.msra.mxu0 %v3372_v8  ;;  %1338 = vmatpush1.bf16.msra.mxu1 %v3374_v9 }
  0x84   : > { %1298 = vmatprep.subr.bf16.mxu0 %v3376_v10  ;;  %1339 = vmatprep.subr.bf16.mxu1 %v3380_v11 }
  0x85   : > { %982 = vmatprep.mubr.bf16.mxu0 %v3872_v3  ;;  %1035 = vmatprep.mubr.bf16.mxu1 %v3872_v3 }
  0x87   : > { %1299 = vmatpush1.bf16.msra.mxu0 %v3382_v12  ;;  %1340 = vmatpush1.bf16.msra.mxu1 %v3384_v13 }
  0x88   : > { %1300 = vmatprep.subr.bf16.mxu0 %v3388_v14  ;;  %1341 = vmatprep.subr.bf16.mxu1 %v3392_v15 }
  0x8a   : > { %983 = vmatmul.mubr.bf16.gmra.mxu0 %v2873_v17  ;;  %1036 = vmatmul.mubr.bf16.gmra.mxu1 %v2873_v17  ;;  %v3553_v17 = vld [vmem:[#allocation10 + $0x104] ss:$16 sps:$4 sm:$0xff]  }
  0x8b   : > { %1301 = vmatpush1.bf16.msra.mxu0 %v3394_v16  ;;  %1342 = vmatpush1.bf16.msra.mxu1 %v3401_v18 }
  0x8c   : > { %1302 = vmatprep.subr.bf16.mxu0 %v3405_v19  ;;  %1343 = vmatprep.subr.bf16.mxu1 %v3407_v20 }
  0x8d   : > { %1328 = vmatprep.mubr.bf16.mxu0 %v3872_v3  ;;  %1369 = vmatprep.mubr.bf16.mxu1 %v3872_v3 }
  0x8f   : > { %1303 = vmatpush1.bf16.msra.mxu0 %v3409_v21  ;;  %1344 = vmatpush1.bf16.msra.mxu1 %v3411_v22 }
  0x90   : > { %1304 = vmatprep.subr.bf16.mxu0 %v3415_v23  ;;  %1345 = vmatprep.subr.bf16.mxu1 %v3419_v24 }
  0x93   : > { %1305 = vmatpush1.bf16.msra.mxu0 %v3423_v25  ;;  %1346 = vmatpush1.bf16.msra.mxu1 %v3427_v26 }
  0x94   : > { %1306 = vmatprep.subr.bf16.mxu0 %v3431_v27  ;;  %1347 = vmatprep.subr.bf16.mxu1 %v3433_v28 }
  0x97   : > { %1307 = vmatpush1.bf16.msra.mxu0 %v3435_v29  ;;  %1348 = vmatpush1.bf16.msra.mxu1 %v3437_v30 }
  0x98   : > { %1308 = vmatprep.subr.bf16.mxu0 %v3441_v31  ;;  %1349 = vmatprep.subr.bf16.mxu1 %v3445_v32 }
  0x9b   : > { %1309 = vmatpush1.bf16.msra.mxu0 %v3447_v33  ;;  %1350 = vmatpush1.bf16.msra.mxu1 %v3451_v34 }
  0x9c   : > { %1310 = vmatprep.subr.bf16.mxu0 %v3455_v35  ;;  %1351 = vmatprep.subr.bf16.mxu1 %v3457_v36 }
  0x9f   : > { %1311 = vmatpush1.bf16.msra.mxu0 %v3461_v37  ;;  %1352 = vmatpush1.bf16.msra.mxu1 %v3463_v38 }
  0xa0   : > { %1571 = vmatprep.subr.bf16.mxu0 %v3467_v40  ;;  %1612 = vmatprep.subr.bf16.mxu1 %v3469_v41 }
  0xa2   : > { %1329 = vmatmul.mubr.bf16.vlgmr.msra.gmra.mxu0 %v1135_v42  ;;  %1370 = vmatmul.mubr.bf16.vlgmr.msra.gmra.mxu1 %v1135_v42  ;;  %v3559_v42 = vld [vmem:[#allocation10 + $0x100] ss:$16 sps:$4 sm:$0xff]  }
  0xa3   : > { %1572 = vmatpush1.bf16.msra.mxu0 %v3473_v43  ;;  %1613 = vmatpush1.bf16.msra.mxu1 %v3475_v44 }
  0xa4   : > { %1573 = vmatprep.subr.bf16.mxu0 %v3479_v45  ;;  %1614 = vmatprep.subr.bf16.mxu1 %v3481_v46 }
  0xa5   : > { %1603 = vmatprep.mubr.bf16.mxu0 %v3872_v3  ;;  %1644 = vmatprep.mubr.bf16.mxu1 %v3872_v3  ;;  %v3561_v3 = vld [vmem:[#allocation10 + $0x108] ss:$16 sps:$4 sm:$0xff]  }
  0xa7   : > { %1574 = vmatpush1.bf16.msra.mxu0 %v3485_v47  ;;  %1615 = vmatpush1.bf16.msra.mxu1 %v3487_v48 }
  0xa8   : > { %1575 = vmatprep.subr.bf16.mxu0 %v3491_v49  ;;  %1616 = vmatprep.subr.bf16.mxu1 %v3493_v50 }
  0xab   : > { %1576 = vmatpush1.bf16.msra.mxu0 %v3499_v51  ;;  %1617 = vmatpush1.bf16.msra.mxu1 %v3501_v52 }
  0xac   : > { %1577 = vmatprep.subr.bf16.mxu0 %v3505_v53  ;;  %1618 = vmatprep.subr.bf16.mxu1 %v3507_v54 }
  0xaf   : > { %1578 = vmatpush1.bf16.msra.mxu0 %v3511_v55  ;;  %1619 = vmatpush1.bf16.msra.mxu1 %v3513_v56 }
  0xb0   : > { %1579 = vmatprep.subr.bf16.mxu0 %v3517_v57  ;;  %1620 = vmatprep.subr.bf16.mxu1 %v3519_v58 }
  0xb3   : > { %1580 = vmatpush1.bf16.msra.mxu0 %v3523_v59  ;;  %1621 = vmatpush1.bf16.msra.mxu1 %v3525_v60 }
  0xb4   : > { %1581 = vmatprep.subr.bf16.mxu0 %v3529_v61  ;;  %1622 = vmatprep.subr.bf16.mxu1 %v3531_v62 }
  0xb7   : > { %1582 = vmatpush1.bf16.msra.mxu0 %v3535_v63  ;;  %1623 = vmatpush1.bf16.msra.mxu1 %v3537_v0  ;;  %v1129_v0 = vld [vmem:[#allocation4] sm:$0xff] }
  0xb8   : > { %1583 = vmatprep.subr.bf16.mxu0 %v3541_v1  ;;  %1624 = vmatprep.subr.bf16.mxu1 %v3543_v2  ;;  %v1410_v1 = vpack.c.bf16 %v1129_v0, %v1129_v0  ;;  %v431_v0 = vlaneseq }
  0xbb   : > { %1584 = vmatpush1.bf16.msra.mxu0 %v3547_v4  ;;  %1625 = vmatpush1.bf16.msra.mxu1 %v3549_v7 }
  0xbc   : > { %1585 = vmatprep.subr.bf16.mxu0 %v3553_v17  ;;  %1626 = vmatprep.subr.bf16.mxu1 %v3555_v39  ;;  %v3952_v39 = vmov 0  }
  0xbf   : > { %1586 = vmatpush1.bf16.msra.mxu0 %v3559_v42  ;;  %1627 = vmatpush1.bf16.msra.mxu1 %v3561_v3 }
  0xc0   : > { %1689 = vmatprep.subr.bf16.mxu0 %v3367_v5  ;;  %1730 = vmatprep.subr.bf16.mxu1 %v3369_v6 }
  0xc2   : > { %1604 = vmatmul.mubr.bf16.vlgmr.msra.gmra.mxu0 %v1410_v1  ;;  %1645 = vmatmul.mubr.bf16.vlgmr.msra.gmra.mxu1 %v1410_v1  ;;  %v432_v1 = vshrl.u32 %v431_v0, 7 }
  0xc3   : > { %1690 = vmatpush1.bf16.msra.mxu0 %v3372_v8  ;;  %1731 = vmatpush1.bf16.msra.mxu1 %v3374_v9 }
  0xc4   : > { %1691 = vmatprep.subr.bf16.mxu0 %v3376_v10  ;;  %1732 = vmatprep.subr.bf16.mxu1 %v3380_v11 }
  0xc5   : > { %1721 = vmatprep.mubr.bf16.mxu0 %v3952_v39  ;;  %1762 = vmatprep.mubr.bf16.mxu1 %v3952_v39 }
  0xc7   : > { %1692 = vmatpush1.bf16.msra.mxu0 %v3382_v12  ;;  %1733 = vmatpush1.bf16.msra.mxu1 %v3384_v13 }
  0xc8   : > { %1693 = vmatprep.subr.bf16.mxu0 %v3388_v14  ;;  %1734 = vmatprep.subr.bf16.mxu1 %v3392_v15 }
  0xcb   : > { %1694 = vmatpush1.bf16.msra.mxu0 %v3394_v16  ;;  %1735 = vmatpush1.bf16.msra.mxu1 %v3401_v18 }
  0xcc   : > { %1695 = vmatprep.subr.bf16.mxu0 %v3405_v19  ;;  %1736 = vmatprep.subr.bf16.mxu1 %v3407_v20 }
  0xcf   : > { %1696 = vmatpush1.bf16.msra.mxu0 %v3409_v21  ;;  %1737 = vmatpush1.bf16.msra.mxu1 %v3411_v22 }
  0xd0   : > { %1697 = vmatprep.subr.bf16.mxu0 %v3415_v23  ;;  %1738 = vmatprep.subr.bf16.mxu1 %v3419_v24 }
  0xd3   : > { %1698 = vmatpush1.bf16.msra.mxu0 %v3423_v25  ;;  %1739 = vmatpush1.bf16.msra.mxu1 %v3427_v26 }
  0xd4   : > { %1699 = vmatprep.subr.bf16.mxu0 %v3431_v27  ;;  %1740 = vmatprep.subr.bf16.mxu1 %v3433_v28 }
  0xd7   : > { %1700 = vmatpush1.bf16.msra.mxu0 %v3435_v29  ;;  %1741 = vmatpush1.bf16.msra.mxu1 %v3437_v30  ;;  %v445_v30 = vsub.s32 3, %v432_v1 }
  0xd8   : > { %1701 = vmatprep.subr.bf16.mxu0 %v3441_v31  ;;  %1742 = vmatprep.subr.bf16.mxu1 %v3445_v32  ;;  %v441_v31 = vsub.s32 2, %v432_v1  ;;  %v433_v32 = vsub.s32 0, %v432_v1 }
  0xdb   : > { %1702 = vmatpush1.bf16.msra.mxu0 %v3447_v33  ;;  %1743 = vmatpush1.bf16.msra.mxu1 %v3451_v34  ;;  %v429_v33 = vld [vmem:[#allocation12] sm:$0xf] }
  0xdc   : > { %1703 = vmatprep.subr.bf16.mxu0 %v3455_v35  ;;  %1744 = vmatprep.subr.bf16.mxu1 %v3457_v36  ;;  %v437_v35 = vsub.s32 1, %v432_v1  ;;  %v3607_v36 = vrot.slane %v429_v33, %v441_v31  ;;  %v3613_v28 = vrot.slane %v429_v33, %v445_v30 }
  0xde   : > { %v438_v27 = vrot.slane %v429_v33, %v437_v35 }
  0xdf   : > { %1704 = vmatpush1.bf16.msra.mxu0 %v3461_v37  ;;  %1745 = vmatpush1.bf16.msra.mxu1 %v3463_v38 }
  0xe0   : > { %1803 = vmatprep.subr.bf16.mxu0 %v3467_v40  ;;  %1844 = vmatprep.subr.bf16.mxu1 %v3469_v41  ;;  %v434_v40 = vrot.slane %v429_v33, %v433_v32 }
 0x122   : > { %v3603_v29 = vpop.f32.mrf.mxu0  ;;  %v3605_v34 = vpop.f32.mrf.mxu1 }
 0x124   : > { %v3609_v37 = vpop.f32.mrf.mxu0  ;;  %v3611_v38 = vpop.f32.mrf.mxu1 }
 0x125   : > { %v713_v11 = vadd.f32 %v3611_v38, %v3613_v28  ;;  %v1128_v38 = vld [vmem:[#allocation3] sm:$0xff] }
 0x126   : > { %v661_v41 = vpop.f32.mrf.mxu0  ;;  %v714_v0 = vpop.f32.mrf.mxu1 }
 0x127   : > { %v3615_v26 = vadd.f32 %v661_v41, %v434_v40  ;;  %v3618_v25 = vadd.f32 %v714_v0, %v3607_v36 }
 0x128   : > { %v663_v24 = vpop.f32.mrf.mxu0  ;;  %v716_v23 = vpop.f32.mrf.mxu1 }
 0x129   : > { %3953 = vst [vmem:[#allocation47_spill] sm:$0xff] %v3615_v26  ;;  %3954 = vst [vmem:[#allocation48_spill] sm:$0xff] %v3618_v25  ;;  %v3620_v1 = vadd.f32 %v663_v24, %v438_v27  ;;  %v3623_v22 = vadd.f32 %v716_v23, %v3613_v28 }
 0x12a   : > { %v667_v21 = vpop.f32.mrf.mxu0  ;;  %v720_v20 = vpop.f32.mrf.mxu1 }
 0x12b   : > { %3955 = vst [vmem:[#allocation49_spill] sm:$0xff] %v3620_v1  ;;  %3956 = vst [vmem:[#allocation50_spill] sm:$0xff] %v3623_v22  ;;  %v3625_v19 = vadd.f32 %v667_v21, %v434_v40  ;;  %v3628_v18 = vadd.f32 %v720_v20, %v3607_v36 }
 0x12c   : > { %v669_v33 = vpop.f32.mrf.mxu0  ;;  %v722_v41 = vpop.f32.mrf.mxu1 }
 0x12d   : > { %3957 = vst [vmem:[#allocation51_spill] sm:$0xff] %v3625_v19  ;;  %3958 = vst [vmem:[#allocation52_spill] sm:$0xff] %v3628_v18  ;;  %v3630_v26 = vadd.f32 %v669_v33, %v438_v27  ;;  %v3633_v0 = vadd.f32 %v722_v41, %v3613_v28  ;;  %v746_v18 = vld [vmem:[#allocation12 + $0x4] sm:$0xf] }
 0x12e   : > { %v671_v25 = vpop.f32.mrf.mxu0  ;;  %v724_v24 = vpop.f32.mrf.mxu1  ;;  %v751_v33 = vrot.slane %v746_v18, %v433_v32  ;;  %v3647_v41 = vrot.slane %v746_v18, %v437_v35 }
 0x12f   : > { %3959 = vst [vmem:[#allocation53_spill] sm:$0xff] %v3630_v26  ;;  %3960 = vst [vmem:[#allocation54_spill] sm:$0xff] %v3633_v0  ;;  %v3635_v1 = vadd.f32 %v671_v25, %v434_v40  ;;  %v3638_v23 = vadd.f32 %v724_v24, %v3607_v36  ;;  %v3645_v26 = vrot.slane %v746_v18, %v441_v31 }
 0x130   : > { %v673_v22 = vpop.f32.mrf.mxu0  ;;  %v726_v21 = vpop.f32.mrf.mxu1  ;;  %v3649_v0 = vrot.slane %v746_v18, %v445_v30 }
 0x131   : > { %3961 = vst [vmem:[#allocation55_spill] sm:$0xff] %v3635_v1  ;;  %3962 = vst [vmem:[#allocation56_spill] sm:$0xff] %v3638_v23  ;;  %v3640_v19 = vadd.f32 %v673_v22, %v438_v27  ;;  %v3643_v20 = vadd.f32 %v726_v21, %v3613_v28 }
 0x133   : > { %3963 = vst [vmem:[#allocation57_spill] sm:$0xff] %v3640_v19  ;;  %3964 = vst [vmem:[#allocation58_spill] sm:$0xff] %v3643_v20 }
 0x142   : > { %v974_v25 = vpop.f32.mrf.mxu0  ;;  %v1027_v1 = vpop.f32.mrf.mxu1 }
 0x143   : > { %v3651_v16 = vadd.f32 %v974_v25, %v751_v33  ;;  %v3654_v24 = vadd.f32 %v1027_v1, %v3645_v26 }
 0x144   : > { %v976_v22 = vpop.f32.mrf.mxu0  ;;  %v1029_v23 = vpop.f32.mrf.mxu1 }
 0x145   : > { %3965 = vst [vmem:[#allocation59_spill] sm:$0xff] %v3651_v16  ;;  %3966 = vst [vmem:[#allocation60_spill] sm:$0xff] %v3654_v24  ;;  %v3657_v21 = vadd.f32 %v976_v22, %v3647_v41  ;;  %v3660_v32 = vadd.f32 %v1029_v23, %v3649_v0 }
 0x146   : > { %v978_v31 = vpop.f32.mrf.mxu0  ;;  %v1031_v35 = vpop.f32.mrf.mxu1 }
 0x147   : > { %3967 = vst [vmem:[#allocation61_spill] sm:$0xff] %v3657_v21  ;;  %3968 = vst [vmem:[#allocation62_spill] sm:$0xff] %v3660_v32  ;;  %v3662_v20 = vadd.f32 %v978_v31, %v751_v33  ;;  %v3665_v18 = vadd.f32 %v1031_v35, %v3645_v26 }
 0x148   : > { %v980_v30 = vpop.f32.mrf.mxu0  ;;  %v1033_v25 = vpop.f32.mrf.mxu1 }
 0x149   : > { %3969 = vst [vmem:[#allocation63_spill] sm:$0xff] %v3662_v20  ;;  %3970 = vst [vmem:[#allocation64_spill] sm:$0xff] %v3665_v18  ;;  %v3668_v1 = vadd.f32 %v980_v30, %v3647_v41  ;;  %v3671_v24 = vadd.f32 %v1033_v25, %v3649_v0 }
 0x14a   : > { %v984_v22 = vpop.f32.mrf.mxu0  ;;  %v1037_v21 = vpop.f32.mrf.mxu1 }
 0x14b   : > { %3971 = vst [vmem:[#allocation65_spill] sm:$0xff] %v3668_v1  ;;  %3972 = vst [vmem:[#allocation66_spill] sm:$0xff] %v3671_v24  ;;  %v3673_v16 = vadd.f32 %v984_v22, %v751_v33  ;;  %v3676_v23 = vadd.f32 %v1037_v21, %v3645_v26  ;;  %v658_v24 = vadd.f32 %v3603_v29, %v434_v40 }
 0x14c   : > { %v986_v31 = vpop.f32.mrf.mxu0  ;;  %v1039_v32 = vpop.f32.mrf.mxu1  ;;  %v711_v40 = vadd.f32 %v3605_v34, %v3607_v36 }
 0x14d   : > { %3973 = vst [vmem:[#allocation67_spill] sm:$0xff] %v3673_v16  ;;  %3974 = vst [vmem:[#allocation68_spill] sm:$0xff] %v3676_v23  ;;  %v3679_v35 = vadd.f32 %v986_v31, %v3647_v41  ;;  %v3682_v19 = vadd.f32 %v1039_v32, %v3649_v0  ;;  %v660_v16 = vadd.f32 %v3609_v37, %v438_v27 }
 0x14e   : > { %v1041_v30 = vpop.f32.mrf.mxu1  ;;  %v988_v18 = vpop.f32.mrf.mxu0 }
 0x14f   : > { %3975 = vst [vmem:[#allocation69_spill] sm:$0xff] %v3679_v35  ;;  %3976 = vst [vmem:[#allocation70_spill] sm:$0xff] %v3682_v19 }
 0x150   : > { %v1043_v1 = vpop.f32.mrf.mxu1  ;;  %v990_v25 = vpop.f32.mrf.mxu0 }
 0x151   : > { %v991_v28 = vadd.f32 %v990_v25, %v3647_v41  ;;  %v1044_v41 = vadd.f32 %v1043_v1, %v3649_v0  ;;  %v1130_v1 = vld [vmem:[#allocation5] sm:$0xff] }
 0x162   : > { %v1330_v20 = vpop.f32.mrf.mxu0  ;;  %v1371_v22 = vpop.f32.mrf.mxu1 }
 0x163   : > { %v1378_v21 = vadd.f32 %v1330_v20, %v658_v24  ;;  %v1380_v20 = vadd.f32 %v1371_v22, %v711_v40 }
 0x164   : > { %v1332_v23 = vpop.f32.mrf.mxu0  ;;  %v1373_v15 = vpop.f32.mrf.mxu1 }
 0x165   : > { %v2641_v14 = vmul.f32 -1.442695, %v1378_v21  ;;  %v1379_v13 = vadd.f32 %v1332_v23, %v660_v16  ;;  %v1381_v29 = vadd.f32 %v1373_v15, %v713_v11 }
 0x166   : > { %v1334_v31 = vpop.f32.mrf.mxu0  ;;  %v1375_v35 = vpop.f32.mrf.mxu1 }
 0x167   : > { %2940 = vpow2.f32 %v2641_v14  ;;  %v2642_v32 = vmul.f32 -1.442695, %v1379_v13  ;;  %v2643_v27 = vmul.f32 -1.442695, %v1381_v29  ;;  %v989_v13 = vadd.f32 %v988_v18, %v751_v33 }
 0x168   : > { %v1335_v19 = vpop.f32.mrf.mxu0  ;;  %v1376_v12 = vpop.f32.mrf.mxu1 }
 0x169   : > { %2942 = vpow2.f32 %v2642_v32 }
 0x16a   : > { %2944 = vpow2.f32 %v2643_v27 }
 0x174   : > { %v2941_v37 = vpop.eup %2940 }
 0x175   : > { %v1385_v24 = vadd.f32 1.0, %v2941_v37 }
 0x176   : > { %v2943_v21 = vpop.eup %2942 }
 0x177   : > { %2946 = vrcp.f32 %v1385_v24  ;;  %v1391_v16 = vadd.f32 1.0, %v2943_v21  ;;  %v2945_v19 = vpop.eup %2944  ;;  %v1042_v21 = vadd.f32 %v1041_v30, %v3645_v26 }
 0x178   : > { %2948 = vtanh.f32 %v1380_v20  ;;  %v1398_v32 = vadd.f32 1.0, %v2945_v19 }
 0x179   : > { %2950 = vrcp.f32 %v1391_v16 }
 0x182   : > { %v1605_v12 = vpop.f32.mrf.mxu0  ;;  %v1646_v14 = vpop.f32.mrf.mxu1 }
 0x183   : > { %v1653_v11 = vadd.f32 %v1605_v12, %v989_v13  ;;  %v1655_v12 = vadd.f32 %v1646_v14, %v1042_v21  ;;  %v3985_v21 = vld [vmem:[#allocation20_spill] sm:$0xff] }
 0x184   : > { %v2947_v15 = vpop.eup %2946  ;;  %v1607_v34 = vpop.f32.mrf.mxu0 }
 0x185   : > { %v1648_v36 = vpop.f32.mrf.mxu1  ;;  %v2949_v23 = vpop.eup %2948  ;;  %v2676_v35 = vmul.f32 -1.442695, %v1653_v11  ;;  %v1654_v22 = vadd.f32 %v1607_v34, %v991_v28 }
 0x186   : > { %v2951_v31 = vpop.eup %2950  ;;  %v1609_v29 = vpop.f32.mrf.mxu0  ;;  %v1402_v27 = vmul.f32 %v2949_v23, %v2947_v15  ;;  %v1656_v25 = vadd.f32 %v1648_v36, %v1044_v41  ;;  %v3981_v41 = vld [vmem:[#allocation16_spill] sm:$0xff] }
 0x187   : > { %v1650_v40 = vpop.f32.mrf.mxu1  ;;  %v1401_v37 = vmul.f32 %v2951_v31, %v1128_v38  ;;  %2952 = vpow2.f32 %v2676_v35  ;;  %v2677_v33 = vmul.f32 -1.442695, %v1654_v22  ;;  %v3978_v29 = vld [vmem:[#allocation45_spill] sm:$0xff] }
 0x188   : > { %v1610_v18 = vpop.f32.mrf.mxu0  ;;  %v2678_v16 = vmul.f32 -1.442695, %v1656_v25  ;;  %v3984_v25 = vld [vmem:[#allocation19_spill] sm:$0xff] }
 0x189   : > { %v1651_v20 = vpop.f32.mrf.mxu1  ;;  %v3691_v24 = vadd.f32 %v1402_v27, %v1401_v37  ;;  %2954 = vpow2.f32 %v2677_v33  ;;  %v3979_v27 = vld [vmem:[#allocation46_spill] sm:$0xff] }
 0x18a   : > { %2956 = vrcp.f32 %v1398_v32  ;;  %v3977_v32 = vld [vmem:[#allocation44_spill] sm:$0xff]  ;;  %v3980_v20 = vld [vmem:[#allocation15_spill] sm:$0xff] }
 0x18b   : > { %2958 = vtanh.f32 %v3691_v24 }
 0x18c   : > { %2960 = vpow2.f32 %v2678_v16  ;;  %v3989_v16 = vld [vmem:[#allocation24_spill] sm:$0xff] }
 0x194   : > { %v2953_v13 = vpop.eup %2952 }
 0x195   : > { %v1660_v19 = vadd.f32 1.0, %v2953_v13  ;;  %v3990_v13 = vld [vmem:[#allocation25_spill] sm:$0xff] }
 0x196   : > { %v2955_v28 = vpop.eup %2954 }
 0x197   : > { %v2957_v11 = vpop.eup %2956  ;;  %2962 = vrcp.f32 %v1660_v19  ;;  %v1666_v15 = vadd.f32 1.0, %v2955_v28  ;;  %v3992_v19 = vld [vmem:[#allocation27_spill] sm:$0xff]  ;;  %v3993_v28 = vld [vmem:[#allocation28_spill] sm:$0xff] }
 0x198   : > { %v2959_v38 = vpop.eup %2958  ;;  %2964 = vtanh.f32 %v1655_v12  ;;  %v3991_v12 = vld [vmem:[#allocation26_spill] sm:$0xff] }
 0x199   : > { %2966 = vrcp.f32 %v1666_v15  ;;  %v1405_v34 = vmul.f32 %v2959_v38, %v2957_v11  ;;  %v2961_v26 = vpop.eup %2960  ;;  %v3994_v11 = vld [vmem:[#allocation29_spill] sm:$0xff]  ;;  %v3995_v15 = vld [vmem:[#allocation30_spill] sm:$0xff]  ;;  %v3996_v38 = vld [vmem:[#allocation31_spill] sm:$0xff] }
 0x19a   : > { %v1673_v36 = vadd.f32 1.0, %v2961_v26  ;;  %v3999_v26 = vld [vmem:[#allocation34_spill] sm:$0xff] }
 0x19b   : > { %v1681_v23 = vpack.c.bf16 %v1405_v34, %v1405_v34  ;;  %v3997_v34 = vld [vmem:[#allocation32_spill] sm:$0xff] }
 0x19c   : > { %2968 = vrcp.f32 %v1673_v36  ;;  %v4004_v36 = vld [vmem:[#allocation39_spill] sm:$0xff] }
 0x19d   : > { %1682 = vst [vmem:[%s3350_s11] sm:$0xf] %v1681_v23  ;;  %1722 = vmatmul.mubr.bf16.vlgmr.msra.gmra.mxu0 %v1681_v23  ;;  %1763 = vmatmul.mubr.bf16.vlgmr.msra.gmra.mxu1 %v1681_v23  ;;  %v3998_v23 = vld [vmem:[#allocation33_spill] sm:$0xff] }
 0x19e   : > { %1804 = vmatpush1.bf16.msra.mxu0 %v3473_v43  ;;  %1845 = vmatpush1.bf16.msra.mxu1 %v3475_v44 }
 0x19f   : > { %1805 = vmatprep.subr.bf16.mxu0 %v3479_v45  ;;  %1846 = vmatprep.subr.bf16.mxu1 %v3481_v46 }
 0x1a0   : > { %1835 = vmatprep.mubr.bf16.mxu0 %v3952_v39  ;;  %1876 = vmatprep.mubr.bf16.mxu1 %v3952_v39 }
 0x1a2   : > { %1806 = vmatpush1.bf16.msra.mxu0 %v3485_v47  ;;  %1847 = vmatpush1.bf16.msra.mxu1 %v3487_v48 }
 0x1a3   : > { %1807 = vmatprep.subr.bf16.mxu0 %v3491_v49  ;;  %1848 = vmatprep.subr.bf16.mxu1 %v3493_v50 }
 0x1a4   : > { %v2963_v0 = vpop.eup %2962 }
 0x1a5   : > { %v2965_v30 = vpop.eup %2964 }
 0x1a6   : > { %v2967_v14 = vpop.eup %2966  ;;  %1808 = vmatpush1.bf16.msra.mxu0 %v3499_v51  ;;  %1849 = vmatpush1.bf16.msra.mxu1 %v3501_v52  ;;  %v1677_v35 = vmul.f32 %v2965_v30, %v2963_v0  ;;  %v4000_v0 = vld [vmem:[#allocation35_spill] sm:$0xff]  ;;  %v4002_v30 = vld [vmem:[#allocation37_spill] sm:$0xff] }
 0x1a7   : > { %v1676_v22 = vmul.f32 %v2967_v14, %v1130_v1  ;;  %1809 = vmatprep.subr.bf16.mxu0 %v3505_v53  ;;  %1850 = vmatprep.subr.bf16.mxu1 %v3507_v54  ;;  %v4001_v1 = vld [vmem:[#allocation36_spill] sm:$0xff]  ;;  %v4003_v14 = vld [vmem:[#allocation38_spill] sm:$0xff] }
 0x1a9   : > { %v3711_v31 = vadd.f32 %v1677_v35, %v1676_v22  ;;  %v2969_v40 = vpop.eup %2968  ;;  %v4005_v35 = vld [vmem:[#allocation40_spill] sm:$0xff]  ;;  %v4006_v22 = vld [vmem:[#allocation41_spill] sm:$0xff] }
 0x1aa   : > { %1810 = vmatpush1.bf16.msra.mxu0 %v3511_v55  ;;  %1851 = vmatpush1.bf16.msra.mxu1 %v3513_v56 }
 0x1ab   : > { %1811 = vmatprep.subr.bf16.mxu0 %v3517_v57  ;;  %1852 = vmatprep.subr.bf16.mxu1 %v3519_v58  ;;  %2970 = vtanh.f32 %v3711_v31 }
 0x1ae   : > { %1812 = vmatpush1.bf16.msra.mxu0 %v3523_v59  ;;  %1853 = vmatpush1.bf16.msra.mxu1 %v3525_v60 }
 0x1af   : > { %1813 = vmatprep.subr.bf16.mxu0 %v3529_v61  ;;  %1854 = vmatprep.subr.bf16.mxu1 %v3531_v62 }
 0x1b2   : > { %1814 = vmatpush1.bf16.msra.mxu0 %v3535_v63  ;;  %1855 = vmatpush1.bf16.msra.mxu1 %v3977_v32 }
 0x1b3   : > { %1815 = vmatprep.subr.bf16.mxu0 %v3978_v29  ;;  %1856 = vmatprep.subr.bf16.mxu1 %v3543_v2 }
 0x1b6   : > { %1816 = vmatpush1.bf16.msra.mxu0 %v3547_v4  ;;  %1857 = vmatpush1.bf16.msra.mxu1 %v3549_v7 }
 0x1b7   : > { %1817 = vmatprep.subr.bf16.mxu0 %v3553_v17  ;;  %1858 = vmatprep.subr.bf16.mxu1 %v3979_v27 }
 0x1b8   : > { %v2971_v37 = vpop.eup %2970 }
 0x1b9   : > { %v1680_v33 = vmul.f32 %v2971_v37, %v2969_v40  ;;  %v4007_v40 = vld [vmem:[#allocation42_spill] sm:$0xff]  ;;  %v4008_v37 = vld [vmem:[#allocation43_spill] sm:$0xff] }
 0x1ba   : > { %1818 = vmatpush1.bf16.msra.mxu0 %v3559_v42  ;;  %1859 = vmatpush1.bf16.msra.mxu1 %v3561_v3 }
 0x1bb   : > { %v1683_v18 = vpack.c.bf16 %v1680_v33, %v1680_v33  ;;  %1921 = vmatprep.subr.bf16.mxu0 %v3367_v5  ;;  %1962 = vmatprep.subr.bf16.mxu1 %v3369_v6  ;;  %v3982_v5 = vld [vmem:[#allocation17_spill] sm:$0xff]  ;;  %v3983_v6 = vld [vmem:[#allocation18_spill] sm:$0xff] }
 0x1bd   : > { %1684 = vst [vmem:[%s3355_s14 + $0xc] sm:$0xf] %v1683_v18  ;;  %1836 = vmatmul.mubr.bf16.vlgmr.msra.gmra.mxu0 %v1683_v18  ;;  %1877 = vmatmul.mubr.bf16.vlgmr.msra.gmra.mxu1 %v1683_v18 }
 0x1be   : > { %1922 = vmatpush1.bf16.msra.mxu0 %v3372_v8  ;;  %1963 = vmatpush1.bf16.msra.mxu1 %v3374_v9  ;;  %v3986_v8 = vld [vmem:[#allocation21_spill] sm:$0xff]  ;;  %v3987_v9 = vld [vmem:[#allocation22_spill] sm:$0xff] }
 0x1bf   : > { %1923 = vmatprep.subr.bf16.mxu0 %v3376_v10  ;;  %1964 = vmatprep.subr.bf16.mxu1 %v3980_v20  ;;  %v3988_v10 = vld [vmem:[#allocation23_spill] sm:$0xff] }
 0x1c0   : > { %1953 = vmatprep.mubr.bf16.mxu0 %v3952_v39  ;;  %1994 = vmatprep.mubr.bf16.mxu1 %v3952_v39  ;;  %v4009_v20 = vld [vmem:[#allocation47_spill] sm:$0xff] }
 0x1c2   : > { %1924 = vmatpush1.bf16.msra.mxu0 %v3981_v41  ;;  %1965 = vmatpush1.bf16.msra.mxu1 %v3982_v5 }
 0x1c3   : > { %1925 = vmatprep.subr.bf16.mxu0 %v3983_v6  ;;  %1966 = vmatprep.subr.bf16.mxu1 %v3984_v25 }
 0x1c6   : > { %1926 = vmatpush1.bf16.msra.mxu0 %v3985_v21  ;;  %1967 = vmatpush1.bf16.msra.mxu1 %v3986_v8  ;;  %v4010_v21 = vld [vmem:[#allocation49_spill] sm:$0xff] }
 0x1c7   : > { %1927 = vmatprep.subr.bf16.mxu0 %v3987_v9  ;;  %1968 = vmatprep.subr.bf16.mxu1 %v3988_v10 }
 0x1ca   : > { %1928 = vmatpush1.bf16.msra.mxu0 %v3989_v16  ;;  %1969 = vmatpush1.bf16.msra.mxu1 %v3990_v13 }
 0x1cb   : > { %1929 = vmatprep.subr.bf16.mxu0 %v3991_v12  ;;  %1970 = vmatprep.subr.bf16.mxu1 %v3992_v19  ;;  %v4011_v19 = vld [vmem:[#allocation50_spill] sm:$0xff] }
 0x1ce   : > { %1930 = vmatpush1.bf16.msra.mxu0 %v3993_v28  ;;  %1971 = vmatpush1.bf16.msra.mxu1 %v3994_v11  ;;  %v4012_v11 = vld [vmem:[#allocation48_spill] sm:$0xff] }
 0x1cf   : > { %1931 = vmatprep.subr.bf16.mxu0 %v3995_v15  ;;  %1972 = vmatprep.subr.bf16.mxu1 %v3996_v38 }
 0x1d2   : > { %1932 = vmatpush1.bf16.msra.mxu0 %v3997_v34  ;;  %1973 = vmatpush1.bf16.msra.mxu1 %v3998_v23 }
 0x1d3   : > { %1933 = vmatprep.subr.bf16.mxu0 %v3999_v26  ;;  %1974 = vmatprep.subr.bf16.mxu1 %v4000_v0 }
 0x1d6   : > { %1934 = vmatpush1.bf16.msra.mxu0 %v4001_v1  ;;  %1975 = vmatpush1.bf16.msra.mxu1 %v4002_v30 }
 0x1d7   : > { %1935 = vmatprep.subr.bf16.mxu0 %v4003_v14  ;;  %1976 = vmatprep.subr.bf16.mxu1 %v4004_v36 }
 0x1da   : > { %1936 = vmatpush1.bf16.msra.mxu0 %v4005_v35  ;;  %1977 = vmatpush1.bf16.msra.mxu1 %v4006_v22 }
 0x1db   : > { %2035 = vmatprep.subr.bf16.mxu0 %v4007_v40  ;;  %2076 = vmatprep.subr.bf16.mxu1 %v4008_v37 }
 0x25d   : > { %v1723_v33 = vpop.f32.mrf.mxu0  ;;  %v1764_v18 = vpop.f32.mrf.mxu1 }
 0x25e   : > { %v1771_v41 = vadd.f32 %v1723_v33, %v4009_v20  ;;  %v1773_v15 = vadd.f32 %v1764_v18, %v4012_v11 }
 0x25f   : > { %v1725_v5 = vpop.f32.mrf.mxu0  ;;  %v1766_v6 = vpop.f32.mrf.mxu1 }
 0x260   : > { %v2679_v25 = vmul.f32 -1.442695, %v1771_v41  ;;  %v1772_v8 = vadd.f32 %v1725_v5, %v4010_v21  ;;  %v1774_v28 = vadd.f32 %v1766_v6, %v4011_v19  ;;  %v4013_v21 = vld [vmem:[#allocation67_spill] sm:$0xff] }
 0x261   : > { %v1727_v9 = vpop.f32.mrf.mxu0  ;;  %v1768_v10 = vpop.f32.mrf.mxu1 }
 0x262   : > { %2972 = vpow2.f32 %v2679_v25  ;;  %v2680_v16 = vmul.f32 -1.442695, %v1772_v8  ;;  %v2681_v38 = vmul.f32 -1.442695, %v1774_v28 }
 0x263   : > { %v1728_v13 = vpop.f32.mrf.mxu0  ;;  %v1769_v12 = vpop.f32.mrf.mxu1 }
 0x264   : > { %2974 = vpow2.f32 %v2680_v16  ;;  %v4014_v13 = vld [vmem:[#allocation69_spill] sm:$0xff] }
 0x265   : > { %2976 = vtanh.f32 %v1773_v15 }
 0x266   : > { %2978 = vpow2.f32 %v2681_v38 }
 0x26f   : > { %v2973_v34 = vpop.eup %2972 }
 0x270   : > { %v1778_v23 = vadd.f32 1.0, %v2973_v34 }
 0x271   : > { %v2975_v26 = vpop.eup %2974 }
 0x272   : > { %2980 = vrcp.f32 %v1778_v23  ;;  %v1784_v33 = vadd.f32 1.0, %v2975_v26  ;;  %v2977_v20 = vpop.eup %2976 }
 0x273   : > { %v2979_v25 = vpop.eup %2978 }
 0x274   : > { %2982 = vrcp.f32 %v1784_v33  ;;  %v1791_v28 = vadd.f32 1.0, %v2979_v25 }
 0x27d   : > { %v1837_v41 = vpop.f32.mrf.mxu0  ;;  %v1878_v5 = vpop.f32.mrf.mxu1 }
 0x27e   : > { %v1885_v8 = vadd.f32 %v1837_v41, %v4013_v21  ;;  %v4016_v21 = vld [vmem:[#allocation68_spill] sm:$0xff] }
 0x27f   : > { %v2981_v9 = vpop.eup %2980  ;;  %v1839_v10 = vpop.f32.mrf.mxu0 }
 0x280   : > { %v1880_v6 = vpop.f32.mrf.mxu1  ;;  %v1795_v16 = vmul.f32 %v2981_v9, %v2977_v20  ;;  %v2682_v18 = vmul.f32 -1.442695, %v1885_v8  ;;  %v1886_v12 = vadd.f32 %v1839_v10, %v4014_v13  ;;  %v4015_v20 = vld [vmem:[#allocation70_spill] sm:$0xff]  ;;  %v1887_v8 = vadd.f32 %v1878_v5, %v4016_v21 }
 0x281   : > { %v2983_v19 = vpop.eup %2982  ;;  %v1841_v11 = vpop.f32.mrf.mxu0  ;;  %v1888_v41 = vadd.f32 %v1880_v6, %v4015_v20 }
 0x282   : > { %v1882_v15 = vpop.f32.mrf.mxu1  ;;  %v1794_v38 = vmul.f32 %v2983_v19, %v3691_v24  ;;  %2984 = vpow2.f32 %v2682_v18  ;;  %v2683_v34 = vmul.f32 -1.442695, %v1886_v12  ;;  %v3090_v11 = vld [vmem:[#allocation10 + $0x40] ss:$16 sps:$4 sm:$0xff]  }
 0x283   : > { %v1842_v23 = vpop.f32.mrf.mxu0  ;;  %v2684_v25 = vmul.f32 -1.442695, %v1888_v41  ;;  %v3091_v15 = vld [vmem:[#allocation10 + $0x48] ss:$16 sps:$4 sm:$0xff]  }
 0x284   : > { %v1883_v26 = vpop.f32.mrf.mxu1  ;;  %v3776_v33 = vadd.f32 %v1795_v16, %v1794_v38  ;;  %2986 = vpow2.f32 %v2683_v34  ;;  %v3092_v38 = vld [vmem:[#allocation10 + $0x24] ss:$16 sps:$4 sm:$0xff]  }
 0x285   : > { %2988 = vrcp.f32 %v1791_v28  ;;  %v4017_v26 = vld [vmem:[#allocation51_spill] sm:$0xff] }
 0x286   : > { %2990 = vtanh.f32 %v3776_v33 }
 0x287   : > { %2992 = vtanh.f32 %v1887_v8 }
 0x288   : > { %2994 = vpow2.f32 %v2684_v25 }
 0x28f   : > { %v2985_v9 = vpop.eup %2984 }
 0x290   : > { %v1892_v10 = vadd.f32 1.0, %v2985_v9  ;;  %v4020_v9 = vld [vmem:[#allocation52_spill] sm:$0xff] }
 0x291   : > { %v2987_v24 = vpop.eup %2986 }
 0x292   : > { %v2989_v18 = vpop.eup %2988  ;;  %2996 = vrcp.f32 %v1892_v10  ;;  %v1898_v13 = vadd.f32 1.0, %v2987_v24 }
 0x293   : > { %v2991_v16 = vpop.eup %2990 }
 0x294   : > { %2998 = vrcp.f32 %v1898_v13  ;;  %v1798_v12 = vmul.f32 %v2991_v16, %v2989_v18  ;;  %v2993_v5 = vpop.eup %2992 }
 0x295   : > { %v2995_v6 = vpop.eup %2994 }
 0x296   : > { %v1913_v19 = vpack.c.bf16 %v1798_v12, %v1798_v12 }
 0x298   : > { %1914 = vst [vmem:[%s3350_s11 + $0x4] sm:$0xf] %v1913_v19  ;;  %1954 = vmatmul.mubr.bf16.vlgmr.msra.gmra.mxu0 %v1913_v19  ;;  %1995 = vmatmul.mubr.bf16.vlgmr.msra.gmra.mxu1 %v1913_v19 }
 0x299   : > { %2036 = vmatpush1.bf16.msra.mxu0 %v3473_v43  ;;  %2077 = vmatpush1.bf16.msra.mxu1 %v3475_v44 }
 0x29a   : > { %2037 = vmatprep.subr.bf16.mxu0 %v3479_v45  ;;  %2078 = vmatprep.subr.bf16.mxu1 %v3481_v46  ;;  %v1905_v45 = vadd.f32 1.0, %v2995_v6 }
 0x29b   : > { %2067 = vmatprep.mubr.bf16.mxu0 %v3952_v39  ;;  %2108 = vmatprep.mubr.bf16.mxu1 %v3952_v39 }
 0x29c   : > { %3000 = vrcp.f32 %v1905_v45 }
 0x29d   : > { %2038 = vmatpush1.bf16.msra.mxu0 %v3485_v47  ;;  %2079 = vmatpush1.bf16.msra.mxu1 %v3487_v48 }
 0x29e   : > { %2039 = vmatprep.subr.bf16.mxu0 %v3491_v49  ;;  %2080 = vmatprep.subr.bf16.mxu1 %v3493_v50 }
 0x29f   : > { %v2997_v43 = vpop.eup %2996 }
 0x2a0   : > { %v1909_v44 = vmul.f32 %v2997_v43, %v2993_v5  ;;  %v4021_v43 = vld [vmem:[#allocation63_spill] sm:$0xff] }
 0x2a1   : > { %v2999_v28 = vpop.eup %2998  ;;  %2040 = vmatpush1.bf16.msra.mxu0 %v3499_v51  ;;  %2081 = vmatpush1.bf16.msra.mxu1 %v3501_v52  ;;  %v3068_v52 = vld [vmem:[#allocation10 + $0xe4] ss:$16 sps:$4 sm:$0xff]  }
 0x2a2   : > { %v1908_v46 = vmul.f32 %v2999_v28, %v3711_v31  ;;  %2041 = vmatprep.subr.bf16.mxu0 %v3505_v53  ;;  %2082 = vmatprep.subr.bf16.mxu1 %v3507_v54  ;;  %v3069_v53 = vld [vmem:[#allocation10 + $0xec] ss:$16 sps:$4 sm:$0xff]   ;;  %v3070_v54 = vld [vmem:[#allocation10 + $0xe0] ss:$16 sps:$4 sm:$0xff]  }
 0x2a3   : > { %v3086_v31 = vld [vmem:[#allocation10 + $0x60] ss:$16 sps:$4 sm:$0xff]  }
 0x2a4   : > { %v3797_v47 = vadd.f32 %v1909_v44, %v1908_v46 }
 0x2a5   : > { %2042 = vmatpush1.bf16.msra.mxu0 %v3511_v55  ;;  %2083 = vmatpush1.bf16.msra.mxu1 %v3513_v56  ;;  %v3071_v55 = vld [vmem:[#allocation10 + $0xe8] ss:$16 sps:$4 sm:$0xff]   ;;  %v3072_v56 = vld [vmem:[#allocation10 + $0xc4] ss:$16 sps:$4 sm:$0xff]  }
 0x2a6   : > { %2043 = vmatprep.subr.bf16.mxu0 %v3517_v57  ;;  %2084 = vmatprep.subr.bf16.mxu1 %v3519_v58  ;;  %3002 = vtanh.f32 %v3797_v47  ;;  %v3073_v57 = vld [vmem:[#allocation10 + $0xcc] ss:$16 sps:$4 sm:$0xff]   ;;  %v3075_v58 = vld [vmem:[#allocation10 + $0xc8] ss:$16 sps:$4 sm:$0xff]  }
 0x2a9   : > { %2044 = vmatpush1.bf16.msra.mxu0 %v3523_v59  ;;  %2085 = vmatpush1.bf16.msra.mxu1 %v3525_v60  ;;  %v3001_v48 = vpop.eup %3000  ;;  %v3076_v59 = vld [vmem:[#allocation10 + $0xa4] ss:$16 sps:$4 sm:$0xff]   ;;  %v3077_v60 = vld [vmem:[#allocation10 + $0xac] ss:$16 sps:$4 sm:$0xff]  }
 0x2aa   : > { %2045 = vmatprep.subr.bf16.mxu0 %v3529_v61  ;;  %2086 = vmatprep.subr.bf16.mxu1 %v3531_v62  ;;  %v3078_v61 = vld [vmem:[#allocation10 + $0xa0] ss:$16 sps:$4 sm:$0xff]   ;;  %v3079_v62 = vld [vmem:[#allocation10 + $0xa8] ss:$16 sps:$4 sm:$0xff]  }
 0x2ad   : > { %2046 = vmatpush1.bf16.msra.mxu0 %v3535_v63  ;;  %2087 = vmatpush1.bf16.msra.mxu1 %v3977_v32  ;;  %v3080_v63 = vld [vmem:[#allocation10 + $0x84] ss:$16 sps:$4 sm:$0xff]   ;;  %v3087_v32 = vld [vmem:[#allocation10 + $0x68] ss:$16 sps:$4 sm:$0xff]  }
 0x2ae   : > { %2047 = vmatprep.subr.bf16.mxu0 %v3978_v29  ;;  %2088 = vmatprep.subr.bf16.mxu1 %v3543_v2  ;;  %v3081_v2 = vld [vmem:[#allocation10 + $0x8c] ss:$16 sps:$4 sm:$0xff]   ;;  %v3088_v29 = vld [vmem:[#allocation10 + $0x44] ss:$16 sps:$4 sm:$0xff]  }
 0x2b1   : > { %2048 = vmatpush1.bf16.msra.mxu0 %v3547_v4  ;;  %2089 = vmatpush1.bf16.msra.mxu1 %v3549_v7  ;;  %v3082_v4 = vld [vmem:[#allocation10 + $0x80] ss:$16 sps:$4 sm:$0xff]   ;;  %v3083_v7 = vld [vmem:[#allocation10 + $0x88] ss:$16 sps:$4 sm:$0xff]  }
 0x2b2   : > { %2049 = vmatprep.subr.bf16.mxu0 %v3553_v17  ;;  %2090 = vmatprep.subr.bf16.mxu1 %v3979_v27  ;;  %v3084_v17 = vld [vmem:[#allocation10 + $0x64] ss:$16 sps:$4 sm:$0xff]   ;;  %v3089_v27 = vld [vmem:[#allocation10 + $0x4c] ss:$16 sps:$4 sm:$0xff]  }
 0x2b3   : > { %v3003_v49 = vpop.eup %3002 }
 0x2b4   : > { %v1912_v50 = vmul.f32 %v3003_v49, %v3001_v48 }
 0x2b5   : > { %2050 = vmatpush1.bf16.msra.mxu0 %v3559_v42  ;;  %2091 = vmatpush1.bf16.msra.mxu1 %v3561_v3  ;;  %v3074_v3 = vld [vmem:[#allocation10 + $0xc0] ss:$16 sps:$4 sm:$0xff]   ;;  %v3085_v42 = vld [vmem:[#allocation10 + $0x6c] ss:$16 sps:$4 sm:$0xff]  }
 0x2b6   : > { %v1915_v51 = vpack.c.bf16 %v1912_v50, %v1912_v50  ;;  %2153 = vmatprep.subr.bf16.mxu0 %v3068_v52  ;;  %2194 = vmatprep.subr.bf16.mxu1 %v3069_v53  ;;  %v4022_v50 = vld [vmem:[#allocation65_spill] sm:$0xff] }
 0x2b8   : > { %1916 = vst [vmem:[%s3355_s14 + $0x8] sm:$0xf] %v1915_v51  ;;  %2068 = vmatmul.mubr.bf16.vlgmr.msra.gmra.mxu0 %v1915_v51  ;;  %2109 = vmatmul.mubr.bf16.vlgmr.msra.gmra.mxu1 %v1915_v51 }
 0x2b9   : > { %2154 = vmatpush1.bf16.msra.mxu0 %v3070_v54  ;;  %2195 = vmatpush1.bf16.msra.mxu1 %v3071_v55 }
 0x2ba   : > { %2155 = vmatprep.subr.bf16.mxu0 %v3072_v56  ;;  %2196 = vmatprep.subr.bf16.mxu1 %v3073_v57 }
 0x2bb   : > { %2185 = vmatprep.mubr.bf16.mxu0 %v3952_v39  ;;  %2226 = vmatprep.mubr.bf16.mxu1 %v3952_v39 }
 0x2bd   : > { %2156 = vmatpush1.bf16.msra.mxu0 %v3074_v3  ;;  %2197 = vmatpush1.bf16.msra.mxu1 %v3075_v58 }
 0x2be   : > { %2157 = vmatprep.subr.bf16.mxu0 %v3076_v59  ;;  %2198 = vmatprep.subr.bf16.mxu1 %v3077_v60  ;;  %v4023_v60 = vld [vmem:[#allocation66_spill] sm:$0xff] }
 0x2c1   : > { %2158 = vmatpush1.bf16.msra.mxu0 %v3078_v61  ;;  %2199 = vmatpush1.bf16.msra.mxu1 %v3079_v62  ;;  %v4024_v62 = vld [vmem:[#allocation64_spill] sm:$0xff] }
 0x2c2   : > { %2159 = vmatprep.subr.bf16.mxu0 %v3080_v63  ;;  %2200 = vmatprep.subr.bf16.mxu1 %v3081_v2 }
 0x2c5   : > { %2160 = vmatpush1.bf16.msra.mxu0 %v3082_v4  ;;  %2201 = vmatpush1.bf16.msra.mxu1 %v3083_v7 }
 0x2c6   : > { %2161 = vmatprep.subr.bf16.mxu0 %v3084_v17  ;;  %2202 = vmatprep.subr.bf16.mxu1 %v3085_v42 }
 0x2c9   : > { %2162 = vmatpush1.bf16.msra.mxu0 %v3086_v31  ;;  %2203 = vmatpush1.bf16.msra.mxu1 %v3087_v32 }
 0x2ca   : > { %2163 = vmatprep.subr.bf16.mxu0 %v3088_v29  ;;  %2204 = vmatprep.subr.bf16.mxu1 %v3089_v27  ;;  %v3093_v27 = vld [vmem:[#allocation10 + $0x1e0] ss:$16 sps:$4 sm:$0xff]  }
 0x2cd   : > { %2164 = vmatpush1.bf16.msra.mxu0 %v3090_v11  ;;  %2205 = vmatpush1.bf16.msra.mxu1 %v3091_v15  ;;  %v3094_v11 = vld [vmem:[#allocation10 + $0x1e8] ss:$16 sps:$4 sm:$0xff]   ;;  %v3095_v15 = vld [vmem:[#allocation10 + $0x1c4] ss:$16 sps:$4 sm:$0xff]  }
 0x2ce   : > { %2165 = vmatprep.subr.bf16.mxu0 %v3092_v38  ;;  %2206 = vmatprep.subr.bf16.mxu1 %v4000_v0  ;;  %v3096_v38 = vld [vmem:[#allocation10 + $0x1cc] ss:$16 sps:$4 sm:$0xff]  }
 0x2d1   : > { %2166 = vmatpush1.bf16.msra.mxu0 %v4001_v1  ;;  %2207 = vmatpush1.bf16.msra.mxu1 %v4002_v30  ;;  %v4018_v30 = vld [vmem:[#allocation53_spill] sm:$0xff] }
 0x2d2   : > { %2167 = vmatprep.subr.bf16.mxu0 %v4003_v14  ;;  %2208 = vmatprep.subr.bf16.mxu1 %v4004_v36 }
 0x2d5   : > { %2168 = vmatpush1.bf16.msra.mxu0 %v4005_v35  ;;  %2209 = vmatpush1.bf16.msra.mxu1 %v4006_v22  ;;  %v4019_v22 = vld [vmem:[#allocation54_spill] sm:$0xff] }
 0x2d6   : > { %2267 = vmatprep.subr.bf16.mxu0 %v4007_v40  ;;  %2308 = vmatprep.subr.bf16.mxu1 %v4008_v37 }
 0x358   : > { %v1955_v34 = vpop.f32.mrf.mxu0  ;;  %v1996_v23 = vpop.f32.mrf.mxu1 }
 0x359   : > { %v2003_v0 = vadd.f32 %v1955_v34, %v4017_v26  ;;  %v2005_v37 = vadd.f32 %v1996_v23, %v4020_v9  ;;  %v3097_v23 = vld [vmem:[#allocation10 + $0x1c0] ss:$16 sps:$4 sm:$0xff]   ;;  %v3098_v26 = vld [vmem:[#allocation10 + $0x1c8] ss:$16 sps:$4 sm:$0xff]  }
 0x35a   : > { %v1957_v20 = vpop.f32.mrf.mxu0  ;;  %v1998_v1 = vpop.f32.mrf.mxu1  ;;  %v3106_v9 = vld [vmem:[#allocation10 + $0x188] ss:$16 sps:$4 sm:$0xff]  }
 0x35b   : > { %v2685_v41 = vmul.f32 -1.442695, %v2003_v0  ;;  %v2004_v21 = vadd.f32 %v1957_v20, %v4018_v30  ;;  %v2006_v40 = vadd.f32 %v1998_v1, %v4019_v22  ;;  %v3099_v20 = vld [vmem:[#allocation10 + $0x1a4] ss:$16 sps:$4 sm:$0xff]   ;;  %v3100_v1 = vld [vmem:[#allocation10 + $0x1ac] ss:$16 sps:$4 sm:$0xff]  }
 0x35c   : > { %v1959_v14 = vpop.f32.mrf.mxu0  ;;  %v2000_v8 = vpop.f32.mrf.mxu1 }
 0x35d   : > { %3004 = vpow2.f32 %v2685_v41  ;;  %v2686_v36 = vmul.f32 -1.442695, %v2004_v21  ;;  %v2687_v10 = vmul.f32 -1.442695, %v2006_v40  ;;  %v3101_v8 = vld [vmem:[#allocation10 + $0x1a0] ss:$16 sps:$4 sm:$0xff]  }
 0x35e   : > { %v1960_v35 = vpop.f32.mrf.mxu0  ;;  %v2001_v25 = vpop.f32.mrf.mxu1  ;;  %v3105_v40 = vld [vmem:[#allocation10 + $0x180] ss:$16 sps:$4 sm:$0xff]  }
 0x35f   : > { %3006 = vpow2.f32 %v2686_v36  ;;  %v3102_v36 = vld [vmem:[#allocation10 + $0x1a8] ss:$16 sps:$4 sm:$0xff]   ;;  %v3103_v35 = vld [vmem:[#allocation10 + $0x184] ss:$16 sps:$4 sm:$0xff]   ;;  %v3104_v25 = vld [vmem:[#allocation10 + $0x18c] ss:$16 sps:$4 sm:$0xff]  }
 0x360   : > { %3008 = vtanh.f32 %v2005_v37  ;;  %v3107_v37 = vld [vmem:[#allocation10 + $0x164] ss:$16 sps:$4 sm:$0xff]  }
 0x361   : > { %3010 = vpow2.f32 %v2687_v10  ;;  %v3108_v10 = vld [vmem:[#allocation10 + $0x16c] ss:$16 sps:$4 sm:$0xff]  }
 0x36a   : > { %v3005_v24 = vpop.eup %3004 }
 0x36b   : > { %v2010_v18 = vadd.f32 1.0, %v3005_v24  ;;  %v3109_v24 = vld [vmem:[#allocation10 + $0x160] ss:$16 sps:$4 sm:$0xff]  }
 0x36c   : > { %v3007_v13 = vpop.eup %3006 }
 0x36d   : > { %3012 = vrcp.f32 %v2010_v18  ;;  %v2016_v16 = vadd.f32 1.0, %v3007_v13  ;;  %v3009_v12 = vpop.eup %3008  ;;  %v3111_v18 = vld [vmem:[#allocation10 + $0x144] ss:$16 sps:$4 sm:$0xff]   ;;  %v3112_v13 = vld [vmem:[#allocation10 + $0x14c] ss:$16 sps:$4 sm:$0xff]  }
 0x36e   : > { %v3011_v6 = vpop.eup %3010 }
 0x36f   : > { %3014 = vrcp.f32 %v2016_v16  ;;  %v2023_v53 = vadd.f32 1.0, %v3011_v6  ;;  %v3113_v16 = vld [vmem:[#allocation10 + $0x140] ss:$16 sps:$4 sm:$0xff]  }
 0x370   : > { %v3117_v6 = vld [vmem:[#allocation10 + $0x120] ss:$16 sps:$4 sm:$0xff]  }
 0x378   : > { %v2069_v19 = vpop.f32.mrf.mxu0  ;;  %v2110_v5 = vpop.f32.mrf.mxu1 }
 0x379   : > { %v2117_v44 = vadd.f32 %v2069_v19, %v4021_v43  ;;  %v2119_v63 = vadd.f32 %v2110_v5, %v4024_v62  ;;  %v3115_v19 = vld [vmem:[#allocation10 + $0x124] ss:$16 sps:$4 sm:$0xff]   ;;  %v3116_v5 = vld [vmem:[#allocation10 + $0x12c] ss:$16 sps:$4 sm:$0xff]   ;;  %v3118_v43 = vld [vmem:[#allocation10 + $0x128] ss:$16 sps:$4 sm:$0xff]  }
 0x37a   : > { %v3013_v28 = vpop.eup %3012  ;;  %v2071_v45 = vpop.f32.mrf.mxu0 }
 0x37b   : > { %v2112_v46 = vpop.f32.mrf.mxu1  ;;  %v2027_v48 = vmul.f32 %v3013_v28, %v3009_v12  ;;  %v2688_v49 = vmul.f32 -1.442695, %v2117_v44  ;;  %v2118_v51 = vadd.f32 %v2071_v45, %v4022_v50  ;;  %v3114_v12 = vld [vmem:[#allocation10 + $0x148] ss:$16 sps:$4 sm:$0xff]   ;;  %v3119_v28 = vld [vmem:[#allocation10 + $0x104] ss:$16 sps:$4 sm:$0xff]  }
 0x37c   : > { %v3015_v52 = vpop.eup %3014  ;;  %v2073_v54 = vpop.f32.mrf.mxu0  ;;  %v2120_v61 = vadd.f32 %v2112_v46, %v4023_v60  ;;  %v3120_v45 = vld [vmem:[#allocation10 + $0x10c] ss:$16 sps:$4 sm:$0xff]   ;;  %v3122_v50 = vld [vmem:[#allocation10 + $0x108] ss:$16 sps:$4 sm:$0xff]  }
 0x37d   : > { %v2114_v55 = vpop.f32.mrf.mxu1  ;;  %v2026_v56 = vmul.f32 %v3015_v52, %v3776_v33  ;;  %3016 = vpow2.f32 %v2688_v49  ;;  %v2689_v57 = vmul.f32 -1.442695, %v2118_v51  ;;  %v3121_v49 = vld [vmem:[#allocation10 + $0x100] ss:$16 sps:$4 sm:$0xff]   ;;  %v4025_v54 = vld [vmem:[#allocation55_spill] sm:$0xff] }
 0x37e   : > { %v2074_v3 = vpop.f32.mrf.mxu0  ;;  %v2690_v2 = vmul.f32 -1.442695, %v2120_v61 }
 0x37f   : > { %v2115_v58 = vpop.f32.mrf.mxu1  ;;  %v3837_v59 = vadd.f32 %v2027_v48, %v2026_v56  ;;  %3018 = vpow2.f32 %v2689_v57 }
 0x380   : > { %3020 = vrcp.f32 %v2023_v53  ;;  %v4026_v58 = vld [vmem:[#allocation57_spill] sm:$0xff] }
 0x381   : > { %3022 = vtanh.f32 %v3837_v59 }
 0x382   : > { %3024 = vtanh.f32 %v2119_v63 }
 0x383   : > { %3026 = vpow2.f32 %v2690_v2 }
 0x38a   : > { %v3017_v4 = vpop.eup %3016 }
 0x38b   : > { %v2124_v7 = vadd.f32 1.0, %v3017_v4 }
 0x38c   : > { %v3019_v33 = vpop.eup %3018 }
 0x38d   : > { %v3021_v17 = vpop.eup %3020  ;;  %3028 = vrcp.f32 %v2124_v7  ;;  %v2130_v42 = vadd.f32 1.0, %v3019_v33  ;;  %v4027_v7 = vld [vmem:[#allocation58_spill] sm:$0xff] }
 0x38e   : > { %v3023_v31 = vpop.eup %3022 }
 0x38f   : > { %3030 = vrcp.f32 %v2130_v42  ;;  %v2030_v32 = vmul.f32 %v3023_v31, %v3021_v17  ;;  %v3025_v34 = vpop.eup %3024  ;;  %v4028_v17 = vld [vmem:[#allocation56_spill] sm:$0xff] }
 0x390   : > { %v3027_v0 = vpop.eup %3026 }
 0x391   : > { %v2145_v29 = vpack.c.bf16 %v2030_v32, %v2030_v32  ;;  %v2137_v14 = vadd.f32 1.0, %v3027_v0 }
 0x393   : > { %2146 = vst [vmem:[%s3350_s11 + $0x8] sm:$0xf] %v2145_v29  ;;  %2186 = vmatmul.mubr.bf16.vlgmr.msra.gmra.mxu0 %v2145_v29  ;;  %2227 = vmatmul.mubr.bf16.vlgmr.msra.gmra.mxu1 %v2145_v29  ;;  %3032 = vrcp.f32 %v2137_v14  ;;  %v4030_v14 = vld [vmem:[#allocation61_spill] sm:$0xff] }
 0x394   : > { %2268 = vmatpush1.bf16.msra.mxu0 %v3093_v27  ;;  %2309 = vmatpush1.bf16.msra.mxu1 %v3094_v11 }
 0x395   : > { %2269 = vmatprep.subr.bf16.mxu0 %v3095_v15  ;;  %2310 = vmatprep.subr.bf16.mxu1 %v3096_v38 }
 0x396   : > { %2299 = vmatprep.mubr.bf16.mxu0 %v3952_v39  ;;  %2340 = vmatprep.mubr.bf16.mxu1 %v3952_v39 }
 0x398   : > { %2270 = vmatpush1.bf16.msra.mxu0 %v3097_v23  ;;  %2311 = vmatpush1.bf16.msra.mxu1 %v3098_v26  ;;  %v4029_v26 = vld [vmem:[#allocation59_spill] sm:$0xff] }
 0x399   : > { %2271 = vmatprep.subr.bf16.mxu0 %v3099_v20  ;;  %2312 = vmatprep.subr.bf16.mxu1 %v3100_v1 }
 0x39a   : > { %v3029_v41 = vpop.eup %3028 }
 0x39b   : > { %v2141_v30 = vmul.f32 %v3029_v41, %v3025_v34 }
 0x39c   : > { %v3031_v21 = vpop.eup %3030  ;;  %2272 = vmatpush1.bf16.msra.mxu0 %v3101_v8  ;;  %2313 = vmatpush1.bf16.msra.mxu1 %v3102_v36 }
 0x39d   : > { %v2140_v39 = vmul.f32 %v3031_v21, %v3797_v47  ;;  %2273 = vmatprep.subr.bf16.mxu0 %v3103_v35  ;;  %2314 = vmatprep.subr.bf16.mxu1 %v3104_v25  ;;  %v3110_v47 = vld [vmem:[#allocation10 + $0x168] ss:$16 sps:$4 sm:$0xff]  }
 0x39f   : > { %v3846_v22 = vadd.f32 %v2141_v30, %v2140_v39 }
 0x3a0   : > { %2274 = vmatpush1.bf16.msra.mxu0 %v3105_v40  ;;  %2315 = vmatpush1.bf16.msra.mxu1 %v3106_v9  ;;  %v3033_v44 = vpop.eup %3032 }
 0x3a1   : > { %2275 = vmatprep.subr.bf16.mxu0 %v3107_v37  ;;  %2316 = vmatprep.subr.bf16.mxu1 %v3108_v10  ;;  %3034 = vtanh.f32 %v3846_v22 }
 0x3a4   : > { %2276 = vmatpush1.bf16.msra.mxu0 %v3109_v24  ;;  %2317 = vmatpush1.bf16.msra.mxu1 %v3110_v47  ;;  %v4031_v47 = vld [vmem:[#allocation62_spill] sm:$0xff] }
 0x3a5   : > { %2277 = vmatprep.subr.bf16.mxu0 %v3111_v18  ;;  %2318 = vmatprep.subr.bf16.mxu1 %v3112_v13  ;;  %v4032_v13 = vld [vmem:[#allocation60_spill] sm:$0xff] }
 0x3a8   : > { %2278 = vmatpush1.bf16.msra.mxu0 %v3113_v16  ;;  %2319 = vmatpush1.bf16.msra.mxu1 %v3114_v12 }
 0x3a9   : > { %2279 = vmatprep.subr.bf16.mxu0 %v3115_v19  ;;  %2320 = vmatprep.subr.bf16.mxu1 %v3116_v5 }
 0x3ac   : > { %2280 = vmatpush1.bf16.msra.mxu0 %v3117_v6  ;;  %2321 = vmatpush1.bf16.msra.mxu1 %v3118_v43 }
 0x3ad   : > { %2281 = vmatprep.subr.bf16.mxu0 %v3119_v28  ;;  %2322 = vmatprep.subr.bf16.mxu1 %v3120_v45 }
 0x3ae   : > { %v3035_v46 = vpop.eup %3034 }
 0x3af   : > { %v2144_v48 = vmul.f32 %v3035_v46, %v3033_v44 }
 0x3b0   : > { %2282 = vmatpush1.bf16.msra.mxu0 %v3121_v49  ;;  %2323 = vmatpush1.bf16.msra.mxu1 %v3122_v50 }
 0x3b1   : > { %v2147_v51 = vpack.c.bf16 %v2144_v48, %v2144_v48 }
 0x3b3   : > { %2148 = vst [vmem:[%s3355_s14 + $0x4] sm:$0xf] %v2147_v51  ;;  %2300 = vmatmul.mubr.bf16.vlgmr.msra.gmra.mxu0 %v2147_v51  ;;  %2341 = vmatmul.mubr.bf16.vlgmr.msra.gmra.mxu1 %v2147_v51 }
 0x453   : > { %v2187_v52 = vpop.f32.mrf.mxu0  ;;  %v2228_v53 = vpop.f32.mrf.mxu1 }
 0x454   : > { %v2235_v55 = vadd.f32 %v2187_v52, %v4025_v54  ;;  %v2237_v42 = vadd.f32 %v2228_v53, %v4028_v17 }
 0x455   : > { %v2189_v56 = vpop.f32.mrf.mxu0  ;;  %v2230_v57 = vpop.f32.mrf.mxu1 }
 0x456   : > { %v2691_v3 = vmul.f32 -1.442695, %v2235_v55  ;;  %v2236_v60 = vadd.f32 %v2189_v56, %v4026_v58  ;;  %v2238_v33 = vadd.f32 %v2230_v57, %v4027_v7 }
 0x457   : > { %v2191_v61 = vpop.f32.mrf.mxu0  ;;  %v2232_v62 = vpop.f32.mrf.mxu1 }
 0x458   : > { %3036 = vpow2.f32 %v2691_v3  ;;  %v2692_v63 = vmul.f32 -1.442695, %v2236_v60  ;;  %v2693_v31 = vmul.f32 -1.442695, %v2238_v33 }
 0x459   : > { %v2192_v2 = vpop.f32.mrf.mxu0  ;;  %v2233_v4 = vpop.f32.mrf.mxu1 }
 0x45a   : > { %3038 = vpow2.f32 %v2692_v63 }
 0x45b   : > { %3040 = vtanh.f32 %v2237_v42 }
 0x45c   : > { %3042 = vpow2.f32 %v2693_v31 }
 0x465   : > { %v3037_v32 = vpop.eup %3036 }
 0x466   : > { %v2242_v29 = vadd.f32 1.0, %v3037_v32 }
 0x467   : > { %v3039_v27 = vpop.eup %3038 }
 0x468   : > { %3044 = vrcp.f32 %v2242_v29  ;;  %v2248_v11 = vadd.f32 1.0, %v3039_v27  ;;  %v3041_v15 = vpop.eup %3040 }
 0x469   : > { %v3043_v23 = vpop.eup %3042 }
 0x46a   : > { %3046 = vrcp.f32 %v2248_v11  ;;  %v2255_v39 = vadd.f32 1.0, %v3043_v23 }
 0x473   : > { %v2301_v38 = vpop.f32.mrf.mxu0  ;;  %v2342_v34 = vpop.f32.mrf.mxu1 }
 0x474   : > { %v2349_v0 = vadd.f32 %v2301_v38, %v4029_v26  ;;  %v2351_v16 = vadd.f32 %v2342_v34, %v4032_v13 }
 0x475   : > { %v3045_v20 = vpop.eup %3044  ;;  %v2303_v1 = vpop.f32.mrf.mxu0 }
 0x476   : > { %v2344_v41 = vpop.f32.mrf.mxu1  ;;  %v2259_v30 = vmul.f32 %v3045_v20, %v3041_v15  ;;  %v2694_v21 = vmul.f32 -1.442695, %v2349_v0  ;;  %v2350_v8 = vadd.f32 %v2303_v1, %v4030_v14 }
 0x477   : > { %v3047_v36 = vpop.eup %3046  ;;  %v2305_v35 = vpop.f32.mrf.mxu0  ;;  %v2352_v18 = vadd.f32 %v2344_v41, %v4031_v47 }
 0x478   : > { %v2346_v25 = vpop.f32.mrf.mxu1  ;;  %v2258_v40 = vmul.f32 %v3047_v36, %v3837_v59  ;;  %3048 = vpow2.f32 %v2694_v21  ;;  %v2695_v9 = vmul.f32 -1.442695, %v2350_v8 }
 0x479   : > { %v2306_v37 = vpop.f32.mrf.mxu0  ;;  %v2696_v12 = vmul.f32 -1.442695, %v2352_v18 }
 0x47a   : > { %v2347_v10 = vpop.f32.mrf.mxu1  ;;  %v2260_v24 = vadd.f32 %v2259_v30, %v2258_v40  ;;  %3050 = vpow2.f32 %v2695_v9 }
 0x47b   : > { %3052 = vrcp.f32 %v2255_v39 }
 0x47c   : > { %3054 = vtanh.f32 %v2260_v24  ;;  %2382 = vst [vmem:[#allocation3] sm:$0xff] %v2260_v24 }
 0x47d   : > { %3056 = vtanh.f32 %v2351_v16 }
 0x47e   : > { %3058 = vpow2.f32 %v2696_v12 }
 0x485   : > { %v3049_v19 = vpop.eup %3048 }
 0x486   : > { %v2356_v5 = vadd.f32 1.0, %v3049_v19 }
 0x487   : > { %v3051_v6 = vpop.eup %3050 }
 0x488   : > { %v3053_v59 = vpop.eup %3052  ;;  %3060 = vrcp.f32 %v2356_v5  ;;  %v2362_v43 = vadd.f32 1.0, %v3051_v6 }
 0x489   : > { %v3055_v44 = vpop.eup %3054 }
 0x48a   : > { %v2262_v28 = vmul.f32 %v3055_v44, %v3053_v59  ;;  %3062 = vrcp.f32 %v2362_v43  ;;  %v3057_v46 = vpop.eup %3056 }
 0x48b   : > { %v3059_v48 = vpop.eup %3058 }
 0x48c   : > { %v2377_v45 = vpack.c.bf16 %v2262_v28, %v2262_v28  ;;  %2381 = vst [vmem:[#allocation2] sm:$0xff] %v2262_v28  ;;  %v2369_v52 = vadd.f32 1.0, %v3059_v48 }
 0x48e   : > { %2378 = vst [vmem:[%s3350_s11 + $0xc] sm:$0xf] %v2377_v45  ;;  %3064 = vrcp.f32 %v2369_v52 }
 0x495   : > { %v3061_v49 = vpop.eup %3060 }
 0x496   : > { %v2373_v50 = vmul.f32 %v3061_v49, %v3057_v46 }
 0x497   : > { %v3063_v51 = vpop.eup %3062 }
 0x498   : > { %v2372_v53 = vmul.f32 %v3063_v51, %v3846_v22 }
 0x49a   : > { %v2374_v54 = vadd.f32 %v2373_v50, %v2372_v53 }
 0x49b   : > { %v3065_v55 = vpop.eup %3064 }
 0x49c   : > { %3066 = vtanh.f32 %v2374_v54  ;;  %2384 = vst [vmem:[#allocation5] sm:$0xff] %v2374_v54 }
 0x4a9   : > { %v3067_v56 = vpop.eup %3066 }
 0x4aa   : > { %v2376_v57 = vmul.f32 %v3067_v56, %v3065_v55 }
 0x4ac   : > { %v2379_v3 = vpack.c.bf16 %v2376_v57, %v2376_v57  ;;  %2383 = vst [vmem:[#allocation4] sm:$0xff] %v2376_v57 }
 0x4ae   : > { %2380 = vst [vmem:[%s3355_s14] sm:$0xf] %v2379_v3 }
 0x4af PF: > { %s19_s21 = sadd.s32 1, %s3215_s21  }
 0x4b0   : > { %p16_p2 = scmp.ge.s32.totalorder %s19_s21, 4  }
 0x4b2   :  { %18 = sbr.rel (!%p16_p2) target bundleno = 2 (0x2), region = 105 }
 0x4b7   :  { %2427 = vsyncpa [#allocation9], 1 }
 0x4b8   :  { %2429 = vsyncpa [#allocation9 + $0x1], 1 }
 0x4b9   :  { %2430 = vsyncpa [#allocation11], 1 }

// kernel: bilstm_forward.3
= control target key start
LH: loop header
LB: loop body
LE: loop exit
PB: predicated region body
PF: predicated region fallthrough
CT: control target
= control target key end

     0   :  { %14 = vsyncpa [#allocation10], 0  ;;  %s4401_s30 = smov 0   ;;  %s5399_s0 = inlined_call_operand.vmem [shape: bf16[64,128], index: 0, kind: input, shape index: {}, may-alias: {0,2}]   ;;  %s5400_s1 = inlined_call_operand.vmem [shape: bf16[64,128], index: 1, kind: input, shape index: {}, may-alias: {1,3}]   ;;  %s5401_s2 = inlined_call_operand.vmem [shape: bf16[64,128], index: 2, kind: input, shape index: {}, may-alias: {0,2}]   ;;  %s5402_s3 = inlined_call_operand.vmem [shape: bf16[64,128], index: 3, kind: input, shape index: {}, may-alias: {1,3}]   ;;  %s5403_s4 = inlined_call_operand.vmem [shape: bf16[4,128,512], index: 4, kind: input, shape index: {}]   ;;  %s5404_s5 = inlined_call_operand.hbm [shape: bf16[2,128,512], index: 5, kind: input, shape index: {}]   ;;  %s5405_s6 = inlined_call_operand.vmem [shape: f32[2,1,512], index: 6, kind: input, shape index: {}]   ;;  %s5406_s7 = inlined_call_operand.vmem [shape: bf16[2,128,128], index: 7, kind: input, shape index: {}]   ;;  %s5407_s8 = inlined_call_operand.vmem [shape: f32[1,128], index: 8, kind: input, shape index: {}]   ;;  %s5408_s9 = inlined_call_operand.vmem [shape: f32[8,128], index: 9, kind: output, shape index: {}]  }
   0x1 LB: > { %s4407_s10 = sadd.s32 4294967295, %s4342_s30   ;;  %p3411_p0 = scmp.ge.s32.totalorder %s4342_s30, 1  ;;  %s4342_s30 = sphi %s4401_s30, %s20_s30  }
   0x2   : > { %p259_p1 = scmp.lt.s32.totalorder %s4342_s30, 3  ;;  %s4344_s11 = smov [#allocation9]  }
   0x3   : > { %s274_s12 = sshll.u32 %s4344_s11, 4  ;;  %p3849_p4 = scmp.eq.s32.totalorder %s4407_s10, 0  ;;  %s275_s12 = int_to_ptr.vmem [resolvable:$true] %s274_s12 }
   0x4   : > { %p4412_p3 = pnand %p3411_p0, %p259_p1  ;;  %s4317_s14 = scalar_lea.vmem %s275_s12, 8192 }
   0x5   : > { %p4318_p8 = scmp.ne.s32.totalorder %s275_s12, %s4317_s14  ;;  %p4325_p11 = scmp.lt.s32.totalorder %s275_s12, %s275_s12 }
   0x6   : > { %p3845_p5 = pneg %p4412_p3  ;;  %p4326_p12 = scmp.lt.s32.totalorder %s4317_s14, %s4317_s14 }
   0x8   : > { %p3846_p6 = pnand %p3849_p4, %p3845_p5  ;;  %p4327_p13 = por %p4326_p12, %p4325_p11 }
   0xa   : > { %p4308_p7 = pneg %p3846_p6 }
   0xc   : > { %p4320_p9 = pnand %p4318_p8, %p4308_p7 }
   0xe   : > { %p4321_p10 = pneg %p4320_p9 }
  0x10   : > { %p4328_p2 = pnand %p4327_p13, %p4321_p10 }
  0x12   : > { %4331 = shalt.err (!%p4328_p2)
}
  0x13   : > { %s4345_s15 = smov 256   ;;  %s4346_s16 = smov 16  }
  0x14   : > { %3848 = dma.hbm_to_vmem [thread:$0]  (!%p3846_p6), %s5404_s5, 8192, %s275_s12, [#allocation10], %s4345_s15, %s4345_s15, %s4346_s16  }
  0x15   : > { %339 = sbr.rel (%p4412_p3) target bundleno = 1534 (0x5fe), region = 56 }
  0x1a   : > { %4337 = dma.done.wait (%p3849_p4), [#allocation10], 8192  }
  0x1b   : > { %4339 = vsyncadd (%p3849_p4), [#allocation10], 4294959104  ;;  %s3416_s19 = sshll.u32 %s4407_s10, 2  ;;  %s399_s20 = ssub.s32 1, %s4407_s10 }
  0x1c   : > { %p388_p0 = scmp.lt.s32.totalorder %s3416_s19, 7  ;;  %s3420_s21 = sshll.u32 %s399_s20, 2 }
  0x1d   : > { %p401_p1 = scmp.lt.s32.totalorder %s3420_s21, 7  ;;  %p5520_p2 = scmp.ne.s32.totalorder %s4407_s10, 0 }
  0x1e   : > { %s5645_s19 = smov (!%p388_p0, %s3416_s19), 7 }
  0x1f   : > { %s5647_s21 = smov (!%p401_p1, %s3420_s21), 7  ;;  %s3417_s22 = sshll.u32 %s5645_s19, 2 }
  0x20   : > { %s4435_s25 = scalar_lea.vmem %s5399_s0, %s3417_s22  ;;  %s4440_s28 = scalar_lea.vmem %s5400_s1, %s3417_s22 }
  0x21   : > { %s3421_s29 = sshll.u32 %s5647_s21, 2  ;;  %419 = sbr.rel (%p5520_p2) target bundleno = 41 (0x29), region = 64 }
  0x22   : > { %s4445_s13 = scalar_lea.vmem %s5401_s2, %s3421_s29  ;;  %s4450_s16 = scalar_lea.vmem %s5402_s3, %s3421_s29 }
  0x26   : > { %v4347_v0 = vmov 0.0  }
  0x27   : > { %420 = vst [vmem:[#allocation2] sm:$0xff] %v4347_v0  ;;  %421 = vst [vmem:[#allocation3] sm:$0xff] %v4347_v0 }
  0x28   : > { %422 = vst [vmem:[#allocation4] sm:$0xff] %v4347_v0  ;;  %423 = vst [vmem:[#allocation5] sm:$0xff] %v4347_v0 }
  0x29 PF: > { %v3866_v1 = vld [vmem:[%s5403_s4 + $0x1e4] ss:$16 sps:$4 sm:$0xff]   ;;  %v3868_v2 = vld [vmem:[%s5403_s4 + $0x1ec] ss:$16 sps:$4 sm:$0xff]   ;;  %v5409_v3 = vmov 0   ;;  %p5575_p3 = scmp.ne.s32.totalorder %s4407_s10, 0 }
  0x2a   : > { %738 = vmatprep.mubr.bf16.mxu0 %v5409_v3  ;;  %791 = vmatprep.mubr.bf16.mxu1 %v5409_v3  ;;  %v3870_v4 = vld [vmem:[%s5403_s4 + $0x1e0] ss:$16 sps:$4 sm:$0xff]   ;;  %v3871_v5 = vld [vmem:[%s5403_s4 + $0x1e8] ss:$16 sps:$4 sm:$0xff]   ;;  %v3872_v6 = vld [vmem:[%s5403_s4 + $0x1c4] ss:$16 sps:$4 sm:$0xff]  }
  0x2b   : > { %706 = vmatprep.subr.bf16.mxu0 %v3866_v1  ;;  %759 = vmatprep.subr.bf16.mxu1 %v3868_v2  ;;  %v3874_v7 = vld [vmem:[%s5403_s4 + $0x1cc] ss:$16 sps:$4 sm:$0xff]   ;;  %v3876_v8 = vld [vmem:[%s5403_s4 + $0x1c0] ss:$16 sps:$4 sm:$0xff]   ;;  %v3877_v9 = vld [vmem:[%s5403_s4 + $0x1c8] ss:$16 sps:$4 sm:$0xff]  }
  0x2c   : > { %707 = vmatpush1.bf16.msra.mxu0 %v3870_v4  ;;  %760 = vmatpush1.bf16.msra.mxu1 %v3871_v5  ;;  %v3878_v10 = vld [vmem:[%s5403_s4 + $0x1a4] ss:$16 sps:$4 sm:$0xff]   ;;  %v3880_v11 = vld [vmem:[%s5403_s4 + $0x1ac] ss:$16 sps:$4 sm:$0xff]   ;;  %v3882_v12 = vld [vmem:[%s5403_s4 + $0x1a0] ss:$16 sps:$4 sm:$0xff]  }
  0x2d   : > { %708 = vmatprep.subr.bf16.mxu0 %v3872_v6  ;;  %761 = vmatprep.subr.bf16.mxu1 %v3874_v7  ;;  %v3883_v13 = vld [vmem:[%s5403_s4 + $0x1a8] ss:$16 sps:$4 sm:$0xff]   ;;  %v3884_v14 = vld [vmem:[%s5403_s4 + $0x184] ss:$16 sps:$4 sm:$0xff]   ;;  %v3886_v15 = vld [vmem:[%s5403_s4 + $0x18c] ss:$16 sps:$4 sm:$0xff]  }
  0x2e   : > { %v3888_v16 = vld [vmem:[%s5403_s4 + $0x180] ss:$16 sps:$4 sm:$0xff]   ;;  %v3889_v17 = vld [vmem:[%s5403_s4 + $0x188] ss:$16 sps:$4 sm:$0xff]   ;;  %v3890_v18 = vld [vmem:[%s5403_s4 + $0x164] ss:$16 sps:$4 sm:$0xff]  }
  0x2f   : > { %v3892_v19 = vld [vmem:[%s5403_s4 + $0x16c] ss:$16 sps:$4 sm:$0xff]   ;;  %v3894_v20 = vld [vmem:[%s5403_s4 + $0x160] ss:$16 sps:$4 sm:$0xff]   ;;  %v3895_v21 = vld [vmem:[%s5403_s4 + $0x168] ss:$16 sps:$4 sm:$0xff]  }
  0x30   : > { %709 = vmatpush1.bf16.msra.mxu0 %v3876_v8  ;;  %762 = vmatpush1.bf16.msra.mxu1 %v3877_v9  ;;  %v3896_v22 = vld [vmem:[%s5403_s4 + $0x144] ss:$16 sps:$4 sm:$0xff]   ;;  %v3898_v23 = vld [vmem:[%s5403_s4 + $0x14c] ss:$16 sps:$4 sm:$0xff]   ;;  %v3900_v24 = vld [vmem:[%s5403_s4 + $0x140] ss:$16 sps:$4 sm:$0xff]  }
  0x31   : > { %710 = vmatprep.subr.bf16.mxu0 %v3878_v10  ;;  %763 = vmatprep.subr.bf16.mxu1 %v3880_v11  ;;  %v3901_v25 = vld [vmem:[%s5403_s4 + $0x148] ss:$16 sps:$4 sm:$0xff]   ;;  %v3902_v26 = vld [vmem:[%s5403_s4 + $0x124] ss:$16 sps:$4 sm:$0xff]   ;;  %v3904_v27 = vld [vmem:[%s5403_s4 + $0x12c] ss:$16 sps:$4 sm:$0xff]  }
  0x32   : > { %v3906_v28 = vld [vmem:[%s5403_s4 + $0x120] ss:$16 sps:$4 sm:$0xff]   ;;  %v3907_v29 = vld [vmem:[%s5403_s4 + $0x128] ss:$16 sps:$4 sm:$0xff]   ;;  %v3908_v30 = vld [vmem:[%s5403_s4 + $0x104] ss:$16 sps:$4 sm:$0xff]  }
  0x33   : > { %v3910_v31 = vld [vmem:[%s5403_s4 + $0x10c] ss:$16 sps:$4 sm:$0xff]   ;;  %v3912_v32 = vld [vmem:[%s5403_s4 + $0x100] ss:$16 sps:$4 sm:$0xff]   ;;  %v3913_v33 = vld [vmem:[%s5403_s4 + $0x108] ss:$16 sps:$4 sm:$0xff]  }
  0x34   : > { %711 = vmatpush1.bf16.msra.mxu0 %v3882_v12  ;;  %764 = vmatpush1.bf16.msra.mxu1 %v3883_v13  ;;  %v3917_v34 = vld [vmem:[%s5403_s4 + $0xe4] ss:$16 sps:$4 sm:$0xff]   ;;  %v3920_v35 = vld [vmem:[%s5403_s4 + $0xec] ss:$16 sps:$4 sm:$0xff]   ;;  %v3915_v37 = vld [vmem:[%s5403_s4 + $0xe0] ss:$16 sps:$4 sm:$0xff]  }
  0x35   : > { %712 = vmatprep.subr.bf16.mxu0 %v3884_v14  ;;  %765 = vmatprep.subr.bf16.mxu1 %v3886_v15  ;;  %v3914_v36 = vld [vmem:[%s4440_s28] sm:$0xff]   ;;  %v3918_v38 = vld [vmem:[%s5403_s4 + $0xe8] ss:$16 sps:$4 sm:$0xff]   ;;  %v3926_v40 = vld [vmem:[%s5403_s4 + $0xcc] ss:$16 sps:$4 sm:$0xff]  }
  0x36   : > { %v3923_v39 = vld [vmem:[%s5403_s4 + $0xc4] ss:$16 sps:$4 sm:$0xff]   ;;  %v3921_v41 = vld [vmem:[%s5403_s4 + $0xc0] ss:$16 sps:$4 sm:$0xff]   ;;  %v3924_v42 = vld [vmem:[%s5403_s4 + $0xc8] ss:$16 sps:$4 sm:$0xff]  }
  0x37   : > { %v3929_v43 = vld [vmem:[%s5403_s4 + $0xa4] ss:$16 sps:$4 sm:$0xff]   ;;  %v3932_v44 = vld [vmem:[%s5403_s4 + $0xac] ss:$16 sps:$4 sm:$0xff]   ;;  %v3927_v46 = vld [vmem:[%s5403_s4 + $0xa0] ss:$16 sps:$4 sm:$0xff]  }
  0x38   : > { %713 = vmatpush1.bf16.msra.mxu0 %v3888_v16  ;;  %766 = vmatpush1.bf16.msra.mxu1 %v3889_v17  ;;  %v3945_v45 = vld [vmem:[%s4440_s28 + $0x8] sm:$0xff]   ;;  %v3935_v48 = vld [vmem:[%s5403_s4 + $0x84] ss:$16 sps:$4 sm:$0xff]   ;;  %v3933_v50 = vld [vmem:[%s5403_s4 + $0x80] ss:$16 sps:$4 sm:$0xff]  }
  0x39   : > { %714 = vmatprep.subr.bf16.mxu0 %v3890_v18  ;;  %767 = vmatprep.subr.bf16.mxu1 %v3892_v19  ;;  %v3930_v47 = vld [vmem:[%s5403_s4 + $0xa8] ss:$16 sps:$4 sm:$0xff]   ;;  %v3938_v49 = vld [vmem:[%s5403_s4 + $0x8c] ss:$16 sps:$4 sm:$0xff]   ;;  %v3941_v52 = vld [vmem:[%s5403_s4 + $0x64] ss:$16 sps:$4 sm:$0xff]  }
  0x3a   : > { %v3936_v51 = vld [vmem:[%s5403_s4 + $0x88] ss:$16 sps:$4 sm:$0xff]   ;;  %v3944_v53 = vld [vmem:[%s5403_s4 + $0x6c] ss:$16 sps:$4 sm:$0xff]   ;;  %v3939_v54 = vld [vmem:[%s5403_s4 + $0x60] ss:$16 sps:$4 sm:$0xff]  }
  0x3b   : > { %v3942_v55 = vld [vmem:[%s5403_s4 + $0x68] ss:$16 sps:$4 sm:$0xff]   ;;  %v3948_v56 = vld [vmem:[%s5403_s4 + $0x44] ss:$16 sps:$4 sm:$0xff]   ;;  %v3951_v57 = vld [vmem:[%s5403_s4 + $0x4c] ss:$16 sps:$4 sm:$0xff]  }
  0x3c   : > { %715 = vmatpush1.bf16.msra.mxu0 %v3894_v20  ;;  %768 = vmatpush1.bf16.msra.mxu1 %v3895_v21  ;;  %v3946_v58 = vld [vmem:[%s5403_s4 + $0x40] ss:$16 sps:$4 sm:$0xff]   ;;  %v3949_v59 = vld [vmem:[%s5403_s4 + $0x48] ss:$16 sps:$4 sm:$0xff]   ;;  %v3954_v60 = vld [vmem:[%s5403_s4 + $0x24] ss:$16 sps:$4 sm:$0xff]  }
  0x3d   : > { %716 = vmatprep.subr.bf16.mxu0 %v3896_v22  ;;  %769 = vmatprep.subr.bf16.mxu1 %v3898_v23  ;;  %v3957_v61 = vld [vmem:[%s5403_s4 + $0x2c] ss:$16 sps:$4 sm:$0xff]   ;;  %v3952_v62 = vld [vmem:[%s5403_s4 + $0x20] ss:$16 sps:$4 sm:$0xff]   ;;  %v3955_v63 = vld [vmem:[%s5403_s4 + $0x28] ss:$16 sps:$4 sm:$0xff]  }
  0x3e   : > { %v3960_v0 = vld [vmem:[%s5403_s4 + $0x4] ss:$16 sps:$4 sm:$0xff]   ;;  %v3963_v1 = vld [vmem:[%s5403_s4 + $0xc] ss:$16 sps:$4 sm:$0xff]   ;;  %v3958_v2 = vld [vmem:[%s5403_s4] ss:$16 sps:$4 sm:$0xff]  }
  0x3f   : > { %v3961_v4 = vld [vmem:[%s5403_s4 + $0x8] ss:$16 sps:$4 sm:$0xff]   ;;  %v3967_v5 = vld [vmem:[%s5403_s4 + $0x3e4] ss:$16 sps:$4 sm:$0xff]   ;;  %v3970_v6 = vld [vmem:[%s5403_s4 + $0x3ec] ss:$16 sps:$4 sm:$0xff]  }
  0x40   : > { %717 = vmatpush1.bf16.msra.mxu0 %v3900_v24  ;;  %770 = vmatpush1.bf16.msra.mxu1 %v3901_v25  ;;  %v3964_v7 = vld [vmem:[%s4435_s25] sm:$0xff]   ;;  %v3968_v9 = vld [vmem:[%s5403_s4 + $0x3e8] ss:$16 sps:$4 sm:$0xff]   ;;  %v3976_v11 = vld [vmem:[%s5403_s4 + $0x3cc] ss:$16 sps:$4 sm:$0xff]  }
  0x41   : > { %718 = vmatprep.subr.bf16.mxu0 %v3902_v26  ;;  %771 = vmatprep.subr.bf16.mxu1 %v3904_v27  ;;  %v3965_v8 = vld [vmem:[%s5403_s4 + $0x3e0] ss:$16 sps:$4 sm:$0xff]   ;;  %v3973_v10 = vld [vmem:[%s5403_s4 + $0x3c4] ss:$16 sps:$4 sm:$0xff]   ;;  %v3974_v13 = vld [vmem:[%s5403_s4 + $0x3c8] ss:$16 sps:$4 sm:$0xff]  }
  0x42   : > { %v3971_v12 = vld [vmem:[%s5403_s4 + $0x3c0] ss:$16 sps:$4 sm:$0xff]   ;;  %v3980_v14 = vld [vmem:[%s5403_s4 + $0x3a4] ss:$16 sps:$4 sm:$0xff]   ;;  %v3983_v15 = vld [vmem:[%s5403_s4 + $0x3ac] ss:$16 sps:$4 sm:$0xff]  }
  0x43   : > { %v3977_v16 = vld [vmem:[%s4435_s25 + $0x8] sm:$0xff]   ;;  %v3978_v17 = vld [vmem:[%s5403_s4 + $0x3a0] ss:$16 sps:$4 sm:$0xff]   ;;  %v3986_v19 = vld [vmem:[%s5403_s4 + $0x384] ss:$16 sps:$4 sm:$0xff]  }
  0x44   : > { %719 = vmatpush1.bf16.msra.mxu0 %v3906_v28  ;;  %772 = vmatpush1.bf16.msra.mxu1 %v3907_v29  ;;  %v3981_v18 = vld [vmem:[%s5403_s4 + $0x3a8] ss:$16 sps:$4 sm:$0xff]   ;;  %v3989_v20 = vld [vmem:[%s5403_s4 + $0x38c] ss:$16 sps:$4 sm:$0xff]   ;;  %v3984_v21 = vld [vmem:[%s5403_s4 + $0x380] ss:$16 sps:$4 sm:$0xff]  }
  0x45   : > { %720 = vmatprep.subr.bf16.mxu0 %v3908_v30  ;;  %773 = vmatprep.subr.bf16.mxu1 %v3910_v31  ;;  %v3987_v22 = vld [vmem:[%s5403_s4 + $0x388] ss:$16 sps:$4 sm:$0xff]   ;;  %v3992_v23 = vld [vmem:[%s5403_s4 + $0x364] ss:$16 sps:$4 sm:$0xff]   ;;  %v3995_v24 = vld [vmem:[%s5403_s4 + $0x36c] ss:$16 sps:$4 sm:$0xff]  }
  0x46   : > { %v3990_v25 = vld [vmem:[%s5403_s4 + $0x360] ss:$16 sps:$4 sm:$0xff]   ;;  %v3993_v26 = vld [vmem:[%s5403_s4 + $0x368] ss:$16 sps:$4 sm:$0xff]   ;;  %v3998_v27 = vld [vmem:[%s5403_s4 + $0x344] ss:$16 sps:$4 sm:$0xff]  }
  0x47   : > { %v4001_v28 = vld [vmem:[%s5403_s4 + $0x34c] ss:$16 sps:$4 sm:$0xff]   ;;  %v3996_v29 = vld [vmem:[%s5403_s4 + $0x340] ss:$16 sps:$4 sm:$0xff]   ;;  %v3999_v30 = vld [vmem:[%s5403_s4 + $0x348] ss:$16 sps:$4 sm:$0xff]  }
  0x48   : > { %721 = vmatpush1.bf16.msra.mxu0 %v3912_v32  ;;  %774 = vmatpush1.bf16.msra.mxu1 %v3913_v33  ;;  %v4004_v31 = vld [vmem:[%s5403_s4 + $0x324] ss:$16 sps:$4 sm:$0xff]   ;;  %v4007_v32 = vld [vmem:[%s5403_s4 + $0x32c] ss:$16 sps:$4 sm:$0xff]   ;;  %v4002_v33 = vld [vmem:[%s5403_s4 + $0x320] ss:$16 sps:$4 sm:$0xff]  }
  0x49   : > { %984 = vmatprep.subr.bf16.mxu0 %v3917_v34  ;;  %1037 = vmatprep.subr.bf16.mxu1 %v3920_v35  ;;  %v4005_v34 = vld [vmem:[%s5403_s4 + $0x328] ss:$16 sps:$4 sm:$0xff]   ;;  %v4010_v35 = vld [vmem:[%s5403_s4 + $0x304] ss:$16 sps:$4 sm:$0xff]  }
  0x4b   : > { %739 = vmatmul.mubr.bf16.vlgmr.msra.gmra.mxu0 %v3914_v36  ;;  %792 = vmatmul.mubr.bf16.vlgmr.msra.gmra.mxu1 %v3914_v36  ;;  %v4013_v36 = vld [vmem:[%s5403_s4 + $0x30c] ss:$16 sps:$4 sm:$0xff]  }
  0x4c   : > { %985 = vmatpush1.bf16.msra.mxu0 %v3915_v37  ;;  %1038 = vmatpush1.bf16.msra.mxu1 %v3918_v38  ;;  %v4008_v37 = vld [vmem:[%s5403_s4 + $0x300] ss:$16 sps:$4 sm:$0xff]   ;;  %v4011_v38 = vld [vmem:[%s5403_s4 + $0x308] ss:$16 sps:$4 sm:$0xff]  }
  0x4d   : > { %986 = vmatprep.subr.bf16.mxu0 %v3923_v39  ;;  %1039 = vmatprep.subr.bf16.mxu1 %v3926_v40  ;;  %v4017_v39 = vld [vmem:[%s5403_s4 + $0x2e4] ss:$16 sps:$4 sm:$0xff]   ;;  %v4020_v40 = vld [vmem:[%s5403_s4 + $0x2ec] ss:$16 sps:$4 sm:$0xff]  }
  0x4e   : > { %748 = vmatprep.mubr.bf16.mxu0 %v5409_v3  ;;  %801 = vmatprep.mubr.bf16.mxu1 %v5409_v3 }
  0x50   : > { %987 = vmatpush1.bf16.msra.mxu0 %v3921_v41  ;;  %1040 = vmatpush1.bf16.msra.mxu1 %v3924_v42  ;;  %v4014_v41 = vld [vmem:[%s4450_s16] sm:$0xff]  }
  0x51   : > { %988 = vmatprep.subr.bf16.mxu0 %v3929_v43  ;;  %1041 = vmatprep.subr.bf16.mxu1 %v3932_v44  ;;  %v4015_v42 = vld [vmem:[%s5403_s4 + $0x2e0] ss:$16 sps:$4 sm:$0xff]   ;;  %v4018_v43 = vld [vmem:[%s5403_s4 + $0x2e8] ss:$16 sps:$4 sm:$0xff]   ;;  %v4023_v44 = vld [vmem:[%s5403_s4 + $0x2c4] ss:$16 sps:$4 sm:$0xff]  }
  0x53   : > { %749 = vmatmul.mubr.bf16.gmra.mxu0 %v3945_v45  ;;  %802 = vmatmul.mubr.bf16.gmra.mxu1 %v3945_v45  ;;  %v4026_v45 = vld [vmem:[%s5403_s4 + $0x2cc] ss:$16 sps:$4 sm:$0xff]  }
  0x54   : > { %989 = vmatpush1.bf16.msra.mxu0 %v3927_v46  ;;  %1042 = vmatpush1.bf16.msra.mxu1 %v3930_v47  ;;  %v4021_v46 = vld [vmem:[%s5403_s4 + $0x2c0] ss:$16 sps:$4 sm:$0xff]   ;;  %v4024_v47 = vld [vmem:[%s5403_s4 + $0x2c8] ss:$16 sps:$4 sm:$0xff]  }
  0x55   : > { %990 = vmatprep.subr.bf16.mxu0 %v3935_v48  ;;  %1043 = vmatprep.subr.bf16.mxu1 %v3938_v49  ;;  %v4029_v48 = vld [vmem:[%s5403_s4 + $0x2a4] ss:$16 sps:$4 sm:$0xff]   ;;  %v4032_v49 = vld [vmem:[%s5403_s4 + $0x2ac] ss:$16 sps:$4 sm:$0xff]  }
  0x56   : > { %1016 = vmatprep.mubr.bf16.mxu0 %v5409_v3  ;;  %1069 = vmatprep.mubr.bf16.mxu1 %v5409_v3 }
  0x58   : > { %991 = vmatpush1.bf16.msra.mxu0 %v3933_v50  ;;  %1044 = vmatpush1.bf16.msra.mxu1 %v3936_v51  ;;  %v4027_v50 = vld [vmem:[%s5403_s4 + $0x2a0] ss:$16 sps:$4 sm:$0xff]   ;;  %v4030_v51 = vld [vmem:[%s5403_s4 + $0x2a8] ss:$16 sps:$4 sm:$0xff]  }
  0x59   : > { %992 = vmatprep.subr.bf16.mxu0 %v3941_v52  ;;  %1045 = vmatprep.subr.bf16.mxu1 %v3944_v53  ;;  %v4045_v52 = vld [vmem:[%s4450_s16 + $0x8] sm:$0xff]   ;;  %v4035_v53 = vld [vmem:[%s5403_s4 + $0x284] ss:$16 sps:$4 sm:$0xff]  }
  0x5c   : > { %993 = vmatpush1.bf16.msra.mxu0 %v3939_v54  ;;  %1046 = vmatpush1.bf16.msra.mxu1 %v3942_v55  ;;  %v4038_v54 = vld [vmem:[%s5403_s4 + $0x28c] ss:$16 sps:$4 sm:$0xff]   ;;  %v4033_v55 = vld [vmem:[%s5403_s4 + $0x280] ss:$16 sps:$4 sm:$0xff]  }
  0x5d   : > { %994 = vmatprep.subr.bf16.mxu0 %v3948_v56  ;;  %1047 = vmatprep.subr.bf16.mxu1 %v3951_v57  ;;  %v4036_v56 = vld [vmem:[%s5403_s4 + $0x288] ss:$16 sps:$4 sm:$0xff]   ;;  %v4041_v57 = vld [vmem:[%s5403_s4 + $0x264] ss:$16 sps:$4 sm:$0xff]  }
  0x60   : > { %995 = vmatpush1.bf16.msra.mxu0 %v3946_v58  ;;  %1048 = vmatpush1.bf16.msra.mxu1 %v3949_v59  ;;  %v4044_v58 = vld [vmem:[%s5403_s4 + $0x26c] ss:$16 sps:$4 sm:$0xff]   ;;  %v4039_v59 = vld [vmem:[%s5403_s4 + $0x260] ss:$16 sps:$4 sm:$0xff]  }
  0x61   : > { %996 = vmatprep.subr.bf16.mxu0 %v3954_v60  ;;  %1049 = vmatprep.subr.bf16.mxu1 %v3957_v61  ;;  %v4042_v60 = vld [vmem:[%s5403_s4 + $0x268] ss:$16 sps:$4 sm:$0xff]   ;;  %v4048_v61 = vld [vmem:[%s5403_s4 + $0x244] ss:$16 sps:$4 sm:$0xff]  }
  0x64   : > { %997 = vmatpush1.bf16.msra.mxu0 %v3952_v62  ;;  %1050 = vmatpush1.bf16.msra.mxu1 %v3955_v63  ;;  %v4051_v62 = vld [vmem:[%s5403_s4 + $0x24c] ss:$16 sps:$4 sm:$0xff]   ;;  %v4046_v63 = vld [vmem:[%s5403_s4 + $0x240] ss:$16 sps:$4 sm:$0xff]  }
  0x65   : > { %998 = vmatprep.subr.bf16.mxu0 %v3960_v0  ;;  %1051 = vmatprep.subr.bf16.mxu1 %v3963_v1  ;;  %v4049_v0 = vld [vmem:[%s5403_s4 + $0x248] ss:$16 sps:$4 sm:$0xff]   ;;  %v4054_v1 = vld [vmem:[%s5403_s4 + $0x224] ss:$16 sps:$4 sm:$0xff]  }
  0x68   : > { %999 = vmatpush1.bf16.msra.mxu0 %v3958_v2  ;;  %1052 = vmatpush1.bf16.msra.mxu1 %v3961_v4  ;;  %v4057_v2 = vld [vmem:[%s5403_s4 + $0x22c] ss:$16 sps:$4 sm:$0xff]   ;;  %v4052_v4 = vld [vmem:[%s5403_s4 + $0x220] ss:$16 sps:$4 sm:$0xff]  }
  0x69   : > { %1299 = vmatprep.subr.bf16.mxu0 %v3967_v5  ;;  %1352 = vmatprep.subr.bf16.mxu1 %v3970_v6  ;;  %v4055_v5 = vld [vmem:[%s5403_s4 + $0x228] ss:$16 sps:$4 sm:$0xff]   ;;  %v4060_v6 = vld [vmem:[%s5403_s4 + $0x204] ss:$16 sps:$4 sm:$0xff]  }
  0x6b   : > { %1017 = vmatmul.mubr.bf16.vlgmr.msra.gmra.mxu0 %v3964_v7  ;;  %1070 = vmatmul.mubr.bf16.vlgmr.msra.gmra.mxu1 %v3964_v7  ;;  %v4063_v7 = vld [vmem:[%s5403_s4 + $0x20c] ss:$16 sps:$4 sm:$0xff]  }
  0x6c   : > { %1300 = vmatpush1.bf16.msra.mxu0 %v3965_v8  ;;  %1353 = vmatpush1.bf16.msra.mxu1 %v3968_v9  ;;  %v4058_v8 = vld [vmem:[%s5403_s4 + $0x200] ss:$16 sps:$4 sm:$0xff]   ;;  %v4061_v9 = vld [vmem:[%s5403_s4 + $0x208] ss:$16 sps:$4 sm:$0xff]  }
  0x6d   : > { %1301 = vmatprep.subr.bf16.mxu0 %v3973_v10  ;;  %1354 = vmatprep.subr.bf16.mxu1 %v3976_v11  ;;  %v4858_v10 = vld [vmem:[#allocation9 + $0xe4] ss:$16 sps:$4 sm:$0xff]   ;;  %v4860_v11 = vld [vmem:[#allocation9 + $0xec] ss:$16 sps:$4 sm:$0xff]  }
  0x6e   : > { %1026 = vmatprep.mubr.bf16.mxu0 %v5409_v3  ;;  %1079 = vmatprep.mubr.bf16.mxu1 %v5409_v3 }
  0x70   : > { %1302 = vmatpush1.bf16.msra.mxu0 %v3971_v12  ;;  %1355 = vmatpush1.bf16.msra.mxu1 %v3974_v13  ;;  %v4064_v12 = vld [vmem:[%s4445_s13] sm:$0xff]   ;;  %v4863_v13 = vld [vmem:[#allocation9 + $0xe0] ss:$16 sps:$4 sm:$0xff]  }
  0x71   : > { %1303 = vmatprep.subr.bf16.mxu0 %v3980_v14  ;;  %1356 = vmatprep.subr.bf16.mxu1 %v3983_v15  ;;  %v4865_v14 = vld [vmem:[#allocation9 + $0xe8] ss:$16 sps:$4 sm:$0xff]   ;;  %v4869_v15 = vld [vmem:[#allocation9 + $0xc4] ss:$16 sps:$4 sm:$0xff]  }
  0x73   : > { %1027 = vmatmul.mubr.bf16.gmra.mxu0 %v3977_v16  ;;  %1080 = vmatmul.mubr.bf16.gmra.mxu1 %v3977_v16  ;;  %v4871_v16 = vld [vmem:[#allocation9 + $0xcc] ss:$16 sps:$4 sm:$0xff]  }
  0x74   : > { %1304 = vmatpush1.bf16.msra.mxu0 %v3978_v17  ;;  %1357 = vmatpush1.bf16.msra.mxu1 %v3981_v18  ;;  %v4873_v17 = vld [vmem:[#allocation9 + $0xc0] ss:$16 sps:$4 sm:$0xff]   ;;  %v4877_v18 = vld [vmem:[#allocation9 + $0xc8] ss:$16 sps:$4 sm:$0xff]  }
  0x75   : > { %1305 = vmatprep.subr.bf16.mxu0 %v3986_v19  ;;  %1358 = vmatprep.subr.bf16.mxu1 %v3989_v20  ;;  %v4881_v19 = vld [vmem:[#allocation9 + $0xa4] ss:$16 sps:$4 sm:$0xff]   ;;  %v4883_v20 = vld [vmem:[#allocation9 + $0xac] ss:$16 sps:$4 sm:$0xff]  }
  0x76   : > { %1331 = vmatprep.mubr.bf16.mxu0 %v5409_v3  ;;  %1384 = vmatprep.mubr.bf16.mxu1 %v5409_v3 }
  0x78   : > { %1306 = vmatpush1.bf16.msra.mxu0 %v3984_v21  ;;  %1359 = vmatpush1.bf16.msra.mxu1 %v3987_v22  ;;  %v4077_v21 = vld [vmem:[%s4445_s13 + $0x8] sm:$0xff]  }
  0x79   : > { %1307 = vmatprep.subr.bf16.mxu0 %v3992_v23  ;;  %1360 = vmatprep.subr.bf16.mxu1 %v3995_v24  ;;  %v4890_v22 = vld [vmem:[#allocation9 + $0xa0] ss:$16 sps:$4 sm:$0xff]   ;;  %v4892_v23 = vld [vmem:[#allocation9 + $0xa8] ss:$16 sps:$4 sm:$0xff]   ;;  %v4896_v24 = vld [vmem:[#allocation9 + $0x84] ss:$16 sps:$4 sm:$0xff]  }
  0x7c   : > { %1308 = vmatpush1.bf16.msra.mxu0 %v3990_v25  ;;  %1361 = vmatpush1.bf16.msra.mxu1 %v3993_v26  ;;  %v4898_v25 = vld [vmem:[#allocation9 + $0x8c] ss:$16 sps:$4 sm:$0xff]   ;;  %v4902_v26 = vld [vmem:[#allocation9 + $0x80] ss:$16 sps:$4 sm:$0xff]  }
  0x7d   : > { %1309 = vmatprep.subr.bf16.mxu0 %v3998_v27  ;;  %1362 = vmatprep.subr.bf16.mxu1 %v4001_v28  ;;  %5521 = vst [vmem:[#allocation12_spill] sm:$0xff] %v4902_v26  ;;  %v4904_v27 = vld [vmem:[#allocation9 + $0x88] ss:$16 sps:$4 sm:$0xff]   ;;  %v4908_v28 = vld [vmem:[#allocation9 + $0x64] ss:$16 sps:$4 sm:$0xff]  }
  0x7e   : > { %5522 = vst [vmem:[#allocation13_spill] sm:$0xff] %v4904_v27  ;;  %5523 = vst [vmem:[#allocation14_spill] sm:$0xff] %v4908_v28 }
  0x80   : > { %1310 = vmatpush1.bf16.msra.mxu0 %v3996_v29  ;;  %1363 = vmatpush1.bf16.msra.mxu1 %v3999_v30  ;;  %v4910_v29 = vld [vmem:[#allocation9 + $0x6c] ss:$16 sps:$4 sm:$0xff]   ;;  %v4916_v30 = vld [vmem:[#allocation9 + $0x60] ss:$16 sps:$4 sm:$0xff]  }
  0x81   : > { %1311 = vmatprep.subr.bf16.mxu0 %v4004_v31  ;;  %1364 = vmatprep.subr.bf16.mxu1 %v4007_v32  ;;  %5524 = vst [vmem:[#allocation15_spill] sm:$0xff] %v4910_v29  ;;  %5525 = vst [vmem:[#allocation16_spill] sm:$0xff] %v4916_v30  ;;  %v4918_v31 = vld [vmem:[#allocation9 + $0x68] ss:$16 sps:$4 sm:$0xff]   ;;  %v4922_v32 = vld [vmem:[#allocation9 + $0x44] ss:$16 sps:$4 sm:$0xff]  }
  0x82   : > { %5526 = vst [vmem:[#allocation17_spill] sm:$0xff] %v4918_v31  ;;  %5527 = vst [vmem:[#allocation18_spill] sm:$0xff] %v4922_v32 }
  0x84   : > { %1312 = vmatpush1.bf16.msra.mxu0 %v4002_v33  ;;  %1365 = vmatpush1.bf16.msra.mxu1 %v4005_v34  ;;  %v4924_v33 = vld [vmem:[#allocation9 + $0x4c] ss:$16 sps:$4 sm:$0xff]   ;;  %v4928_v34 = vld [vmem:[#allocation9 + $0x40] ss:$16 sps:$4 sm:$0xff]  }
  0x85   : > { %1313 = vmatprep.subr.bf16.mxu0 %v4010_v35  ;;  %1366 = vmatprep.subr.bf16.mxu1 %v4013_v36  ;;  %5528 = vst [vmem:[#allocation19_spill] sm:$0xff] %v4924_v33  ;;  %5529 = vst [vmem:[#allocation20_spill] sm:$0xff] %v4928_v34  ;;  %v4930_v35 = vld [vmem:[#allocation9 + $0x48] ss:$16 sps:$4 sm:$0xff]   ;;  %v4934_v36 = vld [vmem:[#allocation9 + $0x24] ss:$16 sps:$4 sm:$0xff]  }
  0x86   : > { %5530 = vst [vmem:[#allocation21_spill] sm:$0xff] %v4930_v35  ;;  %5531 = vst [vmem:[#allocation22_spill] sm:$0xff] %v4934_v36 }
  0x88   : > { %1314 = vmatpush1.bf16.msra.mxu0 %v4008_v37  ;;  %1367 = vmatpush1.bf16.msra.mxu1 %v4011_v38  ;;  %v4936_v37 = vld [vmem:[#allocation9 + $0x2c] ss:$16 sps:$4 sm:$0xff]   ;;  %v4940_v38 = vld [vmem:[#allocation9 + $0x20] ss:$16 sps:$4 sm:$0xff]  }
  0x89   : > { %1577 = vmatprep.subr.bf16.mxu0 %v4017_v39  ;;  %1630 = vmatprep.subr.bf16.mxu1 %v4020_v40  ;;  %5532 = vst [vmem:[#allocation23_spill] sm:$0xff] %v4936_v37  ;;  %5533 = vst [vmem:[#allocation24_spill] sm:$0xff] %v4940_v38  ;;  %v4942_v39 = vld [vmem:[#allocation9 + $0x28] ss:$16 sps:$4 sm:$0xff]   ;;  %v4946_v40 = vld [vmem:[#allocation9 + $0x4] ss:$16 sps:$4 sm:$0xff]  }
  0x8a   : > { %5534 = vst [vmem:[#allocation25_spill] sm:$0xff] %v4942_v39  ;;  %5535 = vst [vmem:[#allocation26_spill] sm:$0xff] %v4946_v40 }
  0x8b   : > { %1332 = vmatmul.mubr.bf16.vlgmr.msra.gmra.mxu0 %v4014_v41  ;;  %1385 = vmatmul.mubr.bf16.vlgmr.msra.gmra.mxu1 %v4014_v41  ;;  %v4948_v41 = vld [vmem:[#allocation9 + $0xc] ss:$16 sps:$4 sm:$0xff]  }
  0x8c   : > { %1578 = vmatpush1.bf16.msra.mxu0 %v4015_v42  ;;  %1631 = vmatpush1.bf16.msra.mxu1 %v4018_v43  ;;  %5536 = vst [vmem:[#allocation27_spill] sm:$0xff] %v4948_v41  ;;  %v4952_v42 = vld [vmem:[#allocation9] ss:$16 sps:$4 sm:$0xff]   ;;  %v4954_v43 = vld [vmem:[#allocation9 + $0x8] ss:$16 sps:$4 sm:$0xff]  }
  0x8d   : > { %1579 = vmatprep.subr.bf16.mxu0 %v4023_v44  ;;  %1632 = vmatprep.subr.bf16.mxu1 %v4026_v45  ;;  %5537 = vst [vmem:[#allocation28_spill] sm:$0xff] %v4952_v42  ;;  %5538 = vst [vmem:[#allocation29_spill] sm:$0xff] %v4954_v43  ;;  %v1857_v44 = vld [vmem:[#allocation2] sm:$0xff]  ;;  %v4958_v45 = vld [vmem:[#allocation9 + $0x1e4] ss:$16 sps:$4 sm:$0xff]  }
  0x8e   : > { %1341 = vmatprep.mubr.bf16.mxu0 %v5409_v3  ;;  %1394 = vmatprep.mubr.bf16.mxu1 %v5409_v3  ;;  %5539 = vst [vmem:[#allocation30_spill] sm:$0xff] %v4958_v45 }
  0x90   : > { %1580 = vmatpush1.bf16.msra.mxu0 %v4021_v46  ;;  %1633 = vmatpush1.bf16.msra.mxu1 %v4024_v47  ;;  %v4960_v46 = vld [vmem:[#allocation9 + $0x1ec] ss:$16 sps:$4 sm:$0xff]   ;;  %v1865_v47 = vpack.c.bf16 %v1857_v44, %v1857_v44 }
  0x91   : > { %1581 = vmatprep.subr.bf16.mxu0 %v4029_v48  ;;  %1634 = vmatprep.subr.bf16.mxu1 %v4032_v49  ;;  %5540 = vst [vmem:[#allocation31_spill] sm:$0xff] %v4960_v46  ;;  %v4964_v48 = vld [vmem:[#allocation9 + $0x1e0] ss:$16 sps:$4 sm:$0xff]   ;;  %v4966_v49 = vld [vmem:[#allocation9 + $0x1e8] ss:$16 sps:$4 sm:$0xff]  }
  0x92   : > { %5541 = vst [vmem:[#allocation32_spill] sm:$0xff] %v4964_v48  ;;  %5542 = vst [vmem:[#allocation33_spill] sm:$0xff] %v4966_v49  ;;  %v5046_v44 = vld [vmem:[#allocation9 + $0x10c] ss:$16 sps:$4 sm:$0xff]  }
  0x93   : > { %1342 = vmatmul.mubr.bf16.gmra.mxu0 %v4045_v52  ;;  %1395 = vmatmul.mubr.bf16.gmra.mxu1 %v4045_v52  ;;  %v4976_v52 = vld [vmem:[#allocation9 + $0x1c0] ss:$16 sps:$4 sm:$0xff]   ;;  %5568 = vst [vmem:[#allocation59_spill] sm:$0xff] %v5046_v44 }
  0x94   : > { %1582 = vmatpush1.bf16.msra.mxu0 %v4027_v50  ;;  %1635 = vmatpush1.bf16.msra.mxu1 %v4030_v51  ;;  %v4970_v50 = vld [vmem:[#allocation9 + $0x1c4] ss:$16 sps:$4 sm:$0xff]   ;;  %v4972_v51 = vld [vmem:[#allocation9 + $0x1cc] ss:$16 sps:$4 sm:$0xff]   ;;  %5545 = vst [vmem:[#allocation36_spill] sm:$0xff] %v4976_v52 }
  0x95   : > { %1583 = vmatprep.subr.bf16.mxu0 %v4035_v53  ;;  %1636 = vmatprep.subr.bf16.mxu1 %v4038_v54  ;;  %5543 = vst [vmem:[#allocation34_spill] sm:$0xff] %v4970_v50  ;;  %5544 = vst [vmem:[#allocation35_spill] sm:$0xff] %v4972_v51  ;;  %v4978_v53 = vld [vmem:[#allocation9 + $0x1c8] ss:$16 sps:$4 sm:$0xff]   ;;  %v4982_v54 = vld [vmem:[#allocation9 + $0x1a4] ss:$16 sps:$4 sm:$0xff]  }
  0x96   : > { %1609 = vmatprep.mubr.bf16.mxu0 %v5409_v3  ;;  %1662 = vmatprep.mubr.bf16.mxu1 %v5409_v3  ;;  %5546 = vst [vmem:[#allocation37_spill] sm:$0xff] %v4978_v53  ;;  %5547 = vst [vmem:[#allocation38_spill] sm:$0xff] %v4982_v54 }
  0x98   : > { %1584 = vmatpush1.bf16.msra.mxu0 %v4033_v55  ;;  %1637 = vmatpush1.bf16.msra.mxu1 %v4036_v56  ;;  %v4984_v55 = vld [vmem:[#allocation9 + $0x1ac] ss:$16 sps:$4 sm:$0xff]   ;;  %v4990_v56 = vld [vmem:[#allocation9 + $0x1a0] ss:$16 sps:$4 sm:$0xff]  }
  0x99   : > { %1585 = vmatprep.subr.bf16.mxu0 %v4041_v57  ;;  %1638 = vmatprep.subr.bf16.mxu1 %v4044_v58  ;;  %5548 = vst [vmem:[#allocation39_spill] sm:$0xff] %v4984_v55  ;;  %5549 = vst [vmem:[#allocation40_spill] sm:$0xff] %v4990_v56  ;;  %v4992_v57 = vld [vmem:[#allocation9 + $0x1a8] ss:$16 sps:$4 sm:$0xff]   ;;  %v4996_v58 = vld [vmem:[#allocation9 + $0x184] ss:$16 sps:$4 sm:$0xff]  }
  0x9a   : > { %5550 = vst [vmem:[#allocation41_spill] sm:$0xff] %v4992_v57  ;;  %5551 = vst [vmem:[#allocation42_spill] sm:$0xff] %v4996_v58 }
  0x9c   : > { %1586 = vmatpush1.bf16.msra.mxu0 %v4039_v59  ;;  %1639 = vmatpush1.bf16.msra.mxu1 %v4042_v60  ;;  %v4998_v59 = vld [vmem:[#allocation9 + $0x18c] ss:$16 sps:$4 sm:$0xff]   ;;  %v5002_v60 = vld [vmem:[#allocation9 + $0x180] ss:$16 sps:$4 sm:$0xff]  }
  0x9d   : > { %1587 = vmatprep.subr.bf16.mxu0 %v4048_v61  ;;  %1640 = vmatprep.subr.bf16.mxu1 %v4051_v62  ;;  %5552 = vst [vmem:[#allocation43_spill] sm:$0xff] %v4998_v59  ;;  %5553 = vst [vmem:[#allocation44_spill] sm:$0xff] %v5002_v60  ;;  %v5004_v61 = vld [vmem:[#allocation9 + $0x188] ss:$16 sps:$4 sm:$0xff]   ;;  %v5008_v62 = vld [vmem:[#allocation9 + $0x164] ss:$16 sps:$4 sm:$0xff]  }
  0x9e   : > { %5554 = vst [vmem:[#allocation45_spill] sm:$0xff] %v5004_v61  ;;  %5555 = vst [vmem:[#allocation46_spill] sm:$0xff] %v5008_v62 }
  0xa0   : > { %1588 = vmatpush1.bf16.msra.mxu0 %v4046_v63  ;;  %1641 = vmatpush1.bf16.msra.mxu1 %v4049_v0  ;;  %v5010_v63 = vld [vmem:[#allocation9 + $0x16c] ss:$16 sps:$4 sm:$0xff]   ;;  %v5014_v0 = vld [vmem:[#allocation9 + $0x160] ss:$16 sps:$4 sm:$0xff]  }
  0xa1   : > { %1589 = vmatprep.subr.bf16.mxu0 %v4054_v1  ;;  %1642 = vmatprep.subr.bf16.mxu1 %v4057_v2  ;;  %5556 = vst [vmem:[#allocation47_spill] sm:$0xff] %v5010_v63  ;;  %5557 = vst [vmem:[#allocation48_spill] sm:$0xff] %v5014_v0  ;;  %v5016_v1 = vld [vmem:[#allocation9 + $0x168] ss:$16 sps:$4 sm:$0xff]   ;;  %v5020_v2 = vld [vmem:[#allocation9 + $0x144] ss:$16 sps:$4 sm:$0xff]  }
  0xa2   : > { %5558 = vst [vmem:[#allocation49_spill] sm:$0xff] %v5016_v1  ;;  %5559 = vst [vmem:[#allocation50_spill] sm:$0xff] %v5020_v2 }
  0xa4   : > { %1590 = vmatpush1.bf16.msra.mxu0 %v4052_v4  ;;  %1643 = vmatpush1.bf16.msra.mxu1 %v4055_v5  ;;  %v5022_v4 = vld [vmem:[#allocation9 + $0x14c] ss:$16 sps:$4 sm:$0xff]   ;;  %v5026_v5 = vld [vmem:[#allocation9 + $0x140] ss:$16 sps:$4 sm:$0xff]  }
  0xa5   : > { %1591 = vmatprep.subr.bf16.mxu0 %v4060_v6  ;;  %1644 = vmatprep.subr.bf16.mxu1 %v4063_v7  ;;  %5560 = vst [vmem:[#allocation51_spill] sm:$0xff] %v5022_v4  ;;  %5561 = vst [vmem:[#allocation52_spill] sm:$0xff] %v5026_v5  ;;  %v5028_v6 = vld [vmem:[#allocation9 + $0x148] ss:$16 sps:$4 sm:$0xff]   ;;  %v5032_v7 = vld [vmem:[#allocation9 + $0x124] ss:$16 sps:$4 sm:$0xff]  }
  0xa6   : > { %5562 = vst [vmem:[#allocation53_spill] sm:$0xff] %v5028_v6  ;;  %5563 = vst [vmem:[#allocation54_spill] sm:$0xff] %v5032_v7 }
  0xa8   : > { %1592 = vmatpush1.bf16.msra.mxu0 %v4058_v8  ;;  %1645 = vmatpush1.bf16.msra.mxu1 %v4061_v9  ;;  %v5034_v8 = vld [vmem:[#allocation9 + $0x12c] ss:$16 sps:$4 sm:$0xff]   ;;  %v5038_v9 = vld [vmem:[#allocation9 + $0x120] ss:$16 sps:$4 sm:$0xff]  }
  0xa9   : > { %2026 = vmatprep.subr.bf16.mxu0 %v4858_v10  ;;  %2067 = vmatprep.subr.bf16.mxu1 %v4860_v11  ;;  %5564 = vst [vmem:[#allocation55_spill] sm:$0xff] %v5034_v8  ;;  %5565 = vst [vmem:[#allocation56_spill] sm:$0xff] %v5038_v9 }
  0xab   : > { %1610 = vmatmul.mubr.bf16.vlgmr.msra.gmra.mxu0 %v4064_v12  ;;  %1663 = vmatmul.mubr.bf16.vlgmr.msra.gmra.mxu1 %v4064_v12  ;;  %v5040_v12 = vld [vmem:[#allocation9 + $0x128] ss:$16 sps:$4 sm:$0xff]  }
  0xac   : > { %2027 = vmatpush1.bf16.msra.mxu0 %v4863_v13  ;;  %2068 = vmatpush1.bf16.msra.mxu1 %v4865_v14  ;;  %5566 = vst [vmem:[#allocation57_spill] sm:$0xff] %v5040_v12 }
  0xad   : > { %2028 = vmatprep.subr.bf16.mxu0 %v4869_v15  ;;  %2069 = vmatprep.subr.bf16.mxu1 %v4871_v16 }
  0xae   : > { %1619 = vmatprep.mubr.bf16.mxu0 %v5409_v3  ;;  %1672 = vmatprep.mubr.bf16.mxu1 %v5409_v3 }
  0xb0   : > { %2029 = vmatpush1.bf16.msra.mxu0 %v4873_v17  ;;  %2070 = vmatpush1.bf16.msra.mxu1 %v4877_v18 }
  0xb1   : > { %2030 = vmatprep.subr.bf16.mxu0 %v4881_v19  ;;  %2071 = vmatprep.subr.bf16.mxu1 %v4883_v20 }
  0xb3   : > { %1620 = vmatmul.mubr.bf16.gmra.mxu0 %v4077_v21  ;;  %1673 = vmatmul.mubr.bf16.gmra.mxu1 %v4077_v21  ;;  %v5044_v21 = vld [vmem:[#allocation9 + $0x104] ss:$16 sps:$4 sm:$0xff]  }
  0xb4   : > { %2031 = vmatpush1.bf16.msra.mxu0 %v4890_v22  ;;  %2072 = vmatpush1.bf16.msra.mxu1 %v4892_v23  ;;  %5567 = vst [vmem:[#allocation58_spill] sm:$0xff] %v5044_v21 }
  0xb5   : > { %2032 = vmatprep.subr.bf16.mxu0 %v4896_v24  ;;  %2073 = vmatprep.subr.bf16.mxu1 %v4898_v25 }
  0xb6   : > { %2058 = vmatprep.mubr.bf16.mxu0 %v5409_v3  ;;  %2099 = vmatprep.mubr.bf16.mxu1 %v5409_v3 }
  0xb8   : > { %2033 = vmatpush1.bf16.msra.mxu0 %v4902_v26  ;;  %2074 = vmatpush1.bf16.msra.mxu1 %v4904_v27 }
  0xb9   : > { %2034 = vmatprep.subr.bf16.mxu0 %v4908_v28  ;;  %2075 = vmatprep.subr.bf16.mxu1 %v4910_v29 }
  0xbc   : > { %2035 = vmatpush1.bf16.msra.mxu0 %v4916_v30  ;;  %2076 = vmatpush1.bf16.msra.mxu1 %v4918_v31 }
  0xbd   : > { %2036 = vmatprep.subr.bf16.mxu0 %v4922_v32  ;;  %2077 = vmatprep.subr.bf16.mxu1 %v4924_v33 }
  0xc0   : > { %2037 = vmatpush1.bf16.msra.mxu0 %v4928_v34  ;;  %2078 = vmatpush1.bf16.msra.mxu1 %v4930_v35 }
  0xc1   : > { %2038 = vmatprep.subr.bf16.mxu0 %v4934_v36  ;;  %2079 = vmatprep.subr.bf16.mxu1 %v4936_v37 }
  0xc4   : > { %2039 = vmatpush1.bf16.msra.mxu0 %v4940_v38  ;;  %2080 = vmatpush1.bf16.msra.mxu1 %v4942_v39 }
  0xc5   : > { %2040 = vmatprep.subr.bf16.mxu0 %v4946_v40  ;;  %2081 = vmatprep.subr.bf16.mxu1 %v4948_v41 }
  0xc8   : > { %2041 = vmatpush1.bf16.msra.mxu0 %v4952_v42  ;;  %2082 = vmatpush1.bf16.msra.mxu1 %v4954_v43 }
  0xc9   : > { %2301 = vmatprep.subr.bf16.mxu0 %v4958_v45  ;;  %2342 = vmatprep.subr.bf16.mxu1 %v4960_v46 }
  0xcb   : > { %2059 = vmatmul.mubr.bf16.vlgmr.msra.gmra.mxu0 %v1865_v47  ;;  %2100 = vmatmul.mubr.bf16.vlgmr.msra.gmra.mxu1 %v1865_v47  ;;  %v5050_v47 = vld [vmem:[#allocation9 + $0x100] ss:$16 sps:$4 sm:$0xff]  }
  0xcc   : > { %2302 = vmatpush1.bf16.msra.mxu0 %v4964_v48  ;;  %2343 = vmatpush1.bf16.msra.mxu1 %v4966_v49  ;;  %5569 = vst [vmem:[#allocation60_spill] sm:$0xff] %v5050_v47 }
  0xcd   : > { %2303 = vmatprep.subr.bf16.mxu0 %v4970_v50  ;;  %2344 = vmatprep.subr.bf16.mxu1 %v4972_v51 }
  0xce   : > { %2333 = vmatprep.mubr.bf16.mxu0 %v5409_v3  ;;  %2374 = vmatprep.mubr.bf16.mxu1 %v5409_v3  ;;  %v5052_v3 = vld [vmem:[#allocation9 + $0x108] ss:$16 sps:$4 sm:$0xff]  }
  0xcf   : > { %5570 = vst [vmem:[#allocation61_spill] sm:$0xff] %v5052_v3 }
  0xd0   : > { %2304 = vmatpush1.bf16.msra.mxu0 %v4976_v52  ;;  %2345 = vmatpush1.bf16.msra.mxu1 %v4978_v53 }
  0xd1   : > { %2305 = vmatprep.subr.bf16.mxu0 %v4982_v54  ;;  %2346 = vmatprep.subr.bf16.mxu1 %v4984_v55 }
  0xd4   : > { %2306 = vmatpush1.bf16.msra.mxu0 %v4990_v56  ;;  %2347 = vmatpush1.bf16.msra.mxu1 %v4992_v57 }
  0xd5   : > { %2307 = vmatprep.subr.bf16.mxu0 %v4996_v58  ;;  %2348 = vmatprep.subr.bf16.mxu1 %v4998_v59  ;;  %v1683_v58 = vld [vmem:[%s5405_s6] sm:$0xf] }
  0xd8   : > { %2308 = vmatpush1.bf16.msra.mxu0 %v5002_v60  ;;  %2349 = vmatpush1.bf16.msra.mxu1 %v5004_v61 }
  0xd9   : > { %2309 = vmatprep.subr.bf16.mxu0 %v5008_v62  ;;  %2350 = vmatprep.subr.bf16.mxu1 %v5010_v63 }
  0xdc   : > { %2310 = vmatpush1.bf16.msra.mxu0 %v5014_v0  ;;  %2351 = vmatpush1.bf16.msra.mxu1 %v5016_v1 }
  0xdd   : > { %2311 = vmatprep.subr.bf16.mxu0 %v5020_v2  ;;  %2352 = vmatprep.subr.bf16.mxu1 %v5022_v4 }
  0xe0   : > { %2312 = vmatpush1.bf16.msra.mxu0 %v5026_v5  ;;  %2353 = vmatpush1.bf16.msra.mxu1 %v5028_v6  ;;  %v1859_v6 = vld [vmem:[#allocation4] sm:$0xff] }
  0xe1   : > { %2313 = vmatprep.subr.bf16.mxu0 %v5032_v7  ;;  %2354 = vmatprep.subr.bf16.mxu1 %v5034_v8  ;;  %v2140_v7 = vpack.c.bf16 %v1859_v6, %v1859_v6 }
  0xe4   : > { %2314 = vmatpush1.bf16.msra.mxu0 %v5038_v9  ;;  %2355 = vmatpush1.bf16.msra.mxu1 %v5040_v12 }
  0xe5   : > { %2315 = vmatprep.subr.bf16.mxu0 %v5044_v21  ;;  %2356 = vmatprep.subr.bf16.mxu1 %v5046_v44  ;;  %v1685_v21 = vlaneseq }
  0xe7   : > { %v5058_v6 = vshrl.u32 %v1685_v21, 7 }
  0xe8   : > { %2316 = vmatpush1.bf16.msra.mxu0 %v5050_v47  ;;  %2357 = vmatpush1.bf16.msra.mxu1 %v5052_v3 }
  0xe9   : > { %v5479_v3 = vsub.s32 0, %v5058_v6  ;;  %v5487_v57 = vsub.s32 1, %v5058_v6  ;;  %v5490_v56 = vsub.s32 3, %v5058_v6 }
  0xeb   : > { %2334 = vmatmul.mubr.bf16.vlgmr.msra.gmra.mxu0 %v2140_v7  ;;  %2375 = vmatmul.mubr.bf16.vlgmr.msra.gmra.mxu1 %v2140_v7  ;;  %v5484_v7 = vsub.s32 2, %v5058_v6  ;;  %v1688_v21 = vrot.slane %v1683_v58, %v5479_v3  ;;  %v1692_v49 = vrot.slane %v1683_v58, %v5487_v57  ;;  %v1700_v48 = vrot.slane %v1683_v58, %v5490_v56 }
  0xed   : > { %v1696_v54 = vrot.slane %v1683_v58, %v5484_v7 }
 0x10b   : > { %v793_v8 = vpop.f32.mrf.mxu1  ;;  %v740_v9 = vpop.f32.mrf.mxu0 }
 0x10d   : > { %v795_v5 = vpop.f32.mrf.mxu1  ;;  %v742_v12 = vpop.f32.mrf.mxu0 }
 0x10f   : > { %v797_v4 = vpop.f32.mrf.mxu1  ;;  %v744_v2 = vpop.f32.mrf.mxu0 }
 0x111   : > { %v799_v1 = vpop.f32.mrf.mxu1  ;;  %v746_v0 = vpop.f32.mrf.mxu0 }
 0x113   : > { %v803_v63 = vpop.f32.mrf.mxu1  ;;  %v750_v62 = vpop.f32.mrf.mxu0 }
 0x115   : > { %v805_v61 = vpop.f32.mrf.mxu1  ;;  %v752_v44 = vpop.f32.mrf.mxu0 }
 0x117   : > { %v807_v47 = vpop.f32.mrf.mxu1  ;;  %v754_v60 = vpop.f32.mrf.mxu0 }
 0x119   : > { %v809_v59 = vpop.f32.mrf.mxu1  ;;  %v756_v55 = vpop.f32.mrf.mxu0 }
 0x12b   : > { %v1018_v53 = vpop.f32.mrf.mxu0  ;;  %v1071_v52 = vpop.f32.mrf.mxu1 }
 0x12c   : > { %v1019_v51 = vadd.f32 %v1018_v53, %v740_v9  ;;  %v1072_v50 = vadd.f32 %v1071_v52, %v793_v8 }
 0x12d   : > { %v1020_v46 = vpop.f32.mrf.mxu0  ;;  %v1073_v45 = vpop.f32.mrf.mxu1 }
 0x12e   : > { %v5075_v43 = vadd.f32 %v1688_v21, %v1019_v51  ;;  %v5077_v42 = vadd.f32 %v1696_v54, %v1072_v50  ;;  %v1021_v3 = vadd.f32 %v1020_v46, %v742_v12  ;;  %v1074_v41 = vadd.f32 %v1073_v45, %v795_v5 }
 0x12f   : > { %v1022_v40 = vpop.f32.mrf.mxu0  ;;  %v1075_v7 = vpop.f32.mrf.mxu1 }
 0x130   : > { %v5079_v39 = vadd.f32 %v1692_v49, %v1021_v3  ;;  %v5081_v53 = vadd.f32 %v1700_v48, %v1074_v41  ;;  %v1023_v52 = vadd.f32 %v1022_v40, %v744_v2  ;;  %v1076_v8 = vadd.f32 %v1075_v7, %v797_v4 }
 0x131   : > { %v1024_v9 = vpop.f32.mrf.mxu0  ;;  %v1077_v57 = vpop.f32.mrf.mxu1 }
 0x132   : > { %v1709_v38 = vadd.f32 %v1688_v21, %v1023_v52  ;;  %v1711_v58 = vadd.f32 %v1696_v54, %v1076_v8  ;;  %v1025_v56 = vadd.f32 %v1024_v9, %v746_v0  ;;  %v1078_v37 = vadd.f32 %v1077_v57, %v799_v1 }
 0x133   : > { %v1028_v51 = vpop.f32.mrf.mxu0  ;;  %v1081_v36 = vpop.f32.mrf.mxu1 }
 0x134   : > { %1725 = vst [vmem:[#allocation6 + $0x50] sm:$0xff] %v1709_v38  ;;  %1727 = vst [vmem:[#allocation6 + $0x8] sm:$0xff] %v1711_v58  ;;  %v1710_v46 = vadd.f32 %v1692_v49, %v1025_v56  ;;  %v1712_v45 = vadd.f32 %v1700_v48, %v1078_v37  ;;  %v1029_v50 = vadd.f32 %v1028_v51, %v750_v62 }
 0x135   : > { %v1082_v5 = vadd.f32 %v1081_v36, %v803_v63  ;;  %v1030_v3 = vpop.f32.mrf.mxu0  ;;  %v1083_v12 = vpop.f32.mrf.mxu1 }
 0x136   : > { %1726 = vst [vmem:[#allocation6 + $0x68] sm:$0xff] %v1710_v46  ;;  %1728 = vst [vmem:[#allocation6 + $0x48] sm:$0xff] %v1712_v45  ;;  %v1713_v40 = vadd.f32 %v1688_v21, %v1029_v50  ;;  %v1031_v2 = vadd.f32 %v1030_v3, %v752_v44  ;;  %v1084_v4 = vadd.f32 %v1083_v12, %v805_v61 }
 0x137   : > { %v1715_v41 = vadd.f32 %v1696_v54, %v1082_v5  ;;  %v1032_v7 = vpop.f32.mrf.mxu0  ;;  %v1085_v52 = vpop.f32.mrf.mxu1 }
 0x138   : > { %1729 = vst [vmem:[#allocation6 + $0x40] sm:$0xff] %v1713_v40  ;;  %v1714_v57 = vadd.f32 %v1692_v49, %v1031_v2  ;;  %v1716_v0 = vadd.f32 %v1700_v48, %v1084_v4  ;;  %v1033_v38 = vadd.f32 %v1032_v7, %v754_v60  ;;  %v1086_v1 = vadd.f32 %v1085_v52, %v807_v47 }
 0x139   : > { %1731 = vst [vmem:[#allocation6 + $0x10] sm:$0xff] %v1715_v41  ;;  %v1034_v56 = vpop.f32.mrf.mxu0  ;;  %v1087_v37 = vpop.f32.mrf.mxu1  ;;  %v5571_v40 = vsub.s32 0, %v5058_v6  ;;  %v5572_v2 = vsub.s32 2, %v5058_v6 }
 0x13a   : > { %1730 = vst [vmem:[#allocation6 + $0x20] sm:$0xff] %v1714_v57  ;;  %1732 = vst [vmem:[#allocation6 + $0x38] sm:$0xff] %v1716_v0  ;;  %v1717_v36 = vadd.f32 %v1688_v21, %v1033_v38  ;;  %v1719_v62 = vadd.f32 %v1696_v54, %v1086_v1  ;;  %v1035_v63 = vadd.f32 %v1034_v56, %v756_v55  ;;  %v5573_v38 = vsub.s32 1, %v5058_v6 }
 0x13b   : > { %v1088_v8 = vadd.f32 %v1087_v37, %v809_v59  ;;  %v5574_v56 = vsub.s32 3, %v5058_v6 }
 0x13c   : > { %1733 = vst [vmem:[#allocation6 + $0x60] sm:$0xff] %v1717_v36  ;;  %1735 = vst [vmem:[#allocation6 + $0x78] sm:$0xff] %v1719_v62  ;;  %v1718_v44 = vadd.f32 %v1692_v49, %v1035_v63 }
 0x13d   : > { %v1720_v61 = vadd.f32 %v1700_v48, %v1088_v8  ;;  %v3657_v48 = vld [vmem:[%s5405_s6 + $0x4] sm:$0xf] }
 0x13e   : > { %1734 = vst [vmem:[#allocation6 + $0x70] sm:$0xff] %v1718_v44  ;;  %v1743_v41 = vrot.slane %v3657_v48, %v5571_v40  ;;  %v1751_v4 = vrot.slane %v3657_v48, %v5572_v2  ;;  %v1747_v1 = vrot.slane %v3657_v48, %v5573_v38  ;;  %v1755_v37 = vrot.slane %v3657_v48, %v5574_v56 }
 0x13f   : > { %1736 = vst [vmem:[#allocation6 + $0x28] sm:$0xff] %v1720_v61 }
 0x14b   : > { %v1386_v9 = vpop.f32.mrf.mxu1  ;;  %v1333_v58 = vpop.f32.mrf.mxu0 }
 0x14d   : > { %v1388_v51 = vpop.f32.mrf.mxu1  ;;  %v1335_v46 = vpop.f32.mrf.mxu0 }
 0x14f   : > { %v1390_v60 = vpop.f32.mrf.mxu1  ;;  %v1337_v47 = vpop.f32.mrf.mxu0 }
 0x151   : > { %v1392_v45 = vpop.f32.mrf.mxu1  ;;  %v1339_v50 = vpop.f32.mrf.mxu0 }
 0x153   : > { %v1396_v5 = vpop.f32.mrf.mxu1  ;;  %v1343_v3 = vpop.f32.mrf.mxu0 }
 0x155   : > { %v1398_v21 = vpop.f32.mrf.mxu1  ;;  %v1345_v54 = vpop.f32.mrf.mxu0 }
 0x157   : > { %v1400_v55 = vpop.f32.mrf.mxu1  ;;  %v1347_v59 = vpop.f32.mrf.mxu0 }
 0x159   : > { %v5083_v12 = vpop.f32.mrf.mxu1  ;;  %v1349_v49 = vpop.f32.mrf.mxu0 }
 0x16b   : > { %v1611_v7 = vpop.f32.mrf.mxu0  ;;  %v1664_v52 = vpop.f32.mrf.mxu1 }
 0x16c   : > { %v1612_v57 = vadd.f32 %v1611_v7, %v1333_v58  ;;  %v1665_v0 = vadd.f32 %v1664_v52, %v1386_v9 }
 0x16d   : > { %v1613_v36 = vpop.f32.mrf.mxu0  ;;  %v1666_v62 = vpop.f32.mrf.mxu1 }
 0x16e   : > { %v1760_v63 = vadd.f32 %v1743_v41, %v1612_v57  ;;  %v1762_v8 = vadd.f32 %v1751_v4, %v1665_v0  ;;  %v1614_v44 = vadd.f32 %v1613_v36, %v1335_v46  ;;  %v1667_v61 = vadd.f32 %v1666_v62, %v1388_v51 }
 0x16f   : > { %v1615_v40 = vpop.f32.mrf.mxu0  ;;  %v1668_v35 = vpop.f32.mrf.mxu1 }
 0x170   : > { %1776 = vst [vmem:[#allocation7 + $0x28] sm:$0xff] %v1760_v63  ;;  %1778 = vst [vmem:[#allocation7 + $0x10] sm:$0xff] %v1762_v8  ;;  %v1761_v2 = vadd.f32 %v1747_v1, %v1614_v44  ;;  %v1763_v34 = vadd.f32 %v1755_v37, %v1667_v61  ;;  %v1616_v58 = vadd.f32 %v1615_v40, %v1337_v47 }
 0x171   : > { %v1669_v9 = vadd.f32 %v1668_v35, %v1390_v60  ;;  %v1617_v7 = vpop.f32.mrf.mxu0  ;;  %v1670_v52 = vpop.f32.mrf.mxu1 }
 0x172   : > { %1777 = vst [vmem:[#allocation7 + $0x68] sm:$0xff] %v1761_v2  ;;  %1779 = vst [vmem:[#allocation7 + $0x40] sm:$0xff] %v1763_v34  ;;  %v1764_v6 = vadd.f32 %v1743_v41, %v1616_v58  ;;  %v1618_v38 = vadd.f32 %v1617_v7, %v1339_v50  ;;  %v1671_v56 = vadd.f32 %v1670_v52, %v1392_v45 }
 0x173   : > { %v1766_v48 = vadd.f32 %v1751_v4, %v1669_v9  ;;  %v1621_v57 = vpop.f32.mrf.mxu0  ;;  %v1674_v0 = vpop.f32.mrf.mxu1 }
 0x174   : > { %1780 = vst [vmem:[#allocation7 + $0x48] sm:$0xff] %v1764_v6  ;;  %v1765_v51 = vadd.f32 %v1747_v1, %v1618_v38  ;;  %v1767_v46 = vadd.f32 %v1755_v37, %v1671_v56  ;;  %v1622_v36 = vadd.f32 %v1621_v57, %v1343_v3  ;;  %v1675_v62 = vadd.f32 %v1674_v0, %v1396_v5 }
 0x175   : > { %1782 = vst [vmem:[#allocation7 + $0x70] sm:$0xff] %v1766_v48  ;;  %v1623_v63 = vpop.f32.mrf.mxu0  ;;  %v1676_v8 = vpop.f32.mrf.mxu1 }
 0x176   : > { %1781 = vst [vmem:[#allocation7 + $0x30] sm:$0xff] %v1765_v51  ;;  %1783 = vst [vmem:[#allocation7 + $0x38] sm:$0xff] %v1767_v46  ;;  %v1768_v35 = vadd.f32 %v1743_v41, %v1622_v36  ;;  %v1770_v60 = vadd.f32 %v1751_v4, %v1675_v62  ;;  %v1624_v47 = vadd.f32 %v1623_v63, %v1345_v54 }
 0x177   : > { %v1677_v34 = vadd.f32 %v1676_v8, %v1398_v21  ;;  %v1625_v44 = vpop.f32.mrf.mxu0  ;;  %v1678_v61 = vpop.f32.mrf.mxu1 }
 0x178   : > { %1784 = vst [vmem:[#allocation7 + $0x20] sm:$0xff] %v1768_v35  ;;  %1786 = vst [vmem:[#allocation7 + $0x18] sm:$0xff] %v1770_v60  ;;  %v1769_v45 = vadd.f32 %v1747_v1, %v1624_v47  ;;  %v1626_v40 = vadd.f32 %v1625_v44, %v1347_v59  ;;  %v1679_v2 = vadd.f32 %v1678_v61, %v1400_v55  ;;  %v1858_v47 = vld [vmem:[#allocation3] sm:$0xff] }
 0x179   : > { %v1771_v50 = vadd.f32 %v1755_v37, %v1677_v34  ;;  %v1627_v58 = vpop.f32.mrf.mxu0  ;;  %v1680_v9 = vpop.f32.mrf.mxu1 }
 0x17a   : > { %1785 = vst [vmem:[#allocation7 + $0x78] sm:$0xff] %v1769_v45  ;;  %v1772_v5 = vadd.f32 %v1743_v41, %v1626_v40  ;;  %v1774_v3 = vadd.f32 %v1751_v4, %v1679_v2  ;;  %v1628_v7 = vadd.f32 %v1627_v58, %v1349_v49  ;;  %v1681_v52 = vadd.f32 %v1680_v9, %v5083_v12 }
 0x17b   : > { %1787 = vst [vmem:[#allocation7 + $0x58] sm:$0xff] %v1771_v50 }
 0x17c   : > { %v1773_v6 = vadd.f32 %v1747_v1, %v1628_v7  ;;  %v1775_v54 = vadd.f32 %v1755_v37, %v1681_v52 }
 0x18b   : > { %v2060_v21 = vpop.f32.mrf.mxu0  ;;  %v2101_v48 = vpop.f32.mrf.mxu1 }
 0x18c   : > { %v2108_v38 = vadd.f32 %v2060_v21, %v5075_v43  ;;  %v2110_v37 = vadd.f32 %v2101_v48, %v5077_v42 }
 0x18d   : > { %v2062_v56 = vpop.f32.mrf.mxu0  ;;  %v2103_v57 = vpop.f32.mrf.mxu1 }
 0x18e   : > { %v3690_v0 = vmul.f32 -1.442695, %v2108_v38  ;;  %v2109_v55 = vadd.f32 %v2062_v56, %v5079_v39  ;;  %v2111_v12 = vadd.f32 %v2103_v57, %v5081_v53 }
 0x18f   : > { %v2064_v59 = vpop.f32.mrf.mxu0  ;;  %v2105_v51 = vpop.f32.mrf.mxu1 }
 0x190   : > { %4162 = vpow2.f32 %v3690_v0  ;;  %v3691_v46 = vmul.f32 -1.442695, %v2109_v55  ;;  %v3692_v49 = vmul.f32 -1.442695, %v2111_v12 }
 0x191   : > { %v2065_v41 = vpop.f32.mrf.mxu0  ;;  %v2106_v4 = vpop.f32.mrf.mxu1 }
 0x192   : > { %4164 = vpow2.f32 %v3691_v46 }
 0x193   : > { %4166 = vpow2.f32 %v3692_v49  ;;  %v1860_v49 = vld [vmem:[#allocation5] sm:$0xff] }
 0x19d   : > { %v4163_v1 = vpop.eup %4162 }
 0x19e   : > { %v2115_v36 = vadd.f32 1.0, %v4163_v1 }
 0x19f   : > { %v4165_v43 = vpop.eup %4164 }
 0x1a0   : > { %4168 = vrcp.f32 %v2115_v36  ;;  %v2121_v62 = vadd.f32 1.0, %v4165_v43  ;;  %v4167_v8 = vpop.eup %4166 }
 0x1a1   : > { %4170 = vtanh.f32 %v2110_v37  ;;  %v2128_v42 = vadd.f32 1.0, %v4167_v8 }
 0x1a2   : > { %4172 = vrcp.f32 %v2121_v62 }
 0x1ab   : > { %v2335_v39 = vpop.f32.mrf.mxu0  ;;  %v2376_v63 = vpop.f32.mrf.mxu1 }
 0x1ac   : > { %v2383_v35 = vadd.f32 %v2335_v39, %v1772_v5  ;;  %v2385_v38 = vadd.f32 %v2376_v63, %v1774_v3 }
 0x1ad   : > { %v4169_v60 = vpop.eup %4168  ;;  %v2337_v34 = vpop.f32.mrf.mxu0 }
 0x1ae   : > { %v2378_v44 = vpop.f32.mrf.mxu1  ;;  %v4171_v53 = vpop.eup %4170  ;;  %v3725_v61 = vmul.f32 -1.442695, %v2383_v35  ;;  %v2384_v45 = vadd.f32 %v2337_v34, %v1773_v6 }
 0x1af   : > { %v4173_v50 = vpop.eup %4172  ;;  %v2339_v40 = vpop.f32.mrf.mxu0  ;;  %v2132_v58 = vmul.f32 %v4171_v53, %v4169_v60  ;;  %v2386_v5 = vadd.f32 %v2378_v44, %v1775_v54 }
 0x1b0   : > { %v2380_v2 = vpop.f32.mrf.mxu1  ;;  %v2131_v9 = vmul.f32 %v4173_v50, %v1858_v47  ;;  %4174 = vpow2.f32 %v3725_v61  ;;  %v3726_v7 = vmul.f32 -1.442695, %v2384_v45 }
 0x1b1   : > { %v2340_v52 = vpop.f32.mrf.mxu0  ;;  %v3727_v56 = vmul.f32 -1.442695, %v2386_v5 }
 0x1b2   : > { %v2381_v21 = vpop.f32.mrf.mxu1  ;;  %v5101_v48 = vadd.f32 %v2132_v58, %v2131_v9  ;;  %4176 = vpow2.f32 %v3726_v7 }
 0x1b3   : > { %4178 = vrcp.f32 %v2128_v42 }
 0x1b4   : > { %4180 = vtanh.f32 %v5101_v48 }
 0x1b5   : > { %4182 = vtanh.f32 %v2385_v38 }
 0x1b6   : > { %4184 = vpow2.f32 %v3727_v56 }
 0x1bd   : > { %v4175_v6 = vpop.eup %4174 }
 0x1be   : > { %v2390_v57 = vadd.f32 1.0, %v4175_v6 }
 0x1bf   : > { %v4177_v0 = vpop.eup %4176 }
 0x1c0   : > { %v4179_v55 = vpop.eup %4178  ;;  %4186 = vrcp.f32 %v2390_v57  ;;  %v2396_v59 = vadd.f32 1.0, %v4177_v0 }
 0x1c1   : > { %v4181_v51 = vpop.eup %4180 }
 0x1c2   : > { %v2135_v46 = vmul.f32 %v4181_v51, %v4179_v55  ;;  %4188 = vrcp.f32 %v2396_v59  ;;  %v4183_v41 = vpop.eup %4182 }
 0x1c3   : > { %v4185_v4 = vpop.eup %4184 }
 0x1c4   : > { %v2403_v54 = vadd.f32 1.0, %v4185_v4 }
 0x1c6   : > { %4190 = vrcp.f32 %v2403_v54 }
 0x1cd   : > { %v4187_v12 = vpop.eup %4186 }
 0x1ce   : > { %v2407_v1 = vmul.f32 %v4187_v12, %v4183_v41 }
 0x1cf   : > { %v4189_v37 = vpop.eup %4188 }
 0x1d0   : > { %v2406_v3 = vmul.f32 %v4189_v37, %v1860_v49 }
 0x1d2   : > { %v5104_v36 = vadd.f32 %v2407_v1, %v2406_v3 }
 0x1d3   : > { %v4191_v43 = vpop.eup %4190 }
 0x1d4   : > { %4192 = vtanh.f32 %v5104_v36 }
 0x1de   : > { %2413 = sbr.rel (%p5575_p3) target bundleno = 485 (0x1e5), region = 68 }
 0x1e1   : > { %v4193_v62 = vpop.eup %4192 }
 0x1e2   : > { %v5107_v39 = vmul.f32 %v4193_v62, %v4191_v43 }
 0x1e4   : > { %2414 = vst [vmem:[#allocation8] sm:$0xff] %v5107_v39 }
 0x1e5 PF: > { %2420 = vmatprep.subr.bf16.mxu0 %v4858_v10  ;;  %2461 = vmatprep.subr.bf16.mxu1 %v4860_v11  ;;  %v5576_v63 = vmov 0   ;;  %v5577_v8 = vld [vmem:[#allocation20_spill] sm:$0xff]  ;;  %v5578_v35 = vld [vmem:[#allocation21_spill] sm:$0xff]  ;;  %v5579_v60 = vld [vmem:[#allocation22_spill] sm:$0xff]  ;;  %v2419_v45 = vpack.c.bf16 %v2135_v46, %v2135_v46  ;;  %p3747_p4 = scmp.ne.s32.totalorder %s4407_s10, 1 }
 0x1e6   : > { %2421 = vmatpush1.bf16.msra.mxu0 %v4863_v13  ;;  %2462 = vmatpush1.bf16.msra.mxu1 %v4865_v14  ;;  %v5580_v47 = vld [vmem:[#allocation23_spill] sm:$0xff]  ;;  %v5581_v34 = vld [vmem:[#allocation24_spill] sm:$0xff]  ;;  %v5582_v44 = vld [vmem:[#allocation25_spill] sm:$0xff] }
 0x1e7   : > { %2422 = vmatprep.subr.bf16.mxu0 %v4869_v15  ;;  %2463 = vmatprep.subr.bf16.mxu1 %v4871_v16  ;;  %v5583_v53 = vld [vmem:[#allocation26_spill] sm:$0xff]  ;;  %v5584_v61 = vld [vmem:[#allocation27_spill] sm:$0xff]  ;;  %v5585_v50 = vld [vmem:[#allocation28_spill] sm:$0xff] }
 0x1e8   : > { %2452 = vmatprep.mubr.bf16.mxu0 %v5576_v63  ;;  %2493 = vmatprep.mubr.bf16.mxu1 %v5576_v63  ;;  %v5586_v42 = vld [vmem:[#allocation29_spill] sm:$0xff]  ;;  %v5587_v40 = vld [vmem:[#allocation30_spill] sm:$0xff]  ;;  %v5588_v2 = vld [vmem:[#allocation31_spill] sm:$0xff] }
 0x1e9   : > { %v5589_v58 = vld [vmem:[#allocation32_spill] sm:$0xff]  ;;  %v5590_v9 = vld [vmem:[#allocation33_spill] sm:$0xff]  ;;  %v5591_v7 = vld [vmem:[#allocation34_spill] sm:$0xff] }
 0x1ea   : > { %2423 = vmatpush1.bf16.msra.mxu0 %v4873_v17  ;;  %2464 = vmatpush1.bf16.msra.mxu1 %v4877_v18  ;;  %v5592_v52 = vld [vmem:[#allocation35_spill] sm:$0xff]  ;;  %v5593_v21 = vld [vmem:[#allocation36_spill] sm:$0xff]  ;;  %v5594_v5 = vld [vmem:[#allocation37_spill] sm:$0xff] }
 0x1eb   : > { %2424 = vmatprep.subr.bf16.mxu0 %v4881_v19  ;;  %2465 = vmatprep.subr.bf16.mxu1 %v4883_v20  ;;  %v5595_v38 = vld [vmem:[#allocation38_spill] sm:$0xff]  ;;  %v5596_v56 = vld [vmem:[#allocation39_spill] sm:$0xff]  ;;  %v5597_v6 = vld [vmem:[#allocation40_spill] sm:$0xff] }
 0x1ec   : > { %v5598_v57 = vld [vmem:[#allocation41_spill] sm:$0xff]  ;;  %v5599_v0 = vld [vmem:[#allocation42_spill] sm:$0xff]  ;;  %v5600_v55 = vld [vmem:[#allocation43_spill] sm:$0xff] }
 0x1ed   : > { %v5601_v59 = vld [vmem:[#allocation44_spill] sm:$0xff]  ;;  %v5602_v51 = vld [vmem:[#allocation45_spill] sm:$0xff]  ;;  %v5603_v46 = vld [vmem:[#allocation46_spill] sm:$0xff] }
 0x1ee   : > { %2425 = vmatpush1.bf16.msra.mxu0 %v4890_v22  ;;  %2466 = vmatpush1.bf16.msra.mxu1 %v4892_v23  ;;  %v5604_v41 = vld [vmem:[#allocation47_spill] sm:$0xff]  ;;  %v5605_v4 = vld [vmem:[#allocation48_spill] sm:$0xff]  ;;  %v5606_v12 = vld [vmem:[#allocation49_spill] sm:$0xff] }
 0x1ef   : > { %2426 = vmatprep.subr.bf16.mxu0 %v4896_v24  ;;  %2467 = vmatprep.subr.bf16.mxu1 %v4898_v25  ;;  %v5607_v49 = vld [vmem:[#allocation50_spill] sm:$0xff]  ;;  %v5608_v1 = vld [vmem:[#allocation51_spill] sm:$0xff]  ;;  %v5609_v37 = vld [vmem:[#allocation52_spill] sm:$0xff] }
 0x1f0   : > { %v5610_v54 = vld [vmem:[#allocation53_spill] sm:$0xff]  ;;  %v5611_v3 = vld [vmem:[#allocation54_spill] sm:$0xff]  ;;  %v5612_v43 = vld [vmem:[#allocation55_spill] sm:$0xff] }
 0x1f1   : > { %v5613_v62 = vld [vmem:[#allocation56_spill] sm:$0xff] }
 0x1f2   : > { %2427 = vmatpush1.bf16.msra.mxu0 %v4902_v26  ;;  %2468 = vmatpush1.bf16.msra.mxu1 %v4904_v27 }
 0x1f3   : > { %2428 = vmatprep.subr.bf16.mxu0 %v4908_v28  ;;  %2469 = vmatprep.subr.bf16.mxu1 %v4910_v29 }
 0x1f6   : > { %2429 = vmatpush1.bf16.msra.mxu0 %v4916_v30  ;;  %2470 = vmatpush1.bf16.msra.mxu1 %v4918_v31 }
 0x1f7   : > { %2430 = vmatprep.subr.bf16.mxu0 %v4922_v32  ;;  %2471 = vmatprep.subr.bf16.mxu1 %v4924_v33 }
 0x1fa   : > { %2431 = vmatpush1.bf16.msra.mxu0 %v5577_v8  ;;  %2472 = vmatpush1.bf16.msra.mxu1 %v5578_v35 }
 0x1fb   : > { %2432 = vmatprep.subr.bf16.mxu0 %v5579_v60  ;;  %2473 = vmatprep.subr.bf16.mxu1 %v5580_v47 }
 0x1fe   : > { %2433 = vmatpush1.bf16.msra.mxu0 %v5581_v34  ;;  %2474 = vmatpush1.bf16.msra.mxu1 %v5582_v44 }
 0x1ff   : > { %2434 = vmatprep.subr.bf16.mxu0 %v5583_v53  ;;  %2475 = vmatprep.subr.bf16.mxu1 %v5584_v61 }
 0x202   : > { %2435 = vmatpush1.bf16.msra.mxu0 %v5585_v50  ;;  %2476 = vmatpush1.bf16.msra.mxu1 %v5586_v42 }
 0x203   : > { %2535 = vmatprep.subr.bf16.mxu0 %v5587_v40  ;;  %2576 = vmatprep.subr.bf16.mxu1 %v5588_v2 }
 0x205   : > { %2453 = vmatmul.mubr.bf16.vlgmr.msra.gmra.mxu0 %v2419_v45  ;;  %2494 = vmatmul.mubr.bf16.vlgmr.msra.gmra.mxu1 %v2419_v45  ;;  %v5614_v45 = vld [vmem:[#allocation57_spill] sm:$0xff] }
 0x206   : > { %2536 = vmatpush1.bf16.msra.mxu0 %v5589_v58  ;;  %2577 = vmatpush1.bf16.msra.mxu1 %v5590_v9 }
 0x207   : > { %2537 = vmatprep.subr.bf16.mxu0 %v5591_v7  ;;  %2578 = vmatprep.subr.bf16.mxu1 %v5592_v52 }
 0x208   : > { %2567 = vmatprep.mubr.bf16.mxu0 %v5576_v63  ;;  %2608 = vmatprep.mubr.bf16.mxu1 %v5576_v63 }
 0x20a   : > { %2538 = vmatpush1.bf16.msra.mxu0 %v5593_v21  ;;  %2579 = vmatpush1.bf16.msra.mxu1 %v5594_v5 }
 0x20b   : > { %2539 = vmatprep.subr.bf16.mxu0 %v5595_v38  ;;  %2580 = vmatprep.subr.bf16.mxu1 %v5596_v56 }
 0x20e   : > { %2540 = vmatpush1.bf16.msra.mxu0 %v5597_v6  ;;  %2581 = vmatpush1.bf16.msra.mxu1 %v5598_v57 }
 0x20f   : > { %2541 = vmatprep.subr.bf16.mxu0 %v5599_v0  ;;  %2582 = vmatprep.subr.bf16.mxu1 %v5600_v55 }
 0x212   : > { %2542 = vmatpush1.bf16.msra.mxu0 %v5601_v59  ;;  %2583 = vmatpush1.bf16.msra.mxu1 %v5602_v51 }
 0x213   : > { %2543 = vmatprep.subr.bf16.mxu0 %v5603_v46  ;;  %2584 = vmatprep.subr.bf16.mxu1 %v5604_v41  ;;  %v5615_v41 = vld [vmem:[#allocation58_spill] sm:$0xff] }
 0x216   : > { %2544 = vmatpush1.bf16.msra.mxu0 %v5605_v4  ;;  %2585 = vmatpush1.bf16.msra.mxu1 %v5606_v12  ;;  %v5616_v4 = vld [vmem:[#allocation59_spill] sm:$0xff] }
 0x217   : > { %2545 = vmatprep.subr.bf16.mxu0 %v5607_v49  ;;  %2586 = vmatprep.subr.bf16.mxu1 %v5608_v1  ;;  %v2534_v49 = vpack.c.bf16 %v5107_v39, %v5107_v39  ;;  %v5617_v1 = vld [vmem:[#allocation60_spill] sm:$0xff]  ;;  %v2415_v39 = vld [vmem:[#allocation6 + $0x50] sm:$0xff] }
 0x21a   : > { %2546 = vmatpush1.bf16.msra.mxu0 %v5609_v37  ;;  %2587 = vmatpush1.bf16.msra.mxu1 %v5610_v54  ;;  %v5618_v37 = vld [vmem:[#allocation61_spill] sm:$0xff] }
 0x21b   : > { %2547 = vmatprep.subr.bf16.mxu0 %v5611_v3  ;;  %2588 = vmatprep.subr.bf16.mxu1 %v5612_v43 }
 0x21e   : > { %2548 = vmatpush1.bf16.msra.mxu0 %v5613_v62  ;;  %2589 = vmatpush1.bf16.msra.mxu1 %v5614_v45 }
 0x21f   : > { %2549 = vmatprep.subr.bf16.mxu0 %v5615_v41  ;;  %2590 = vmatprep.subr.bf16.mxu1 %v5616_v4 }
 0x222   : > { %2550 = vmatpush1.bf16.msra.mxu0 %v5617_v1  ;;  %2591 = vmatpush1.bf16.msra.mxu1 %v5618_v37 }
 0x223   : > { %2650 = vmatprep.subr.bf16.mxu0 %v4858_v10  ;;  %2691 = vmatprep.subr.bf16.mxu1 %v4860_v11 }
 0x225   : > { %2568 = vmatmul.mubr.bf16.vlgmr.msra.gmra.mxu0 %v2534_v49  ;;  %2609 = vmatmul.mubr.bf16.vlgmr.msra.gmra.mxu1 %v2534_v49 }
 0x226   : > { %2651 = vmatpush1.bf16.msra.mxu0 %v4863_v13  ;;  %2692 = vmatpush1.bf16.msra.mxu1 %v4865_v14 }
 0x227   : > { %2652 = vmatprep.subr.bf16.mxu0 %v4869_v15  ;;  %2693 = vmatprep.subr.bf16.mxu1 %v4871_v16 }
 0x228   : > { %2682 = vmatprep.mubr.bf16.mxu0 %v5576_v63  ;;  %2723 = vmatprep.mubr.bf16.mxu1 %v5576_v63 }
 0x22a   : > { %2653 = vmatpush1.bf16.msra.mxu0 %v4873_v17  ;;  %2694 = vmatpush1.bf16.msra.mxu1 %v4877_v18 }
 0x22b   : > { %2654 = vmatprep.subr.bf16.mxu0 %v4881_v19  ;;  %2695 = vmatprep.subr.bf16.mxu1 %v4883_v20 }
 0x22e   : > { %2655 = vmatpush1.bf16.msra.mxu0 %v4890_v22  ;;  %2696 = vmatpush1.bf16.msra.mxu1 %v4892_v23 }
 0x22f   : > { %2656 = vmatprep.subr.bf16.mxu0 %v4896_v24  ;;  %2697 = vmatprep.subr.bf16.mxu1 %v4898_v25 }
 0x232   : > { %2657 = vmatpush1.bf16.msra.mxu0 %v4902_v26  ;;  %2698 = vmatpush1.bf16.msra.mxu1 %v4904_v27 }
 0x233   : > { %2658 = vmatprep.subr.bf16.mxu0 %v4908_v28  ;;  %2699 = vmatprep.subr.bf16.mxu1 %v4910_v29 }
 0x236   : > { %2659 = vmatpush1.bf16.msra.mxu0 %v4916_v30  ;;  %2700 = vmatpush1.bf16.msra.mxu1 %v4918_v31  ;;  %v2417_v30 = vld [vmem:[#allocation6 + $0x8] sm:$0xff] }
 0x237   : > { %2660 = vmatprep.subr.bf16.mxu0 %v4922_v32  ;;  %2701 = vmatprep.subr.bf16.mxu1 %v4924_v33 }
 0x23a   : > { %2661 = vmatpush1.bf16.msra.mxu0 %v5577_v8  ;;  %2702 = vmatpush1.bf16.msra.mxu1 %v5578_v35 }
 0x23b   : > { %2662 = vmatprep.subr.bf16.mxu0 %v5579_v60  ;;  %2703 = vmatprep.subr.bf16.mxu1 %v5580_v47  ;;  %v2416_v60 = vld [vmem:[#allocation6 + $0x68] sm:$0xff] }
 0x23e   : > { %2663 = vmatpush1.bf16.msra.mxu0 %v5581_v34  ;;  %2704 = vmatpush1.bf16.msra.mxu1 %v5582_v44 }
 0x23f   : > { %2664 = vmatprep.subr.bf16.mxu0 %v5583_v53  ;;  %2705 = vmatprep.subr.bf16.mxu1 %v5584_v61 }
 0x242   : > { %2665 = vmatpush1.bf16.msra.mxu0 %v5585_v50  ;;  %2706 = vmatpush1.bf16.msra.mxu1 %v5586_v42  ;;  %v2418_v42 = vld [vmem:[#allocation6 + $0x48] sm:$0xff] }
 0x243   : > { %2765 = vmatprep.subr.bf16.mxu0 %v5587_v40  ;;  %2806 = vmatprep.subr.bf16.mxu1 %v5588_v2 }
 0x2c5   : > { %v2454_v49 = vpop.f32.mrf.mxu0  ;;  %v2495_v47 = vpop.f32.mrf.mxu1 }
 0x2c6   : > { %v2502_v35 = vadd.f32 %v2454_v49, %v2415_v39  ;;  %v2504_v29 = vadd.f32 %v2495_v47, %v2417_v30 }
 0x2c7   : > { %v2456_v34 = vpop.f32.mrf.mxu0  ;;  %v2497_v8 = vpop.f32.mrf.mxu1 }
 0x2c8   : > { %v3729_v44 = vmul.f32 -1.442695, %v2502_v35  ;;  %v2503_v33 = vadd.f32 %v2456_v34, %v2416_v60  ;;  %v2505_v40 = vadd.f32 %v2497_v8, %v2418_v42  ;;  %v2530_v60 = vld [vmem:[#allocation7 + $0x20] sm:$0xff] }
 0x2c9   : > { %v2458_v53 = vpop.f32.mrf.mxu0  ;;  %v2499_v32 = vpop.f32.mrf.mxu1 }
 0x2ca   : > { %4194 = vpow2.f32 %v3729_v44  ;;  %v3730_v61 = vmul.f32 -1.442695, %v2503_v33  ;;  %v3731_v2 = vmul.f32 -1.442695, %v2505_v40  ;;  %v2531_v44 = vld [vmem:[#allocation7 + $0x78] sm:$0xff] }
 0x2cb   : > { %v2459_v50 = vpop.f32.mrf.mxu0  ;;  %v2500_v31 = vpop.f32.mrf.mxu1 }
 0x2cc   : > { %4196 = vpow2.f32 %v3730_v61 }
 0x2cd   : > { %4198 = vpow2.f32 %v3731_v2 }
 0x2ce   : > { %4200 = vtanh.f32 %v2504_v29 }
 0x2d7   : > { %v4195_v28 = vpop.eup %4194 }
 0x2d8   : > { %v2509_v27 = vadd.f32 1.0, %v4195_v28 }
 0x2d9   : > { %v4197_v39 = vpop.eup %4196 }
 0x2da   : > { %4202 = vrcp.f32 %v2509_v27  ;;  %v2515_v35 = vadd.f32 1.0, %v4197_v39  ;;  %v4199_v32 = vpop.eup %4198 }
 0x2db   : > { %v4201_v34 = vpop.eup %4200  ;;  %v2522_v8 = vadd.f32 1.0, %v4199_v32  ;;  %v2532_v32 = vld [vmem:[#allocation7 + $0x18] sm:$0xff] }
 0x2dc   : > { %4204 = vrcp.f32 %v2515_v35 }
 0x2e5   : > { %v2569_v33 = vpop.f32.mrf.mxu0  ;;  %v2610_v31 = vpop.f32.mrf.mxu1 }
 0x2e6   : > { %v2617_v53 = vadd.f32 %v2569_v33, %v2530_v60  ;;  %v2533_v60 = vld [vmem:[#allocation7 + $0x58] sm:$0xff]  ;;  %v2619_v33 = vadd.f32 %v2610_v31, %v2532_v32  ;;  %v5622_v32 = vld [vmem:[#allocation51_spill] sm:$0xff] }
 0x2e7   : > { %v4203_v61 = vpop.eup %4202  ;;  %v2571_v50 = vpop.f32.mrf.mxu0 }
 0x2e8   : > { %v2612_v42 = vpop.f32.mrf.mxu1  ;;  %v2526_v30 = vmul.f32 %v4203_v61, %v4201_v34  ;;  %v3732_v47 = vmul.f32 -1.442695, %v2617_v53  ;;  %v2618_v40 = vadd.f32 %v2571_v50, %v2531_v44 }
 0x2e9   : > { %v4205_v28 = vpop.eup %4204  ;;  %v2573_v29 = vpop.f32.mrf.mxu0  ;;  %v2620_v34 = vadd.f32 %v2612_v42, %v2533_v60  ;;  %v5620_v60 = vld [vmem:[#allocation48_spill] sm:$0xff] }
 0x2ea   : > { %v2614_v2 = vpop.f32.mrf.mxu1  ;;  %v2525_v27 = vmul.f32 %v4205_v28, %v5101_v48  ;;  %4206 = vpow2.f32 %v3732_v47  ;;  %v3733_v49 = vmul.f32 -1.442695, %v2618_v40 }
 0x2eb   : > { %4208 = vrcp.f32 %v2522_v8  ;;  %v2574_v39 = vpop.f32.mrf.mxu0  ;;  %v3734_v44 = vmul.f32 -1.442695, %v2620_v34  ;;  %v5623_v34 = vld [vmem:[#allocation52_spill] sm:$0xff] }
 0x2ec   : > { %v2615_v35 = vpop.f32.mrf.mxu1  ;;  %v5219_v26 = vadd.f32 %v2526_v30, %v2525_v27  ;;  %4210 = vpow2.f32 %v3733_v49 }
 0x2ed   : > { %v5619_v35 = vld [vmem:[#allocation47_spill] sm:$0xff] }
 0x2ee   : > { %4212 = vtanh.f32 %v5219_v26 }
 0x2ef   : > { %4214 = vtanh.f32 %v2619_v33 }
 0x2f0   : > { %4216 = vpow2.f32 %v3734_v44 }
 0x2f7   : > { %v4207_v53 = vpop.eup %4206 }
 0x2f8   : > { %v4209_v61 = vpop.eup %4208  ;;  %v2624_v50 = vadd.f32 1.0, %v4207_v53 }
 0x2f9   : > { %v4211_v48 = vpop.eup %4210 }
 0x2fa   : > { %4218 = vrcp.f32 %v2624_v50  ;;  %v2630_v8 = vadd.f32 1.0, %v4211_v48  ;;  %v5638_v50 = vld [vmem:[#allocation26_spill] sm:$0xff]  ;;  %v5639_v48 = vld [vmem:[#allocation27_spill] sm:$0xff] }
 0x2fb   : > { %v4213_v47 = vpop.eup %4212 }
 0x2fc   : > { %4220 = vrcp.f32 %v2630_v8  ;;  %v2529_v30 = vmul.f32 %v4213_v47, %v4209_v61  ;;  %v4215_v31 = vpop.eup %4214  ;;  %v5640_v8 = vld [vmem:[#allocation28_spill] sm:$0xff]  ;;  %v5641_v47 = vld [vmem:[#allocation29_spill] sm:$0xff] }
 0x2fd   : > { %v4217_v42 = vpop.eup %4216 }
 0x2fe   : > { %v2649_v40 = vpack.c.bf16 %v2529_v30, %v2529_v30  ;;  %v2637_v2 = vadd.f32 1.0, %v4217_v42  ;;  %v5642_v30 = vld [vmem:[#allocation30_spill] sm:$0xff] }
 0x300   : > { %2683 = vmatmul.mubr.bf16.vlgmr.msra.gmra.mxu0 %v2649_v40  ;;  %2724 = vmatmul.mubr.bf16.vlgmr.msra.gmra.mxu1 %v2649_v40  ;;  %4222 = vrcp.f32 %v2637_v2  ;;  %v5643_v40 = vld [vmem:[#allocation31_spill] sm:$0xff] }
 0x301   : > { %2766 = vmatpush1.bf16.msra.mxu0 %v5589_v58  ;;  %2807 = vmatpush1.bf16.msra.mxu1 %v5590_v9 }
 0x302   : > { %2767 = vmatprep.subr.bf16.mxu0 %v5591_v7  ;;  %2808 = vmatprep.subr.bf16.mxu1 %v5592_v52 }
 0x303   : > { %2797 = vmatprep.mubr.bf16.mxu0 %v5576_v63  ;;  %2838 = vmatprep.mubr.bf16.mxu1 %v5576_v63 }
 0x305   : > { %2768 = vmatpush1.bf16.msra.mxu0 %v5593_v21  ;;  %2809 = vmatpush1.bf16.msra.mxu1 %v5594_v5 }
 0x306   : > { %2769 = vmatprep.subr.bf16.mxu0 %v5595_v38  ;;  %2810 = vmatprep.subr.bf16.mxu1 %v5596_v56 }
 0x307   : > { %v4219_v28 = vpop.eup %4218 }
 0x308   : > { %v2641_v49 = vmul.f32 %v4219_v28, %v4215_v31  ;;  %v2645_v31 = vld [vmem:[#allocation6 + $0x40] sm:$0xff] }
 0x309   : > { %v4221_v29 = vpop.eup %4220  ;;  %2770 = vmatpush1.bf16.msra.mxu0 %v5597_v6  ;;  %2811 = vmatpush1.bf16.msra.mxu1 %v5598_v57 }
 0x30a   : > { %v2640_v27 = vmul.f32 %v4221_v29, %v5104_v36  ;;  %2771 = vmatprep.subr.bf16.mxu0 %v5599_v0  ;;  %2812 = vmatprep.subr.bf16.mxu1 %v5600_v55  ;;  %v5621_v36 = vld [vmem:[#allocation50_spill] sm:$0xff]  ;;  %v2646_v29 = vld [vmem:[#allocation6 + $0x20] sm:$0xff] }
 0x30c   : > { %v5237_v39 = vadd.f32 %v2641_v49, %v2640_v27 }
 0x30d   : > { %2772 = vmatpush1.bf16.msra.mxu0 %v5601_v59  ;;  %2813 = vmatpush1.bf16.msra.mxu1 %v5602_v51  ;;  %v4223_v33 = vpop.eup %4222 }
 0x30e   : > { %4224 = vtanh.f32 %v5237_v39  ;;  %2773 = vmatprep.subr.bf16.mxu0 %v5603_v46  ;;  %2814 = vmatprep.subr.bf16.mxu1 %v5619_v35 }
 0x311   : > { %2774 = vmatpush1.bf16.msra.mxu0 %v5620_v60  ;;  %2815 = vmatpush1.bf16.msra.mxu1 %v5606_v12 }
 0x312   : > { %2775 = vmatprep.subr.bf16.mxu0 %v5621_v36  ;;  %2816 = vmatprep.subr.bf16.mxu1 %v5622_v32 }
 0x315   : > { %2776 = vmatpush1.bf16.msra.mxu0 %v5623_v34  ;;  %2817 = vmatpush1.bf16.msra.mxu1 %v5610_v54 }
 0x316   : > { %2777 = vmatprep.subr.bf16.mxu0 %v5611_v3  ;;  %2818 = vmatprep.subr.bf16.mxu1 %v5612_v43 }
 0x319   : > { %2778 = vmatpush1.bf16.msra.mxu0 %v5613_v62  ;;  %2819 = vmatpush1.bf16.msra.mxu1 %v5614_v45 }
 0x31a   : > { %2779 = vmatprep.subr.bf16.mxu0 %v5615_v41  ;;  %2820 = vmatprep.subr.bf16.mxu1 %v5616_v4 }
 0x31b   : > { %v4225_v44 = vpop.eup %4224 }
 0x31c   : > { %v2644_v53 = vmul.f32 %v4225_v44, %v4223_v33 }
 0x31d   : > { %2780 = vmatpush1.bf16.msra.mxu0 %v5617_v1  ;;  %2821 = vmatpush1.bf16.msra.mxu1 %v5618_v37 }
 0x31e   : > { %v2764_v61 = vpack.c.bf16 %v2644_v53, %v2644_v53  ;;  %2880 = vmatprep.subr.bf16.mxu0 %v4858_v10  ;;  %2921 = vmatprep.subr.bf16.mxu1 %v4860_v11  ;;  %v5624_v10 = vld [vmem:[#allocation12_spill] sm:$0xff]  ;;  %v5625_v11 = vld [vmem:[#allocation13_spill] sm:$0xff] }
 0x320   : > { %2798 = vmatmul.mubr.bf16.vlgmr.msra.gmra.mxu0 %v2764_v61  ;;  %2839 = vmatmul.mubr.bf16.vlgmr.msra.gmra.mxu1 %v2764_v61 }
 0x321   : > { %2881 = vmatpush1.bf16.msra.mxu0 %v4863_v13  ;;  %2922 = vmatpush1.bf16.msra.mxu1 %v4865_v14  ;;  %v5626_v13 = vld [vmem:[#allocation14_spill] sm:$0xff]  ;;  %v5627_v14 = vld [vmem:[#allocation15_spill] sm:$0xff] }
 0x322   : > { %2882 = vmatprep.subr.bf16.mxu0 %v4869_v15  ;;  %2923 = vmatprep.subr.bf16.mxu1 %v4871_v16  ;;  %v5628_v15 = vld [vmem:[#allocation16_spill] sm:$0xff]  ;;  %v5629_v16 = vld [vmem:[#allocation17_spill] sm:$0xff] }
 0x323   : > { %2912 = vmatprep.mubr.bf16.mxu0 %v5576_v63  ;;  %2953 = vmatprep.mubr.bf16.mxu1 %v5576_v63 }
 0x325   : > { %2883 = vmatpush1.bf16.msra.mxu0 %v4873_v17  ;;  %2924 = vmatpush1.bf16.msra.mxu1 %v4877_v18  ;;  %v5630_v17 = vld [vmem:[#allocation18_spill] sm:$0xff]  ;;  %v5631_v18 = vld [vmem:[#allocation19_spill] sm:$0xff] }
 0x326   : > { %2884 = vmatprep.subr.bf16.mxu0 %v4881_v19  ;;  %2925 = vmatprep.subr.bf16.mxu1 %v4883_v20  ;;  %v5632_v19 = vld [vmem:[#allocation20_spill] sm:$0xff]  ;;  %v5633_v20 = vld [vmem:[#allocation21_spill] sm:$0xff] }
 0x329   : > { %2885 = vmatpush1.bf16.msra.mxu0 %v4890_v22  ;;  %2926 = vmatpush1.bf16.msra.mxu1 %v4892_v23  ;;  %v5634_v22 = vld [vmem:[#allocation22_spill] sm:$0xff]  ;;  %v5635_v23 = vld [vmem:[#allocation23_spill] sm:$0xff] }
 0x32a   : > { %2886 = vmatprep.subr.bf16.mxu0 %v4896_v24  ;;  %2927 = vmatprep.subr.bf16.mxu1 %v4898_v25  ;;  %v5636_v24 = vld [vmem:[#allocation24_spill] sm:$0xff]  ;;  %v5637_v25 = vld [vmem:[#allocation25_spill] sm:$0xff] }
 0x32d   : > { %2887 = vmatpush1.bf16.msra.mxu0 %v5624_v10  ;;  %2928 = vmatpush1.bf16.msra.mxu1 %v5625_v11 }
 0x32e   : > { %2888 = vmatprep.subr.bf16.mxu0 %v5626_v13  ;;  %2929 = vmatprep.subr.bf16.mxu1 %v5627_v14  ;;  %v2648_v14 = vld [vmem:[#allocation6 + $0x38] sm:$0xff] }
 0x331   : > { %2889 = vmatpush1.bf16.msra.mxu0 %v5628_v15  ;;  %2930 = vmatpush1.bf16.msra.mxu1 %v5629_v16  ;;  %v2647_v16 = vld [vmem:[#allocation6 + $0x10] sm:$0xff] }
 0x332   : > { %2890 = vmatprep.subr.bf16.mxu0 %v5630_v17  ;;  %2931 = vmatprep.subr.bf16.mxu1 %v5631_v18 }
 0x335   : > { %2891 = vmatpush1.bf16.msra.mxu0 %v5632_v19  ;;  %2932 = vmatpush1.bf16.msra.mxu1 %v5633_v20 }
 0x336   : > { %2892 = vmatprep.subr.bf16.mxu0 %v5634_v22  ;;  %2933 = vmatprep.subr.bf16.mxu1 %v5635_v23 }
 0x339   : > { %2893 = vmatpush1.bf16.msra.mxu0 %v5636_v24  ;;  %2934 = vmatpush1.bf16.msra.mxu1 %v5637_v25  ;;  %v2760_v24 = vld [vmem:[#allocation7 + $0x48] sm:$0xff] }
 0x33a   : > { %2894 = vmatprep.subr.bf16.mxu0 %v5638_v50  ;;  %2935 = vmatprep.subr.bf16.mxu1 %v5639_v48  ;;  %v2761_v48 = vld [vmem:[#allocation7 + $0x30] sm:$0xff] }
 0x33d   : > { %2895 = vmatpush1.bf16.msra.mxu0 %v5640_v8  ;;  %2936 = vmatpush1.bf16.msra.mxu1 %v5641_v47 }
 0x33e   : > { %2995 = vmatprep.subr.bf16.mxu0 %v5642_v30  ;;  %3036 = vmatprep.subr.bf16.mxu1 %v5643_v40 }
 0x3c0   : > { %v2684_v42 = vpop.f32.mrf.mxu0  ;;  %v2725_v28 = vpop.f32.mrf.mxu1 }
 0x3c1   : > { %v2732_v2 = vadd.f32 %v2684_v42, %v2645_v31  ;;  %v2734_v19 = vadd.f32 %v2725_v28, %v2647_v16  ;;  %v2762_v16 = vld [vmem:[#allocation7 + $0x70] sm:$0xff] }
 0x3c2   : > { %v2686_v27 = vpop.f32.mrf.mxu0  ;;  %v2727_v49 = vpop.f32.mrf.mxu1 }
 0x3c3   : > { %v3735_v33 = vmul.f32 -1.442695, %v2732_v2  ;;  %v2733_v44 = vadd.f32 %v2686_v27, %v2646_v29  ;;  %v2735_v15 = vadd.f32 %v2727_v49, %v2648_v14  ;;  %v2763_v14 = vld [vmem:[#allocation7 + $0x38] sm:$0xff] }
 0x3c4   : > { %v2688_v53 = vpop.f32.mrf.mxu0  ;;  %v2729_v61 = vpop.f32.mrf.mxu1 }
 0x3c5   : > { %4226 = vpow2.f32 %v3735_v33  ;;  %v3736_v10 = vmul.f32 -1.442695, %v2733_v44  ;;  %v3737_v17 = vmul.f32 -1.442695, %v2735_v15 }
 0x3c6   : > { %v2689_v11 = vpop.f32.mrf.mxu0  ;;  %v2730_v13 = vpop.f32.mrf.mxu1 }
 0x3c7   : > { %4228 = vpow2.f32 %v3736_v10 }
 0x3c8   : > { %4230 = vpow2.f32 %v3737_v17 }
 0x3d2   : > { %v4227_v18 = vpop.eup %4226 }
 0x3d3   : > { %v2739_v20 = vadd.f32 1.0, %v4227_v18 }
 0x3d4   : > { %v4229_v22 = vpop.eup %4228 }
 0x3d5   : > { %4232 = vrcp.f32 %v2739_v20  ;;  %v2745_v23 = vadd.f32 1.0, %v4229_v22  ;;  %v4231_v8 = vpop.eup %4230 }
 0x3d6   : > { %4234 = vtanh.f32 %v2734_v19  ;;  %v2752_v27 = vadd.f32 1.0, %v4231_v8 }
 0x3d7   : > { %4236 = vrcp.f32 %v2745_v23 }
 0x3e0   : > { %v2799_v25 = vpop.f32.mrf.mxu0  ;;  %v2840_v50 = vpop.f32.mrf.mxu1 }
 0x3e1   : > { %v2847_v47 = vadd.f32 %v2799_v25, %v2760_v24  ;;  %v2849_v19 = vadd.f32 %v2840_v50, %v2762_v16 }
 0x3e2   : > { %v4233_v30 = vpop.eup %4232  ;;  %v2801_v40 = vpop.f32.mrf.mxu0 }
 0x3e3   : > { %v2842_v31 = vpop.f32.mrf.mxu1  ;;  %v4235_v42 = vpop.eup %4234  ;;  %v3738_v29 = vmul.f32 -1.442695, %v2847_v47  ;;  %v2848_v2 = vadd.f32 %v2801_v40, %v2761_v48 }
 0x3e4   : > { %v4237_v28 = vpop.eup %4236  ;;  %v2803_v49 = vpop.f32.mrf.mxu0  ;;  %v2756_v44 = vmul.f32 %v4235_v42, %v4233_v30  ;;  %v2850_v15 = vadd.f32 %v2842_v31, %v2763_v14  ;;  %v2990_v30 = vld [vmem:[#allocation7 + $0x28] sm:$0xff] }
 0x3e5   : > { %v2844_v33 = vpop.f32.mrf.mxu1  ;;  %v2755_v53 = vmul.f32 %v4237_v28, %v5219_v26  ;;  %4238 = vpow2.f32 %v3738_v29  ;;  %v3739_v61 = vmul.f32 -1.442695, %v2848_v2  ;;  %v2991_v42 = vld [vmem:[#allocation7 + $0x68] sm:$0xff] }
 0x3e6   : > { %v2804_v10 = vpop.f32.mrf.mxu0  ;;  %v3740_v17 = vmul.f32 -1.442695, %v2850_v15 }
 0x3e7   : > { %v2845_v11 = vpop.f32.mrf.mxu1  ;;  %v5295_v13 = vadd.f32 %v2756_v44, %v2755_v53  ;;  %4240 = vpow2.f32 %v3739_v61 }
 0x3e8   : > { %4242 = vrcp.f32 %v2752_v27 }
 0x3e9   : > { %4244 = vtanh.f32 %v5295_v13 }
 0x3ea   : > { %4246 = vpow2.f32 %v3740_v17 }
 0x3f2   : > { %v4239_v18 = vpop.eup %4238 }
 0x3f3   : > { %v2854_v20 = vadd.f32 1.0, %v4239_v18 }
 0x3f4   : > { %v4241_v22 = vpop.eup %4240 }
 0x3f5   : > { %v4243_v26 = vpop.eup %4242  ;;  %4248 = vrcp.f32 %v2854_v20  ;;  %v2860_v23 = vadd.f32 1.0, %v4241_v22  ;;  %v2993_v22 = vld [vmem:[#allocation7 + $0x40] sm:$0xff] }
 0x3f6   : > { %v4245_v24 = vpop.eup %4244  ;;  %4250 = vtanh.f32 %v2849_v19 }
 0x3f7   : > { %4252 = vrcp.f32 %v2860_v23  ;;  %v2759_v25 = vmul.f32 %v4245_v24, %v4243_v26  ;;  %v4247_v50 = vpop.eup %4246  ;;  %v2992_v23 = vld [vmem:[#allocation7 + $0x10] sm:$0xff] }
 0x3f8   : > { %v2867_v47 = vadd.f32 1.0, %v4247_v50 }
 0x3f9   : > { %v2879_v48 = vpack.c.bf16 %v2759_v25, %v2759_v25 }
 0x3fa   : > { %4254 = vrcp.f32 %v2867_v47 }
 0x3fb   : > { %2913 = vmatmul.mubr.bf16.vlgmr.msra.gmra.mxu0 %v2879_v48  ;;  %2954 = vmatmul.mubr.bf16.vlgmr.msra.gmra.mxu1 %v2879_v48 }
 0x3fc   : > { %2996 = vmatpush1.bf16.msra.mxu0 %v5589_v58  ;;  %3037 = vmatpush1.bf16.msra.mxu1 %v5590_v9 }
 0x3fd   : > { %2997 = vmatprep.subr.bf16.mxu0 %v5591_v7  ;;  %3038 = vmatprep.subr.bf16.mxu1 %v5592_v52 }
 0x3fe   : > { %3027 = vmatprep.mubr.bf16.mxu0 %v5576_v63  ;;  %3068 = vmatprep.mubr.bf16.mxu1 %v5576_v63 }
 0x400   : > { %2998 = vmatpush1.bf16.msra.mxu0 %v5593_v21  ;;  %3039 = vmatpush1.bf16.msra.mxu1 %v5594_v5 }
 0x401   : > { %2999 = vmatprep.subr.bf16.mxu0 %v5595_v38  ;;  %3040 = vmatprep.subr.bf16.mxu1 %v5596_v56 }
 0x402   : > { %v4249_v58 = vpop.eup %4248 }
 0x403   : > { %v4251_v8 = vpop.eup %4250 }
 0x404   : > { %v4253_v9 = vpop.eup %4252  ;;  %3000 = vmatpush1.bf16.msra.mxu0 %v5597_v6  ;;  %3041 = vmatpush1.bf16.msra.mxu1 %v5598_v57  ;;  %v2871_v7 = vmul.f32 %v4251_v8, %v4249_v58  ;;  %v2875_v6 = vld [vmem:[#allocation6 + $0x60] sm:$0xff] }
 0x405   : > { %v2870_v63 = vmul.f32 %v4253_v9, %v5237_v39  ;;  %3001 = vmatprep.subr.bf16.mxu0 %v5599_v0  ;;  %3042 = vmatprep.subr.bf16.mxu1 %v5600_v55  ;;  %v2876_v55 = vld [vmem:[#allocation6 + $0x70] sm:$0xff] }
 0x407   : > { %v5313_v52 = vadd.f32 %v2871_v7, %v2870_v63  ;;  %v4255_v21 = vpop.eup %4254 }
 0x408   : > { %3002 = vmatpush1.bf16.msra.mxu0 %v5601_v59  ;;  %3043 = vmatpush1.bf16.msra.mxu1 %v5602_v51 }
 0x409   : > { %3003 = vmatprep.subr.bf16.mxu0 %v5603_v46  ;;  %3044 = vmatprep.subr.bf16.mxu1 %v5619_v35  ;;  %4256 = vtanh.f32 %v5313_v52 }
 0x40c   : > { %3004 = vmatpush1.bf16.msra.mxu0 %v5620_v60  ;;  %3045 = vmatpush1.bf16.msra.mxu1 %v5606_v12 }
 0x40d   : > { %3005 = vmatprep.subr.bf16.mxu0 %v5621_v36  ;;  %3046 = vmatprep.subr.bf16.mxu1 %v5622_v32 }
 0x410   : > { %3006 = vmatpush1.bf16.msra.mxu0 %v5623_v34  ;;  %3047 = vmatpush1.bf16.msra.mxu1 %v5610_v54 }
 0x411   : > { %3007 = vmatprep.subr.bf16.mxu0 %v5611_v3  ;;  %3048 = vmatprep.subr.bf16.mxu1 %v5612_v43 }
 0x414   : > { %3008 = vmatpush1.bf16.msra.mxu0 %v5613_v62  ;;  %3049 = vmatpush1.bf16.msra.mxu1 %v5614_v45  ;;  %v2877_v45 = vld [vmem:[#allocation6 + $0x78] sm:$0xff] }
 0x415   : > { %3009 = vmatprep.subr.bf16.mxu0 %v5615_v41  ;;  %3050 = vmatprep.subr.bf16.mxu1 %v5616_v4 }
 0x416   : > { %v4257_v5 = vpop.eup %4256 }
 0x417   : > { %v2874_v38 = vmul.f32 %v4257_v5, %v4255_v21 }
 0x418   : > { %3010 = vmatpush1.bf16.msra.mxu0 %v5617_v1  ;;  %3051 = vmatpush1.bf16.msra.mxu1 %v5618_v37  ;;  %v2878_v37 = vld [vmem:[#allocation6 + $0x28] sm:$0xff] }
 0x419   : > { %v2994_v56 = vpack.c.bf16 %v2874_v38, %v2874_v38 }
 0x41b   : > { %3028 = vmatmul.mubr.bf16.vlgmr.msra.gmra.mxu0 %v2994_v56  ;;  %3069 = vmatmul.mubr.bf16.vlgmr.msra.gmra.mxu1 %v2994_v56 }
 0x4bb   : > { %v2914_v57 = vpop.f32.mrf.mxu0  ;;  %v2955_v0 = vpop.f32.mrf.mxu1 }
 0x4bc   : > { %v2962_v59 = vadd.f32 %v2914_v57, %v2875_v6  ;;  %v2964_v60 = vadd.f32 %v2955_v0, %v2877_v45 }
 0x4bd   : > { %v2916_v51 = vpop.f32.mrf.mxu0  ;;  %v2957_v46 = vpop.f32.mrf.mxu1 }
 0x4be   : > { %v3741_v12 = vmul.f32 -1.442695, %v2962_v59  ;;  %v2963_v41 = vadd.f32 %v2916_v51, %v2876_v55  ;;  %v2965_v62 = vadd.f32 %v2957_v46, %v2878_v37 }
 0x4bf   : > { %v2918_v54 = vpop.f32.mrf.mxu0  ;;  %v2959_v4 = vpop.f32.mrf.mxu1 }
 0x4c0   : > { %4258 = vpow2.f32 %v3741_v12  ;;  %v3742_v3 = vmul.f32 -1.442695, %v2963_v41  ;;  %v3743_v39 = vmul.f32 -1.442695, %v2965_v62 }
 0x4c1   : > { %v2919_v43 = vpop.f32.mrf.mxu0  ;;  %v2960_v1 = vpop.f32.mrf.mxu1 }
 0x4c2   : > { %4260 = vpow2.f32 %v3742_v3 }
 0x4c3   : > { %4262 = vpow2.f32 %v3743_v39 }
 0x4cd   : > { %v4259_v35 = vpop.eup %4258 }
 0x4ce   : > { %v2969_v36 = vadd.f32 1.0, %v4259_v35 }
 0x4cf   : > { %v4261_v32 = vpop.eup %4260 }
 0x4d0   : > { %4264 = vrcp.f32 %v2969_v36  ;;  %v2975_v34 = vadd.f32 1.0, %v4261_v32  ;;  %v4263_v29 = vpop.eup %4262 }
 0x4d1   : > { %4266 = vtanh.f32 %v2964_v60  ;;  %v2982_v10 = vadd.f32 1.0, %v4263_v29 }
 0x4d2   : > { %4268 = vrcp.f32 %v2975_v34 }
 0x4db   : > { %v3029_v40 = vpop.f32.mrf.mxu0  ;;  %v3070_v31 = vpop.f32.mrf.mxu1 }
 0x4dc   : > { %v3077_v2 = vadd.f32 %v3029_v40, %v2990_v30  ;;  %v3079_v48 = vadd.f32 %v3070_v31, %v2992_v23 }
 0x4dd   : > { %v4265_v28 = vpop.eup %4264  ;;  %v3031_v27 = vpop.f32.mrf.mxu0 }
 0x4de   : > { %v3072_v49 = vpop.f32.mrf.mxu1  ;;  %v4267_v33 = vpop.eup %4266  ;;  %v3744_v44 = vmul.f32 -1.442695, %v3077_v2  ;;  %v3078_v53 = vadd.f32 %v3031_v27, %v2991_v42 }
 0x4df   : > { %v4269_v61 = vpop.eup %4268  ;;  %v3033_v11 = vpop.f32.mrf.mxu0  ;;  %v2986_v15 = vmul.f32 %v4267_v33, %v4265_v28  ;;  %v3080_v26 = vadd.f32 %v3072_v49, %v2993_v22 }
 0x4e0   : > { %v3074_v14 = vpop.f32.mrf.mxu1  ;;  %v2985_v16 = vmul.f32 %v4269_v61, %v5295_v13  ;;  %4270 = vpow2.f32 %v3744_v44  ;;  %v3745_v17 = vmul.f32 -1.442695, %v3078_v53 }
 0x4e1   : > { %v3034_v18 = vpop.f32.mrf.mxu0  ;;  %v3746_v24 = vmul.f32 -1.442695, %v3080_v26 }
 0x4e2   : > { %v3075_v19 = vpop.f32.mrf.mxu1  ;;  %v2987_v20 = vadd.f32 %v2986_v15, %v2985_v16  ;;  %4272 = vpow2.f32 %v3745_v17 }
 0x4e3   : > { %4274 = vrcp.f32 %v2982_v10 }
 0x4e4   : > { %4276 = vtanh.f32 %v2987_v20  ;;  %3106 = vst [vmem:[#allocation3] sm:$0xff] %v2987_v20 }
 0x4e5   : > { %4278 = vpow2.f32 %v3746_v24 }
 0x4ed   : > { %v4271_v25 = vpop.eup %4270 }
 0x4ee   : > { %v3084_v50 = vadd.f32 1.0, %v4271_v25 }
 0x4ef   : > { %v4273_v58 = vpop.eup %4272 }
 0x4f0   : > { %v4275_v8 = vpop.eup %4274  ;;  %4280 = vrcp.f32 %v3084_v50  ;;  %v3090_v13 = vadd.f32 1.0, %v4273_v58 }
 0x4f1   : > { %v4277_v9 = vpop.eup %4276  ;;  %4282 = vtanh.f32 %v3079_v48 }
 0x4f2   : > { %v5335_v47 = vmul.f32 %v4277_v9, %v4275_v8  ;;  %4284 = vrcp.f32 %v3090_v13  ;;  %v4279_v7 = vpop.eup %4278 }
 0x4f3   : > { %v3097_v38 = vadd.f32 1.0, %v4279_v7 }
 0x4f4   : > { %3105 = vst [vmem:[#allocation2] sm:$0xff] %v5335_v47 }
 0x4f5   : > { %4286 = vrcp.f32 %v3097_v38 }
 0x4fd   : > { %v4281_v63 = vpop.eup %4280 }
 0x4fe   : > { %v4283_v21 = vpop.eup %4282 }
 0x4ff   : > { %v4285_v5 = vpop.eup %4284  ;;  %v3101_v56 = vmul.f32 %v4283_v21, %v4281_v63 }
 0x500   : > { %v3100_v6 = vmul.f32 %v4285_v5, %v5313_v52 }
 0x502   : > { %v3102_v57 = vadd.f32 %v3101_v56, %v3100_v6  ;;  %v4287_v0 = vpop.eup %4286 }
 0x504   : > { %4288 = vtanh.f32 %v3102_v57  ;;  %3108 = vst [vmem:[#allocation5] sm:$0xff] %v3102_v57 }
 0x510   : > { %3112 = sbr.rel (%p3747_p4) target bundleno = 1534 (0x5fe), region = 72 }
 0x511   : > { %v4289_v55 = vpop.eup %4288 }
 0x512   : > { %v3104_v59 = vmul.f32 %v4289_v55, %v4287_v0 }
 0x514   : > { %3107 = vst [vmem:[#allocation4] sm:$0xff] %v3104_v59 }
 0x515   : > { %v4290_v51 = vld [vmem:[%s5406_s7 + $0x78] sm:$0xff]   ;;  %v4349_v46 = vmov 0.0   ;;  %v4292_v12 = vld [vmem:[%s5406_s7 + $0x70] sm:$0xff]   ;;  %vm4350_vm0 = vmmov 0   ;;  %v4294_v54 = vld [vmem:[%s5406_s7 + $0x68] sm:$0xff]   ;;  %v3113_v30 = vpack.c.bf16 %v5335_v47, %v5335_v47 }
 0x516   : > { %3801 = vmatprep.subr.bf16.mxu0 %v4349_v46  ;;  %3821 = vmatprep.subr.bf16.mxu1 %v4349_v46  ;;  %v4291_v52 = vld [vmem:[%s5406_s7 + $0x38] sm:$0xff]   ;;  %v4293_v41 = vld [vmem:[%s5406_s7 + $0x30] sm:$0xff]   ;;  %v4295_v4 = vld [vmem:[%s5406_s7 + $0x28] sm:$0xff]  }
 0x517   : > { %3802 = vmatpush3.bf16.msra.mxu0 %v4290_v51  ;;  %3817 = vmatprep.mubr.msk.bf16.mxu0 %vm4350_vm0, %v4349_v46  ;;  %v4296_v3 = vld [vmem:[%s5406_s7 + $0x60] sm:$0xff]   ;;  %v4298_v1 = vld [vmem:[%s5406_s7 + $0x58] sm:$0xff]   ;;  %v4300_v62 = vld [vmem:[%s5406_s7 + $0x50] sm:$0xff]  }
 0x518   : > { %3822 = vmatpush3.bf16.msra.mxu1 %v4291_v52  ;;  %3803 = vmatprep.subr.bf16.mxu0 %v4349_v46  ;;  %v4297_v43 = vld [vmem:[%s5406_s7 + $0x20] sm:$0xff]   ;;  %v4299_v37 = vld [vmem:[%s5406_s7 + $0x18] sm:$0xff]   ;;  %v4301_v45 = vld [vmem:[%s5406_s7 + $0x10] sm:$0xff]  }
 0x519   : > { %3823 = vmatprep.subr.bf16.mxu1 %v4349_v46  ;;  %3837 = vmatprep.mubr.msk.bf16.mxu1 %vm4350_vm0, %v4349_v46  ;;  %v4302_v39 = vld [vmem:[%s5406_s7 + $0x48] sm:$0xff]   ;;  %v4304_v60 = vld [vmem:[%s5406_s7 + $0x40] sm:$0xff]  }
 0x51a   : > { %v4303_v35 = vld [vmem:[%s5406_s7 + $0x8] sm:$0xff]   ;;  %v3130_v36 = vld [vmem:[#allocation8] sm:$0xff] }
 0x51b   : > { %3804 = vmatpush3.bf16.msra.mxu0 %v4292_v12  ;;  %v4305_v32 = vld [vmem:[%s5406_s7] sm:$0xff]   ;;  %v3131_v34 = vpack.c.bf16 %v3130_v36, %v3130_v36 }
 0x51c   : > { %3824 = vmatpush3.bf16.msra.mxu1 %v4293_v41  ;;  %3805 = vmatprep.subr.bf16.mxu0 %v4349_v46  ;;  %v3780_v42 = vld [vmem:[%s5407_s8] ss:$0 sm:$0xff] }
 0x51d   : > { %3825 = vmatprep.subr.bf16.mxu1 %v4349_v46 }
 0x51f   : > { %3806 = vmatpush3.bf16.msra.mxu0 %v4294_v54 }
 0x520   : > { %3826 = vmatpush3.bf16.msra.mxu1 %v4295_v4  ;;  %3807 = vmatprep.subr.bf16.mxu0 %v4349_v46 }
 0x521   : > { %3827 = vmatprep.subr.bf16.mxu1 %v4349_v46 }
 0x523   : > { %3808 = vmatpush3.bf16.msra.mxu0 %v4296_v3 }
 0x524   : > { %3828 = vmatpush3.bf16.msra.mxu1 %v4297_v43  ;;  %3809 = vmatprep.subr.bf16.mxu0 %v4349_v46 }
 0x525   : > { %3829 = vmatprep.subr.bf16.mxu1 %v4349_v46 }
 0x527   : > { %3810 = vmatpush3.bf16.msra.mxu0 %v4298_v1 }
 0x528   : > { %3830 = vmatpush3.bf16.msra.mxu1 %v4299_v37  ;;  %3811 = vmatprep.subr.bf16.mxu0 %v4349_v46 }
 0x529   : > { %3831 = vmatprep.subr.bf16.mxu1 %v4349_v46 }
 0x52b   : > { %3812 = vmatpush3.bf16.msra.mxu0 %v4300_v62 }
 0x52c   : > { %3832 = vmatpush3.bf16.msra.mxu1 %v4301_v45  ;;  %3813 = vmatprep.subr.bf16.mxu0 %v4349_v46 }
 0x52d   : > { %3833 = vmatprep.subr.bf16.mxu1 %v4349_v46 }
 0x52f   : > { %3814 = vmatpush3.bf16.msra.mxu0 %v4302_v39 }
 0x530   : > { %3834 = vmatpush3.bf16.msra.mxu1 %v4303_v35  ;;  %3815 = vmatprep.subr.bf16.mxu0 %v4349_v46 }
 0x531   : > { %3835 = vmatprep.subr.bf16.mxu1 %v4349_v46 }
 0x533   : > { %3816 = vmatpush3.bf16.msra.mxu0 %v4304_v60 }
 0x534   : > { %3836 = vmatpush3.bf16.msra.mxu1 %v4305_v32 }
 0x536   : > { %3818 = vmatmul.mubr.bf16.vlgmr.msra.gmra.mxu0 %v3131_v34 }
 0x537   : > { %3838 = vmatmul.mubr.bf16.vlgmr.msra.gmra.mxu1 %v3113_v30 }
 0x5f6   : > { %v3231_v40 = vpop.f32.mrf.mxu0 }
 0x5f7   : > { %v3319_v31 = vpop.f32.mrf.mxu1 }
 0x5f8   : > { %v3320_v29 = vadd.f32 %v3319_v31, %v3231_v40  ;;  %v3819_v2 = vpop.f32.mrf.mxu0 }
 0x5f9   : > { %v3839_v28 = vpop.f32.mrf.mxu1 }
 0x5fa   : > { %v3332_v27 = vadd.f32 %v3780_v42, %v3320_v29  ;;  %v3234_v49 = vpop.f32.mrf.mxu0 }
 0x5fb   : > { %v3322_v33 = vpop.f32.mrf.mxu1 }
 0x5fc   : > { %3333 = vst [vmem:[%s5408_s9] sm:$0xff] %v3332_v27  ;;  %v3820_v44 = vpop.f32.mrf.mxu0 }
 0x5fd   : > { %v3840_v53 = vpop.f32.mrf.mxu1 }
 0x5fe PF: > { %s20_s30 = sadd.s32 1, %s4342_s30  }
 0x5ff   : > { %p17_p5 = scmp.ge.s32.totalorder %s20_s30, 4  }
 0x601   :  { %19 = sbr.rel (!%p17_p5) target bundleno = 1 (0x1), region = 114 }
 0x606   :  { %3345 = vsyncpa [#allocation10], 1 }
 0x607   :  { %3347 = vsyncpa [#allocation10 + $0x1], 1 }

</bundles_post_ra>
